<compile_context>
chip_gen: v5e
topology: v5e:2x2
jax: 0.10.0
libtpu: 0.0.40
codegen_flags: <defaults>
</compile_context>

<pallas_src>
import functools

import jax
import jax.numpy as jnp
import numpy as np
from jax.experimental import pallas as pl
from jax.experimental.pallas import tpu as pltpu


# ----------------------------------------------------------------------------
# Fused down_block kernel (4 phases x T row-tiles).
# ----------------------------------------------------------------------------
def down_block_kernel(x_ref, w1_ref, g1_ref, be1_ref, w2_ref, g2_ref, be2_ref,
                      o_ref,
                      xp_ref, y1_ref, y2_ref, s1_ref, s2_ref, *, eps):
    ph = pl.program_id(0)            # 0: pool, 1: conv1, 2: bn1+conv2, 3: bn2+out
    t = pl.program_id(1)             # pooled-row tile index

    n, th, wo, cout = o_ref.shape    # (N, tile_h, W2, Cout)
    cin = w1_ref.shape[1]
    h2 = y2_ref.shape[1]             # pooled height
    mt = n * th * wo                 # matmul rows handled per tile
    mtot = n * h2 * wo               # total rows per channel (BatchNorm count)
    r0 = t * th                      # first pooled row of this tile

    # ---- one-time init: zero halos (== SAME zero padding) and stat scratch ----
    @pl.when(jnp.logical_and(ph == 0, t == 0))
    def _init():
        xp_ref[...] = jnp.zeros_like(xp_ref)
        y1_ref[...] = jnp.zeros_like(y1_ref)
        s1_ref[...] = jnp.zeros_like(s1_ref)
        s2_ref[...] = jnp.zeros_like(s2_ref)

    # ---- phase 0: 2x2 / stride-2 max-pool of the streamed input tile ----------
    @pl.when(ph == 0)
    def _pool():
        x = x_ref[...]                                    # (N, 2*th, W2, 2*Cin) bf16
        x = x.reshape(n, th, 2, wo, 2 * cin)              # leading-dim split only
        xh = jnp.maximum(x[:, :, 0], x[:, :, 1])          # H pairs  -> (N, th, W2, 2*Cin)
        xp = jnp.maximum(xh[..., :cin], xh[..., cin:])    # W pairs  -> (N, th, W2, Cin)
        xp_ref[:, pl.ds(r0 + 1, th), 1:wo + 1, :] = xp    # interior; halo stays 0

    # ---- phase 1: conv1 as 9 accumulating bf16 matmuls + BN1 sum/sumsq --------
    @pl.when(ph == 1)
    def _conv1():
        acc = jnp.zeros((mt, cout), jnp.float32)
        for k in range(9):
            dy, dx = k // 3, k % 3
            patch = xp_ref[:, pl.ds(r0 + dy, th), dx:dx + wo, :].reshape(mt, cin)
            acc = acc + jnp.dot(patch, w1_ref[k],
                                preferred_element_type=jnp.float32)
        s1_ref[0:1, :] += jnp.sum(acc, axis=0, keepdims=True)
        s1_ref[1:2, :] += jnp.sum(acc * acc, axis=0, keepdims=True)
        # conv bias omitted: cancels under the training-mode BN mean subtraction.
        y1_ref[:, pl.ds(r0 + 1, th), 1:wo + 1, :] = (
            acc.reshape(n, th, wo, cout).astype(y1_ref.dtype))

    # ---- phase 2: BN1 + ReLU (FMA+max) -> conv2 (9-tap) + BN2 sum/sumsq -------
    @pl.when(ph == 2)
    def _bn1_conv2():
        inv = jnp.float32(1.0 / mtot)
        mean1 = s1_ref[0:1, :] * inv
        var1 = jnp.maximum(s1_ref[1:2, :] * inv - mean1 * mean1, 0.0)
        scale1 = (g1_ref[...] * jax.lax.rsqrt(var1 + eps)).reshape(1, 1, 1, cout)
        shift1 = (be1_ref[...].reshape(1, 1, 1, cout)
                  - mean1.reshape(1, 1, 1, cout) * scale1)

        raw = y1_ref[:, pl.ds(r0, th + 2), :, :].astype(jnp.float32)
        a = jnp.maximum(raw * scale1 + shift1, 0.0)       # BN1 + ReLU (FMA + max)
        # Re-zero the SAME-padding halo of the *post* BN/ReLU activation.
        prow = jax.lax.broadcasted_iota(jnp.int32, a.shape, 1) + r0
        pcol = jax.lax.broadcasted_iota(jnp.int32, a.shape, 2)
        interior = (prow >= 1) & (prow <= h2) & (pcol >= 1) & (pcol <= wo)
        a = jnp.where(interior, a, 0.0).astype(jnp.bfloat16)

        acc = jnp.zeros((mt, cout), jnp.float32)
        for k in range(9):
            dy, dx = k // 3, k % 3
            patch = a[:, dy:dy + th, dx:dx + wo, :].reshape(mt, cout)
            acc = acc + jnp.dot(patch, w2_ref[k],
                                preferred_element_type=jnp.float32)
        s2_ref[0:1, :] += jnp.sum(acc, axis=0, keepdims=True)
        s2_ref[1:2, :] += jnp.sum(acc * acc, axis=0, keepdims=True)
        y2_ref[:, pl.ds(r0, th), :, :] = acc.reshape(n, th, wo, cout)

    # ---- phase 3: BN2 + ReLU -> output tile (pipelined HBM writeback) ---------
    @pl.when(ph == 3)
    def _bn2_out():
        inv = jnp.float32(1.0 / mtot)
        mean2 = s2_ref[0:1, :] * inv
        var2 = jnp.maximum(s2_ref[1:2, :] * inv - mean2 * mean2, 0.0)
        scale2 = (g2_ref[...] * jax.lax.rsqrt(var2 + eps)).reshape(1, 1, 1, cout)
        shift2 = (be2_ref[...].reshape(1, 1, 1, cout)
                  - mean2.reshape(1, 1, 1, cout) * scale2)
        z = y2_ref[:, pl.ds(r0, th), :, :]
        o_ref[...] = jnp.maximum(z * scale2 + shift2, 0.0).astype(o_ref.dtype)


# ----------------------------------------------------------------------------
# Wrapper: layout glue + BlockSpecs / grid.
# ----------------------------------------------------------------------------
def down_block_forward(x_nchw, params, *, eps=1e-5, tile_h=None):
    n, cin, h, w = x_nchw.shape
    assert h % 2 == 0 and w % 2 == 0, "MaxPool2d(2) expects even H and W"
    h2, w2 = h // 2, w // 2
    cout = params["w1"].shape[-1]

    if tile_h is None:
        tile_h = next(t for t in (16, 8, 4, 2, 1) if h2 % t == 0)
    assert h2 % tile_h == 0
    num_tiles = h2 // tile_h

    # NCHW f32 -> NHWC bf16, with the W-pooling pairs packed into lanes:
    # (N, H, W2, 2*Cin).  The reshape is a free contiguous regroup.
    x_pk = jnp.transpose(x_nchw, (0, 2, 3, 1)).astype(jnp.bfloat16)
    x_pk = x_pk.reshape(n, h, w2, 2 * cin)

    # HWIO weights -> (9, Cin, Cout) tap form (tap k = 3*dy + dx), bf16 operands.
    w1f = params["w1"].reshape(9, cin, cout).astype(jnp.bfloat16)
    w2f = params["w2"].reshape(9, cout, cout).astype(jnp.bfloat16)
    g1 = params["g1"].reshape(1, cout).astype(jnp.float32)
    be1 = params["be1"].reshape(1, cout).astype(jnp.float32)
    g2 = params["g2"].reshape(1, cout).astype(jnp.float32)
    be2 = params["be2"].reshape(1, cout).astype(jnp.float32)

    in_specs = [
        # Raw input: streamed per-tile only during phase 0 (fixed block otherwise).
        pl.BlockSpec((n, 2 * tile_h, w2, 2 * cin),
                     lambda ph, t: (0, jnp.where(ph == 0, t, 0), 0, 0)),
        # Weights / BN params: constant-index blocks -> resident across all tiles.
        pl.BlockSpec((9, cin, cout), lambda ph, t: (0, 0, 0)),
        pl.BlockSpec((1, cout), lambda ph, t: (0, 0)),
        pl.BlockSpec((1, cout), lambda ph, t: (0, 0)),
        pl.BlockSpec((9, cout, cout), lambda ph, t: (0, 0, 0)),
        pl.BlockSpec((1, cout), lambda ph, t: (0, 0)),
        pl.BlockSpec((1, cout), lambda ph, t: (0, 0)),
    ]
    # Output blocks are only produced (and written back) during phase 3.
    out_spec = pl.BlockSpec((n, tile_h, w2, cout),
                            lambda ph, t: (0, jnp.where(ph == 3, t, 0), 0, 0))

    scratch = [
        pltpu.VMEM((n, h2 + 2, w2 + 2, cin), jnp.bfloat16),   # pooled input + SAME pad
        pltpu.VMEM((n, h2 + 2, w2 + 2, cout), jnp.bfloat16),  # conv1 raw (+halo space)
        pltpu.VMEM((n, h2, w2, cout), jnp.float32),           # conv2 raw
        pltpu.VMEM((2, cout), jnp.float32),                   # BN1 sum / sumsq (f32)
        pltpu.VMEM((2, cout), jnp.float32),                   # BN2 sum / sumsq (f32)
    ]

    out_nhwc = pl.pallas_call(
        functools.partial(down_block_kernel, eps=eps),
        out_shape=jax.ShapeDtypeStruct((n, h2, w2, cout), jnp.float32),
        grid_spec=pltpu.PrefetchScalarGridSpec(
            num_scalar_prefetch=0,
            grid=(4, num_tiles),                 # (phase, row-tile), phase-major
            in_specs=in_specs,
            out_specs=out_spec,
            scratch_shapes=scratch),
        compiler_params=pltpu.CompilerParams(
            dimension_semantics=("arbitrary", "arbitrary"),
            vmem_limit_bytes=64 * 1024 * 1024),
    )(x_pk, w1f, g1, be1, w2f, g2, be2)

    # TODO(synk): keep NHWC if downstream consumes it; NCHW kept to mirror PyTorch.
    return jnp.transpose(out_nhwc, (0, 3, 1, 2)).astype(x_nchw.dtype)


# ----------------------------------------------------------------------------
# Pure-JAX (XLA, f32) reference for the correctness check (includes conv biases,
# mirroring the PyTorch module exactly; the bias cancels under training BN).
# ----------------------------------------------------------------------------
def reference_forward(x_nchw, params, eps=1e-5):
    x = jax.lax.reduce_window(x_nchw, -jnp.inf, jax.lax.max,
                              (1, 1, 2, 2), (1, 1, 2, 2), "VALID")

    def conv_bn_relu(x, w_hwio, b, g, be):
        w_oihw = jnp.transpose(w_hwio, (3, 2, 0, 1))
        y = jax.lax.conv_general_dilated(
            x, w_oihw, (1, 1), "SAME",
            dimension_numbers=("NCHW", "OIHW", "NCHW"))
        y = y + b.reshape(1, -1, 1, 1)
        m = y.mean(axis=(0, 2, 3), keepdims=True)
        v = ((y - m) ** 2).mean(axis=(0, 2, 3), keepdims=True)
        y = (y - m) * jax.lax.rsqrt(v + eps) * g.reshape(1, -1, 1, 1) \
            + be.reshape(1, -1, 1, 1)
        return jnp.maximum(y, 0.0)

    x = conv_bn_relu(x, params["w1"], params["b1"], params["g1"], params["be1"])
    x = conv_bn_relu(x, params["w2"], params["b2"], params["g2"], params["be2"])
    return x


if __name__ == "__main__":
    N, C_IN, C_OUT, H, W = 2, 4, 8, 16, 16

    key = jax.random.PRNGKey(0)
    kx, kw1, kb1, kw2, kb2, kg1, kbe1, kg2, kbe2 = jax.random.split(key, 9)

    x = jax.random.normal(kx, (N, C_IN, H, W), dtype=jnp.float32)

    params = {
        # conv weights stored HWIO (kernel-friendly for NHWC / channel-last matmuls)
        "w1": jax.random.normal(kw1, (3, 3, C_IN, C_OUT), jnp.float32) * 0.1,
        "b1": jax.random.normal(kb1, (C_OUT,), jnp.float32) * 0.1,   # reference only
        "g1": 1.0 + 0.1 * jax.random.normal(kg1, (C_OUT,), jnp.float32),
        "be1": 0.1 * jax.random.normal(kbe1, (C_OUT,), jnp.float32),
        "w2": jax.random.normal(kw2, (3, 3, C_OUT, C_OUT), jnp.float32) * 0.1,
        "b2": jax.random.normal(kb2, (C_OUT,), jnp.float32) * 0.1,   # reference only
        "g2": 1.0 + 0.1 * jax.random.normal(kg2, (C_OUT,), jnp.float32),
        "be2": 0.1 * jax.random.normal(kbe2, (C_OUT,), jnp.float32),
    }

    fwd = jax.jit(functools.partial(down_block_forward, tile_h=4))  # 2 row tiles
    out = jax.block_until_ready(fwd(x, params))

    ref = jax.block_until_ready(reference_forward(x, params))
    assert out.shape == (N, C_OUT, H // 2, W // 2), out.shape
    # bf16 MXU operands -> loosened tolerance (stats/accumulation stay f32).
    np.testing.assert_allclose(np.asarray(out), np.asarray(ref),
                               rtol=5e-2, atol=5e-2)

    print("KERNEL_OK")
</pallas_src>

<mosaic_0001>
module attributes {stable_mosaic.version = 11 : i64} {
  func.func @down_block_kernel(%arg0: i32, %arg1: i32, %arg2: memref<2x8x8x8xbf16, #tpu.memory_space<vmem>>, %arg3: memref<9x4x8xbf16, #tpu.memory_space<vmem>>, %arg4: memref<1x8xf32, #tpu.memory_space<vmem>>, %arg5: memref<1x8xf32, #tpu.memory_space<vmem>>, %arg6: memref<9x8x8xbf16, #tpu.memory_space<vmem>>, %arg7: memref<1x8xf32, #tpu.memory_space<vmem>>, %arg8: memref<1x8xf32, #tpu.memory_space<vmem>>, %arg9: memref<2x4x8x8xf32, #tpu.memory_space<vmem>>, %arg10: memref<2x10x10x4xbf16, #tpu.memory_space<vmem>>, %arg11: memref<2x10x10x8xbf16, #tpu.memory_space<vmem>>, %arg12: memref<2x8x8x8xf32, #tpu.memory_space<vmem>>, %arg13: memref<2x8xf32, #tpu.memory_space<vmem>>, %arg14: memref<2x8xf32, #tpu.memory_space<vmem>>) attributes {dimension_semantics = [#tpu.dimension_semantics<arbitrary>, #tpu.dimension_semantics<arbitrary>], iteration_bounds = array<i64: 4, 2>, scalar_prefetch = 0 : i64, scratch_operands = 5 : i64, tpu.core_type = #tpu.core_type<tc>, window_params = [{transform_indices = @transform_0, window_bounds = array<i64: 2, 8, 8, 8>}, {pipeline_mode = #tpu.pipeline_mode<synchronous>, transform_indices = @transform_1, window_bounds = array<i64: 9, 4, 8>}, {pipeline_mode = #tpu.pipeline_mode<synchronous>, transform_indices = @transform_2, window_bounds = array<i64: 1, 8>}, {pipeline_mode = #tpu.pipeline_mode<synchronous>, transform_indices = @transform_3, window_bounds = array<i64: 1, 8>}, {pipeline_mode = #tpu.pipeline_mode<synchronous>, transform_indices = @transform_4, window_bounds = array<i64: 9, 8, 8>}, {pipeline_mode = #tpu.pipeline_mode<synchronous>, transform_indices = @transform_5, window_bounds = array<i64: 1, 8>}, {pipeline_mode = #tpu.pipeline_mode<synchronous>, transform_indices = @transform_6, window_bounds = array<i64: 1, 8>}, {transform_indices = @transform_7, window_bounds = array<i64: 2, 4, 8, 8>}]} {
    %c4_i32 = arith.constant 4 : i32
    %0 = arith.muli %arg1, %c4_i32 : i32
    %c0_i32 = arith.constant 0 : i32
    %1 = arith.cmpi eq, %arg0, %c0_i32 : i32
    %c0_i32_0 = arith.constant 0 : i32
    %2 = arith.cmpi eq, %arg1, %c0_i32_0 : i32
    %3 = arith.andi %1, %2 : i1
    %4 = arith.extui %3 : i1 to i32
    %c0_i32_1 = arith.constant 0 : i32
    %5 = arith.cmpi ne, %4, %c0_i32_1 : i32
    scf.if %5 {
      %cst = arith.constant 0.000000e+00 : bf16
      %18 = vector.broadcast %cst : bf16 to vector<2x10x10x4xbf16>
      %c0 = arith.constant 0 : index
      %c0_7 = arith.constant 0 : index
      %c0_8 = arith.constant 0 : index
      %c0_9 = arith.constant 0 : index
      %19 = vector.load %arg10[%c0, %c0_7, %c0_8, %c0_9] : memref<2x10x10x4xbf16, #tpu.memory_space<vmem>>, vector<2x10x10x4xbf16>
      tpu.vector_store %arg10[%c0, %c0_7, %c0_8, %c0_9], %18 {strides = array<i32>} : memref<2x10x10x4xbf16, #tpu.memory_space<vmem>>, vector<2x10x10x4xbf16>,
      %cst_10 = arith.constant 0.000000e+00 : bf16
      %20 = vector.broadcast %cst_10 : bf16 to vector<2x10x10x8xbf16>
      %c0_11 = arith.constant 0 : index
      %c0_12 = arith.constant 0 : index
      %c0_13 = arith.constant 0 : index
      %c0_14 = arith.constant 0 : index
      %21 = vector.load %arg11[%c0_11, %c0_12, %c0_13, %c0_14] : memref<2x10x10x8xbf16, #tpu.memory_space<vmem>>, vector<2x10x10x8xbf16>
      tpu.vector_store %arg11[%c0_11, %c0_12, %c0_13, %c0_14], %20 {strides = array<i32>} : memref<2x10x10x8xbf16, #tpu.memory_space<vmem>>, vector<2x10x10x8xbf16>,
      %cst_15 = arith.constant 0.000000e+00 : f32
      %22 = vector.broadcast %cst_15 : f32 to vector<2x8xf32>
      %c0_16 = arith.constant 0 : index
      %c0_17 = arith.constant 0 : index
      %23 = vector.load %arg13[%c0_16, %c0_17] : memref<2x8xf32, #tpu.memory_space<vmem>>, vector<2x8xf32>
      tpu.vector_store %arg13[%c0_16, %c0_17], %22 {strides = array<i32>} : memref<2x8xf32, #tpu.memory_space<vmem>>, vector<2x8xf32>,
      %cst_18 = arith.constant 0.000000e+00 : f32
      %24 = vector.broadcast %cst_18 : f32 to vector<2x8xf32>
      %c0_19 = arith.constant 0 : index
      %c0_20 = arith.constant 0 : index
      %25 = vector.load %arg14[%c0_19, %c0_20] : memref<2x8xf32, #tpu.memory_space<vmem>>, vector<2x8xf32>
      tpu.vector_store %arg14[%c0_19, %c0_20], %24 {strides = array<i32>} : memref<2x8xf32, #tpu.memory_space<vmem>>, vector<2x8xf32>,
    } else {
    }
    %c0_i32_2 = arith.constant 0 : i32
    %6 = arith.cmpi eq, %arg0, %c0_i32_2 : i32
    %7 = arith.extui %6 : i1 to i32
    %c0_i32_3 = arith.constant 0 : i32
    %8 = arith.cmpi ne, %7, %c0_i32_3 : i32
    scf.if %8 {
      %c0 = arith.constant 0 : index
      %c0_7 = arith.constant 0 : index
      %c0_8 = arith.constant 0 : index
      %c0_9 = arith.constant 0 : index
      %18 = vector.load %arg2[%c0, %c0_7, %c0_8, %c0_9] : memref<2x8x8x8xbf16, #tpu.memory_space<vmem>>, vector<2x8x8x8xbf16>
      %19 = vector.shape_cast %18 : vector<2x8x8x8xbf16> to vector<2x4x2x8x8xbf16>
      %20 = vector.extract_strided_slice %19 {offsets = [0, 0, 0, 0, 0], sizes = [2, 4, 1, 8, 8], strides = [1, 1, 1, 1, 1]} : vector<2x4x2x8x8xbf16> to vector<2x4x1x8x8xbf16>
      %21 = vector.shape_cast %20 : vector<2x4x1x8x8xbf16> to vector<2x4x8x8xbf16>
      %22 = vector.extract_strided_slice %19 {offsets = [0, 0, 1, 0, 0], sizes = [2, 4, 1, 8, 8], strides = [1, 1, 1, 1, 1]} : vector<2x4x2x8x8xbf16> to vector<2x4x1x8x8xbf16>
      %23 = vector.shape_cast %22 : vector<2x4x1x8x8xbf16> to vector<2x4x8x8xbf16>
      %24 = arith.maximumf %21, %23 : vector<2x4x8x8xbf16>
      %25 = vector.extract_strided_slice %24 {offsets = [0, 0, 0, 0], sizes = [2, 4, 8, 4], strides = [1, 1, 1, 1]} : vector<2x4x8x8xbf16> to vector<2x4x8x4xbf16>
      %26 = vector.extract_strided_slice %24 {offsets = [0, 0, 0, 4], sizes = [2, 4, 8, 4], strides = [1, 1, 1, 1]} : vector<2x4x8x8xbf16> to vector<2x4x8x4xbf16>
      %27 = arith.maximumf %25, %26 : vector<2x4x8x4xbf16>
      %c1_i32_10 = arith.constant 1 : i32
      %28 = arith.addi %0, %c1_i32_10 : i32
      %c0_11 = arith.constant 0 : index
      %29 = arith.index_cast %28 : i32 to index
      %c1 = arith.constant 1 : index
      %c0_12 = arith.constant 0 : index
      %30 = vector.load %arg10[%c0_11, %29, %c1, %c0_12] : memref<2x10x10x4xbf16, #tpu.memory_space<vmem>>, vector<2x4x8x4xbf16>
      tpu.vector_store %arg10[%c0_11, %29, %c1, %c0_12], %27 {strides = array<i32>} : memref<2x10x10x4xbf16, #tpu.memory_space<vmem>>, vector<2x4x8x4xbf16>,
    } else {
    }
    %c1_i32 = arith.constant 1 : i32
    %9 = arith.cmpi eq, %arg0, %c1_i32 : i32
    %10 = arith.extui %9 : i1 to i32
    %c0_i32_4 = arith.constant 0 : i32
    %11 = arith.cmpi ne, %10, %c0_i32_4 : i32
    scf.if %11 {
      %cst = arith.constant 0.000000e+00 : f32
      %18 = vector.broadcast %cst : f32 to vector<64x8xf32>
      %c0_i32_7 = arith.constant 0 : i32
      %19 = arith.addi %0, %c0_i32_7 : i32
      %c0 = arith.constant 0 : index
      %20 = arith.index_cast %19 : i32 to index
      %c0_8 = arith.constant 0 : index
      %c0_9 = arith.constant 0 : index
      %21 = vector.load %arg10[%c0, %20, %c0_8, %c0_9] : memref<2x10x10x4xbf16, #tpu.memory_space<vmem>>, vector<2x4x8x4xbf16>
      %22 = vector.shape_cast %21 : vector<2x4x8x4xbf16> to vector<64x4xbf16>
      %c0_10 = arith.constant 0 : index
      %c0_11 = arith.constant 0 : index
      %c0_12 = arith.constant 0 : index
      %23 = vector.load %arg3[%c0_10, %c0_11, %c0_12] : memref<9x4x8xbf16, #tpu.memory_space<vmem>>, vector<1x4x8xbf16>
      %24 = vector.shape_cast %23 : vector<1x4x8xbf16> to vector<4x8xbf16>
      %cst_13 = arith.constant dense<0.000000e+00> : vector<64x8xf32>
      %25 = tpu.matmul %22, %24, %cst_13 {dimension_numbers = #tpu.dot_dimension_numbers<[1], [0], [0], [1], [0, 0, 1, 1], [], []>} : vector<64x4xbf16>, vector<4x8xbf16>, vector<64x8xf32> -> vector<64x8xf32>
      %26 = arith.addf %18, %25 : vector<64x8xf32>
      %c0_i32_14 = arith.constant 0 : i32
      %27 = arith.addi %0, %c0_i32_14 : i32
      %c0_15 = arith.constant 0 : index
      %28 = arith.index_cast %27 : i32 to index
      %c1 = arith.constant 1 : index
      %c0_16 = arith.constant 0 : index
      %29 = vector.load %arg10[%c0_15, %28, %c1, %c0_16] : memref<2x10x10x4xbf16, #tpu.memory_space<vmem>>, vector<2x4x8x4xbf16>
      %30 = vector.shape_cast %29 : vector<2x4x8x4xbf16> to vector<64x4xbf16>
      %c1_17 = arith.constant 1 : index
      %c0_18 = arith.constant 0 : index
      %c0_19 = arith.constant 0 : index
      %31 = vector.load %arg3[%c1_17, %c0_18, %c0_19] : memref<9x4x8xbf16, #tpu.memory_space<vmem>>, vector<1x4x8xbf16>
      %32 = vector.shape_cast %31 : vector<1x4x8xbf16> to vector<4x8xbf16>
      %cst_20 = arith.constant dense<0.000000e+00> : vector<64x8xf32>
      %33 = tpu.matmul %30, %32, %cst_20 {dimension_numbers = #tpu.dot_dimension_numbers<[1], [0], [0], [1], [0, 0, 1, 1], [], []>} : vector<64x4xbf16>, vector<4x8xbf16>, vector<64x8xf32> -> vector<64x8xf32>
      %34 = arith.addf %26, %33 : vector<64x8xf32>
      %c0_i32_21 = arith.constant 0 : i32
      %35 = arith.addi %0, %c0_i32_21 : i32
      %c0_22 = arith.constant 0 : index
      %36 = arith.index_cast %35 : i32 to index
      %c2 = arith.constant 2 : index
      %c0_23 = arith.constant 0 : index
      %37 = vector.load %arg10[%c0_22, %36, %c2, %c0_23] : memref<2x10x10x4xbf16, #tpu.memory_space<vmem>>, vector<2x4x8x4xbf16>
      %38 = vector.shape_cast %37 : vector<2x4x8x4xbf16> to vector<64x4xbf16>
      %c2_24 = arith.constant 2 : index
      %c0_25 = arith.constant 0 : index
      %c0_26 = arith.constant 0 : index
      %39 = vector.load %arg3[%c2_24, %c0_25, %c0_26] : memref<9x4x8xbf16, #tpu.memory_space<vmem>>, vector<1x4x8xbf16>
      %40 = vector.shape_cast %39 : vector<1x4x8xbf16> to vector<4x8xbf16>
      %cst_27 = arith.constant dense<0.000000e+00> : vector<64x8xf32>
      %41 = tpu.matmul %38, %40, %cst_27 {dimension_numbers = #tpu.dot_dimension_numbers<[1], [0], [0], [1], [0, 0, 1, 1], [], []>} : vector<64x4xbf16>, vector<4x8xbf16>, vector<64x8xf32> -> vector<64x8xf32>
      %42 = arith.addf %34, %41 : vector<64x8xf32>
      %c1_i32_28 = arith.constant 1 : i32
      %43 = arith.addi %0, %c1_i32_28 : i32
      %c0_29 = arith.constant 0 : index
      %44 = arith.index_cast %43 : i32 to index
      %c0_30 = arith.constant 0 : index
      %c0_31 = arith.constant 0 : index
      %45 = vector.load %arg10[%c0_29, %44, %c0_30, %c0_31] : memref<2x10x10x4xbf16, #tpu.memory_space<vmem>>, vector<2x4x8x4xbf16>
      %46 = vector.shape_cast %45 : vector<2x4x8x4xbf16> to vector<64x4xbf16>
      %c3 = arith.constant 3 : index
      %c0_32 = arith.constant 0 : index
      %c0_33 = arith.constant 0 : index
      %47 = vector.load %arg3[%c3, %c0_32, %c0_33] : memref<9x4x8xbf16, #tpu.memory_space<vmem>>, vector<1x4x8xbf16>
      %48 = vector.shape_cast %47 : vector<1x4x8xbf16> to vector<4x8xbf16>
      %cst_34 = arith.constant dense<0.000000e+00> : vector<64x8xf32>
      %49 = tpu.matmul %46, %48, %cst_34 {dimension_numbers = #tpu.dot_dimension_numbers<[1], [0], [0], [1], [0, 0, 1, 1], [], []>} : vector<64x4xbf16>, vector<4x8xbf16>, vector<64x8xf32> -> vector<64x8xf32>
      %50 = arith.addf %42, %49 : vector<64x8xf32>
      %c1_i32_35 = arith.constant 1 : i32
      %51 = arith.addi %0, %c1_i32_35 : i32
      %c0_36 = arith.constant 0 : index
      %52 = arith.index_cast %51 : i32 to index
      %c1_37 = arith.constant 1 : index
      %c0_38 = arith.constant 0 : index
      %53 = vector.load %arg10[%c0_36, %52, %c1_37, %c0_38] : memref<2x10x10x4xbf16, #tpu.memory_space<vmem>>, vector<2x4x8x4xbf16>
      %54 = vector.shape_cast %53 : vector<2x4x8x4xbf16> to vector<64x4xbf16>
      %c4 = arith.constant 4 : index
      %c0_39 = arith.constant 0 : index
      %c0_40 = arith.constant 0 : index
      %55 = vector.load %arg3[%c4, %c0_39, %c0_40] : memref<9x4x8xbf16, #tpu.memory_space<vmem>>, vector<1x4x8xbf16>
      %56 = vector.shape_cast %55 : vector<1x4x8xbf16> to vector<4x8xbf16>
      %cst_41 = arith.constant dense<0.000000e+00> : vector<64x8xf32>
      %57 = tpu.matmul %54, %56, %cst_41 {dimension_numbers = #tpu.dot_dimension_numbers<[1], [0], [0], [1], [0, 0, 1, 1], [], []>} : vector<64x4xbf16>, vector<4x8xbf16>, vector<64x8xf32> -> vector<64x8xf32>
      %58 = arith.addf %50, %57 : vector<64x8xf32>
      %c1_i32_42 = arith.constant 1 : i32
      %59 = arith.addi %0, %c1_i32_42 : i32
      %c0_43 = arith.constant 0 : index
      %60 = arith.index_cast %59 : i32 to index
      %c2_44 = arith.constant 2 : index
      %c0_45 = arith.constant 0 : index
      %61 = vector.load %arg10[%c0_43, %60, %c2_44, %c0_45] : memref<2x10x10x4xbf16, #tpu.memory_space<vmem>>, vector<2x4x8x4xbf16>
      %62 = vector.shape_cast %61 : vector<2x4x8x4xbf16> to vector<64x4xbf16>
      %c5 = arith.constant 5 : index
      %c0_46 = arith.constant 0 : index
      %c0_47 = arith.constant 0 : index
      %63 = vector.load %arg3[%c5, %c0_46, %c0_47] : memref<9x4x8xbf16, #tpu.memory_space<vmem>>, vector<1x4x8xbf16>
      %64 = vector.shape_cast %63 : vector<1x4x8xbf16> to vector<4x8xbf16>
      %cst_48 = arith.constant dense<0.000000e+00> : vector<64x8xf32>
      %65 = tpu.matmul %62, %64, %cst_48 {dimension_numbers = #tpu.dot_dimension_numbers<[1], [0], [0], [1], [0, 0, 1, 1], [], []>} : vector<64x4xbf16>, vector<4x8xbf16>, vector<64x8xf32> -> vector<64x8xf32>
      %66 = arith.addf %58, %65 : vector<64x8xf32>
      %c2_i32_49 = arith.constant 2 : i32
      %67 = arith.addi %0, %c2_i32_49 : i32
      %c0_50 = arith.constant 0 : index
      %68 = arith.index_cast %67 : i32 to index
      %c0_51 = arith.constant 0 : index
      %c0_52 = arith.constant 0 : index
      %69 = vector.load %arg10[%c0_50, %68, %c0_51, %c0_52] : memref<2x10x10x4xbf16, #tpu.memory_space<vmem>>, vector<2x4x8x4xbf16>
      %70 = vector.shape_cast %69 : vector<2x4x8x4xbf16> to vector<64x4xbf16>
      %c6 = arith.constant 6 : index
      %c0_53 = arith.constant 0 : index
      %c0_54 = arith.constant 0 : index
      %71 = vector.load %arg3[%c6, %c0_53, %c0_54] : memref<9x4x8xbf16, #tpu.memory_space<vmem>>, vector<1x4x8xbf16>
      %72 = vector.shape_cast %71 : vector<1x4x8xbf16> to vector<4x8xbf16>
      %cst_55 = arith.constant dense<0.000000e+00> : vector<64x8xf32>
      %73 = tpu.matmul %70, %72, %cst_55 {dimension_numbers = #tpu.dot_dimension_numbers<[1], [0], [0], [1], [0, 0, 1, 1], [], []>} : vector<64x4xbf16>, vector<4x8xbf16>, vector<64x8xf32> -> vector<64x8xf32>
      %74 = arith.addf %66, %73 : vector<64x8xf32>
      %c2_i32_56 = arith.constant 2 : i32
      %75 = arith.addi %0, %c2_i32_56 : i32
      %c0_57 = arith.constant 0 : index
      %76 = arith.index_cast %75 : i32 to index
      %c1_58 = arith.constant 1 : index
      %c0_59 = arith.constant 0 : index
      %77 = vector.load %arg10[%c0_57, %76, %c1_58, %c0_59] : memref<2x10x10x4xbf16, #tpu.memory_space<vmem>>, vector<2x4x8x4xbf16>
      %78 = vector.shape_cast %77 : vector<2x4x8x4xbf16> to vector<64x4xbf16>
      %c7 = arith.constant 7 : index
      %c0_60 = arith.constant 0 : index
      %c0_61 = arith.constant 0 : index
      %79 = vector.load %arg3[%c7, %c0_60, %c0_61] : memref<9x4x8xbf16, #tpu.memory_space<vmem>>, vector<1x4x8xbf16>
      %80 = vector.shape_cast %79 : vector<1x4x8xbf16> to vector<4x8xbf16>
      %cst_62 = arith.constant dense<0.000000e+00> : vector<64x8xf32>
      %81 = tpu.matmul %78, %80, %cst_62 {dimension_numbers = #tpu.dot_dimension_numbers<[1], [0], [0], [1], [0, 0, 1, 1], [], []>} : vector<64x4xbf16>, vector<4x8xbf16>, vector<64x8xf32> -> vector<64x8xf32>
      %82 = arith.addf %74, %81 : vector<64x8xf32>
      %c2_i32_63 = arith.constant 2 : i32
      %83 = arith.addi %0, %c2_i32_63 : i32
      %c0_64 = arith.constant 0 : index
      %84 = arith.index_cast %83 : i32 to index
      %c2_65 = arith.constant 2 : index
      %c0_66 = arith.constant 0 : index
      %85 = vector.load %arg10[%c0_64, %84, %c2_65, %c0_66] : memref<2x10x10x4xbf16, #tpu.memory_space<vmem>>, vector<2x4x8x4xbf16>
      %86 = vector.shape_cast %85 : vector<2x4x8x4xbf16> to vector<64x4xbf16>
      %c8 = arith.constant 8 : index
      %c0_67 = arith.constant 0 : index
      %c0_68 = arith.constant 0 : index
      %87 = vector.load %arg3[%c8, %c0_67, %c0_68] : memref<9x4x8xbf16, #tpu.memory_space<vmem>>, vector<1x4x8xbf16>
      %88 = vector.shape_cast %87 : vector<1x4x8xbf16> to vector<4x8xbf16>
      %cst_69 = arith.constant dense<0.000000e+00> : vector<64x8xf32>
      %89 = tpu.matmul %86, %88, %cst_69 {dimension_numbers = #tpu.dot_dimension_numbers<[1], [0], [0], [1], [0, 0, 1, 1], [], []>} : vector<64x4xbf16>, vector<4x8xbf16>, vector<64x8xf32> -> vector<64x8xf32>
      %90 = arith.addf %82, %89 : vector<64x8xf32>
      %c0_70 = arith.constant 0 : index
      %c0_71 = arith.constant 0 : index
      %91 = vector.load %arg13[%c0_70, %c0_71] : memref<2x8xf32, #tpu.memory_space<vmem>>, vector<1x8xf32>
      %cst_72 = arith.constant dense<0.000000e+00> : vector<8xf32>
      %92 = vector.multi_reduction <add>, %90, %cst_72 [0] : vector<64x8xf32> to vector<8xf32>
      %93 = vector.shape_cast %92 : vector<8xf32> to vector<1x8xf32>
      %94 = arith.addf %91, %93 : vector<1x8xf32>
      %c0_73 = arith.constant 0 : index
      %c0_74 = arith.constant 0 : index
      %95 = vector.load %arg13[%c0_73, %c0_74] : memref<2x8xf32, #tpu.memory_space<vmem>>, vector<1x8xf32>
      tpu.vector_store %arg13[%c0_73, %c0_74], %94 {strides = array<i32>} : memref<2x8xf32, #tpu.memory_space<vmem>>, vector<1x8xf32>,
      %c1_75 = arith.constant 1 : index
      %c0_76 = arith.constant 0 : index
      %96 = vector.load %arg13[%c1_75, %c0_76] : memref<2x8xf32, #tpu.memory_space<vmem>>, vector<1x8xf32>
      %97 = arith.mulf %90, %90 : vector<64x8xf32>
      %cst_77 = arith.constant dense<0.000000e+00> : vector<8xf32>
      %98 = vector.multi_reduction <add>, %97, %cst_77 [0] : vector<64x8xf32> to vector<8xf32>
      %99 = vector.shape_cast %98 : vector<8xf32> to vector<1x8xf32>
      %100 = arith.addf %96, %99 : vector<1x8xf32>
      %c1_78 = arith.constant 1 : index
      %c0_79 = arith.constant 0 : index
      %101 = vector.load %arg13[%c1_78, %c0_79] : memref<2x8xf32, #tpu.memory_space<vmem>>, vector<1x8xf32>
      tpu.vector_store %arg13[%c1_78, %c0_79], %100 {strides = array<i32>} : memref<2x8xf32, #tpu.memory_space<vmem>>, vector<1x8xf32>,
      %102 = vector.shape_cast %90 : vector<64x8xf32> to vector<2x4x8x8xf32>
      %103 = arith.truncf %102 : vector<2x4x8x8xf32> to vector<2x4x8x8xbf16>
      %c1_i32_80 = arith.constant 1 : i32
      %104 = arith.addi %0, %c1_i32_80 : i32
      %c0_81 = arith.constant 0 : index
      %105 = arith.index_cast %104 : i32 to index
      %c1_82 = arith.constant 1 : index
      %c0_83 = arith.constant 0 : index
      %106 = vector.load %arg11[%c0_81, %105, %c1_82, %c0_83] : memref<2x10x10x8xbf16, #tpu.memory_space<vmem>>, vector<2x4x8x8xbf16>
      tpu.vector_store %arg11[%c0_81, %105, %c1_82, %c0_83], %103 {strides = array<i32>} : memref<2x10x10x8xbf16, #tpu.memory_space<vmem>>, vector<2x4x8x8xbf16>,
    } else {
    }
    %c2_i32 = arith.constant 2 : i32
    %12 = arith.cmpi eq, %arg0, %c2_i32 : i32
    %13 = arith.extui %12 : i1 to i32
    %c0_i32_5 = arith.constant 0 : i32
    %14 = arith.cmpi ne, %13, %c0_i32_5 : i32
    scf.if %14 {
      %c0 = arith.constant 0 : index
      %c0_7 = arith.constant 0 : index
      %18 = vector.load %arg13[%c0, %c0_7] : memref<2x8xf32, #tpu.memory_space<vmem>>, vector<1x8xf32>
      %cst = arith.constant 7.812500e-03 : f32
      %19 = vector.broadcast %cst : f32 to vector<1x8xf32>
      %20 = arith.mulf %18, %19 : vector<1x8xf32>
      %c1 = arith.constant 1 : index
      %c0_8 = arith.constant 0 : index
      %21 = vector.load %arg13[%c1, %c0_8] : memref<2x8xf32, #tpu.memory_space<vmem>>, vector<1x8xf32>
      %cst_9 = arith.constant 7.812500e-03 : f32
      %22 = vector.broadcast %cst_9 : f32 to vector<1x8xf32>
      %23 = arith.mulf %21, %22 : vector<1x8xf32>
      %24 = arith.mulf %20, %20 : vector<1x8xf32>
      %25 = arith.subf %23, %24 : vector<1x8xf32>
      %cst_10 = arith.constant 0.000000e+00 : f32
      %26 = vector.broadcast %cst_10 : f32 to vector<1x8xf32>
      %27 = arith.maximumf %25, %26 : vector<1x8xf32>
      %c0_11 = arith.constant 0 : index
      %c0_12 = arith.constant 0 : index
      %28 = vector.load %arg4[%c0_11, %c0_12] : memref<1x8xf32, #tpu.memory_space<vmem>>, vector<1x8xf32>
      %cst_13 = arith.constant 9.99999974E-6 : f32
      %29 = vector.broadcast %cst_13 : f32 to vector<1x8xf32>
      %30 = arith.addf %27, %29 : vector<1x8xf32>
      %31 = math.rsqrt %30 : vector<1x8xf32>
      %32 = arith.mulf %28, %31 : vector<1x8xf32>
      %33 = vector.shape_cast %32 : vector<1x8xf32> to vector<1x1x1x8xf32>
      %c0_14 = arith.constant 0 : index
      %c0_15 = arith.constant 0 : index
      %34 = vector.load %arg5[%c0_14, %c0_15] : memref<1x8xf32, #tpu.memory_space<vmem>>, vector<1x8xf32>
      %35 = vector.shape_cast %34 : vector<1x8xf32> to vector<1x1x1x8xf32>
      %36 = vector.shape_cast %20 : vector<1x8xf32> to vector<1x1x1x8xf32>
      %37 = arith.mulf %36, %33 : vector<1x1x1x8xf32>
      %38 = arith.subf %35, %37 : vector<1x1x1x8xf32>
      %c0_16 = arith.constant 0 : index
      %39 = arith.index_cast %0 : i32 to index
      %c0_17 = arith.constant 0 : index
      %c0_18 = arith.constant 0 : index
      %40 = vector.load %arg11[%c0_16, %39, %c0_17, %c0_18] : memref<2x10x10x8xbf16, #tpu.memory_space<vmem>>, vector<2x6x10x8xbf16>
      %41 = arith.extf %40 : vector<2x6x10x8xbf16> to vector<2x6x10x8xf32>
      %42 = vector.broadcast %33 : vector<1x1x1x8xf32> to vector<2x6x10x8xf32>
      %43 = arith.mulf %41, %42 : vector<2x6x10x8xf32>
      %44 = vector.broadcast %38 : vector<1x1x1x8xf32> to vector<2x6x10x8xf32>
      %45 = arith.addf %43, %44 : vector<2x6x10x8xf32>
      %cst_19 = arith.constant 0.000000e+00 : f32
      %46 = vector.broadcast %cst_19 : f32 to vector<2x6x10x8xf32>
      %47 = arith.maximumf %45, %46 : vector<2x6x10x8xf32>
      %48 = tpu.iota {dimensions = array<i32: 1>} : vector<2x6x10x8xi32>
      %49 = vector.broadcast %0 : i32 to vector<2x6x10x8xi32>
      %50 = arith.addi %48, %49 : vector<2x6x10x8xi32>
      %51 = tpu.iota {dimensions = array<i32: 2>} : vector<2x6x10x8xi32>
      %c1_i32_20 = arith.constant 1 : i32
      %52 = vector.broadcast %c1_i32_20 : i32 to vector<2x6x10x8xi32>
      %53 = arith.cmpi sge, %50, %52 : vector<2x6x10x8xi32>
      %c8_i32 = arith.constant 8 : i32
      %54 = vector.broadcast %c8_i32 : i32 to vector<2x6x10x8xi32>
      %55 = arith.cmpi sle, %50, %54 : vector<2x6x10x8xi32>
      %56 = arith.andi %53, %55 : vector<2x6x10x8xi1>
      %c1_i32_21 = arith.constant 1 : i32
      %57 = vector.broadcast %c1_i32_21 : i32 to vector<2x6x10x8xi32>
      %58 = arith.cmpi sge, %51, %57 : vector<2x6x10x8xi32>
      %59 = arith.andi %56, %58 : vector<2x6x10x8xi1>
      %c8_i32_22 = arith.constant 8 : i32
      %60 = vector.broadcast %c8_i32_22 : i32 to vector<2x6x10x8xi32>
      %61 = arith.cmpi sle, %51, %60 : vector<2x6x10x8xi32>
      %62 = arith.andi %59, %61 : vector<2x6x10x8xi1>
      %cst_23 = arith.constant 0.000000e+00 : f32
      %63 = vector.broadcast %cst_23 : f32 to vector<2x6x10x8xf32>
      %64 = arith.select %62, %47, %63 : vector<2x6x10x8xi1>, vector<2x6x10x8xf32>
      %65 = arith.truncf %64 : vector<2x6x10x8xf32> to vector<2x6x10x8xbf16>
      %cst_24 = arith.constant 0.000000e+00 : f32
      %66 = vector.broadcast %cst_24 : f32 to vector<64x8xf32>
      %67 = vector.extract_strided_slice %65 {offsets = [0, 0, 0, 0], sizes = [2, 4, 8, 8], strides = [1, 1, 1, 1]} : vector<2x6x10x8xbf16> to vector<2x4x8x8xbf16>
      %68 = vector.shape_cast %67 : vector<2x4x8x8xbf16> to vector<64x8xbf16>
      %c0_25 = arith.constant 0 : index
      %c0_26 = arith.constant 0 : index
      %c0_27 = arith.constant 0 : index
      %69 = vector.load %arg6[%c0_25, %c0_26, %c0_27] : memref<9x8x8xbf16, #tpu.memory_space<vmem>>, vector<1x8x8xbf16>
      %70 = vector.shape_cast %69 : vector<1x8x8xbf16> to vector<8x8xbf16>
      %cst_28 = arith.constant dense<0.000000e+00> : vector<64x8xf32>
      %71 = tpu.matmul %68, %70, %cst_28 {dimension_numbers = #tpu.dot_dimension_numbers<[1], [0], [0], [1], [0, 0, 1, 1], [], []>} : vector<64x8xbf16>, vector<8x8xbf16>, vector<64x8xf32> -> vector<64x8xf32>
      %72 = arith.addf %66, %71 : vector<64x8xf32>
      %73 = vector.extract_strided_slice %65 {offsets = [0, 0, 1, 0], sizes = [2, 4, 8, 8], strides = [1, 1, 1, 1]} : vector<2x6x10x8xbf16> to vector<2x4x8x8xbf16>
      %74 = vector.shape_cast %73 : vector<2x4x8x8xbf16> to vector<64x8xbf16>
      %c1_29 = arith.constant 1 : index
      %c0_30 = arith.constant 0 : index
      %c0_31 = arith.constant 0 : index
      %75 = vector.load %arg6[%c1_29, %c0_30, %c0_31] : memref<9x8x8xbf16, #tpu.memory_space<vmem>>, vector<1x8x8xbf16>
      %76 = vector.shape_cast %75 : vector<1x8x8xbf16> to vector<8x8xbf16>
      %cst_32 = arith.constant dense<0.000000e+00> : vector<64x8xf32>
      %77 = tpu.matmul %74, %76, %cst_32 {dimension_numbers = #tpu.dot_dimension_numbers<[1], [0], [0], [1], [0, 0, 1, 1], [], []>} : vector<64x8xbf16>, vector<8x8xbf16>, vector<64x8xf32> -> vector<64x8xf32>
      %78 = arith.addf %72, %77 : vector<64x8xf32>
      %79 = vector.extract_strided_slice %65 {offsets = [0, 0, 2, 0], sizes = [2, 4, 8, 8], strides = [1, 1, 1, 1]} : vector<2x6x10x8xbf16> to vector<2x4x8x8xbf16>
      %80 = vector.shape_cast %79 : vector<2x4x8x8xbf16> to vector<64x8xbf16>
      %c2 = arith.constant 2 : index
      %c0_33 = arith.constant 0 : index
      %c0_34 = arith.constant 0 : index
      %81 = vector.load %arg6[%c2, %c0_33, %c0_34] : memref<9x8x8xbf16, #tpu.memory_space<vmem>>, vector<1x8x8xbf16>
      %82 = vector.shape_cast %81 : vector<1x8x8xbf16> to vector<8x8xbf16>
      %cst_35 = arith.constant dense<0.000000e+00> : vector<64x8xf32>
      %83 = tpu.matmul %80, %82, %cst_35 {dimension_numbers = #tpu.dot_dimension_numbers<[1], [0], [0], [1], [0, 0, 1, 1], [], []>} : vector<64x8xbf16>, vector<8x8xbf16>, vector<64x8xf32> -> vector<64x8xf32>
      %84 = arith.addf %78, %83 : vector<64x8xf32>
      %85 = vector.extract_strided_slice %65 {offsets = [0, 1, 0, 0], sizes = [2, 4, 8, 8], strides = [1, 1, 1, 1]} : vector<2x6x10x8xbf16> to vector<2x4x8x8xbf16>
      %86 = vector.shape_cast %85 : vector<2x4x8x8xbf16> to vector<64x8xbf16>
      %c3 = arith.constant 3 : index
      %c0_36 = arith.constant 0 : index
      %c0_37 = arith.constant 0 : index
      %87 = vector.load %arg6[%c3, %c0_36, %c0_37] : memref<9x8x8xbf16, #tpu.memory_space<vmem>>, vector<1x8x8xbf16>
      %88 = vector.shape_cast %87 : vector<1x8x8xbf16> to vector<8x8xbf16>
      %cst_38 = arith.constant dense<0.000000e+00> : vector<64x8xf32>
      %89 = tpu.matmul %86, %88, %cst_38 {dimension_numbers = #tpu.dot_dimension_numbers<[1], [0], [0], [1], [0, 0, 1, 1], [], []>} : vector<64x8xbf16>, vector<8x8xbf16>, vector<64x8xf32> -> vector<64x8xf32>
      %90 = arith.addf %84, %89 : vector<64x8xf32>
      %91 = vector.extract_strided_slice %65 {offsets = [0, 1, 1, 0], sizes = [2, 4, 8, 8], strides = [1, 1, 1, 1]} : vector<2x6x10x8xbf16> to vector<2x4x8x8xbf16>
      %92 = vector.shape_cast %91 : vector<2x4x8x8xbf16> to vector<64x8xbf16>
      %c4 = arith.constant 4 : index
      %c0_39 = arith.constant 0 : index
      %c0_40 = arith.constant 0 : index
      %93 = vector.load %arg6[%c4, %c0_39, %c0_40] : memref<9x8x8xbf16, #tpu.memory_space<vmem>>, vector<1x8x8xbf16>
      %94 = vector.shape_cast %93 : vector<1x8x8xbf16> to vector<8x8xbf16>
      %cst_41 = arith.constant dense<0.000000e+00> : vector<64x8xf32>
      %95 = tpu.matmul %92, %94, %cst_41 {dimension_numbers = #tpu.dot_dimension_numbers<[1], [0], [0], [1], [0, 0, 1, 1], [], []>} : vector<64x8xbf16>, vector<8x8xbf16>, vector<64x8xf32> -> vector<64x8xf32>
      %96 = arith.addf %90, %95 : vector<64x8xf32>
      %97 = vector.extract_strided_slice %65 {offsets = [0, 1, 2, 0], sizes = [2, 4, 8, 8], strides = [1, 1, 1, 1]} : vector<2x6x10x8xbf16> to vector<2x4x8x8xbf16>
      %98 = vector.shape_cast %97 : vector<2x4x8x8xbf16> to vector<64x8xbf16>
      %c5 = arith.constant 5 : index
      %c0_42 = arith.constant 0 : index
      %c0_43 = arith.constant 0 : index
      %99 = vector.load %arg6[%c5, %c0_42, %c0_43] : memref<9x8x8xbf16, #tpu.memory_space<vmem>>, vector<1x8x8xbf16>
      %100 = vector.shape_cast %99 : vector<1x8x8xbf16> to vector<8x8xbf16>
      %cst_44 = arith.constant dense<0.000000e+00> : vector<64x8xf32>
      %101 = tpu.matmul %98, %100, %cst_44 {dimension_numbers = #tpu.dot_dimension_numbers<[1], [0], [0], [1], [0, 0, 1, 1], [], []>} : vector<64x8xbf16>, vector<8x8xbf16>, vector<64x8xf32> -> vector<64x8xf32>
      %102 = arith.addf %96, %101 : vector<64x8xf32>
      %103 = vector.extract_strided_slice %65 {offsets = [0, 2, 0, 0], sizes = [2, 4, 8, 8], strides = [1, 1, 1, 1]} : vector<2x6x10x8xbf16> to vector<2x4x8x8xbf16>
      %104 = vector.shape_cast %103 : vector<2x4x8x8xbf16> to vector<64x8xbf16>
      %c6 = arith.constant 6 : index
      %c0_45 = arith.constant 0 : index
      %c0_46 = arith.constant 0 : index
      %105 = vector.load %arg6[%c6, %c0_45, %c0_46] : memref<9x8x8xbf16, #tpu.memory_space<vmem>>, vector<1x8x8xbf16>
      %106 = vector.shape_cast %105 : vector<1x8x8xbf16> to vector<8x8xbf16>
      %cst_47 = arith.constant dense<0.000000e+00> : vector<64x8xf32>
      %107 = tpu.matmul %104, %106, %cst_47 {dimension_numbers = #tpu.dot_dimension_numbers<[1], [0], [0], [1], [0, 0, 1, 1], [], []>} : vector<64x8xbf16>, vector<8x8xbf16>, vector<64x8xf32> -> vector<64x8xf32>
      %108 = arith.addf %102, %107 : vector<64x8xf32>
      %109 = vector.extract_strided_slice %65 {offsets = [0, 2, 1, 0], sizes = [2, 4, 8, 8], strides = [1, 1, 1, 1]} : vector<2x6x10x8xbf16> to vector<2x4x8x8xbf16>
      %110 = vector.shape_cast %109 : vector<2x4x8x8xbf16> to vector<64x8xbf16>
      %c7 = arith.constant 7 : index
      %c0_48 = arith.constant 0 : index
      %c0_49 = arith.constant 0 : index
      %111 = vector.load %arg6[%c7, %c0_48, %c0_49] : memref<9x8x8xbf16, #tpu.memory_space<vmem>>, vector<1x8x8xbf16>
      %112 = vector.shape_cast %111 : vector<1x8x8xbf16> to vector<8x8xbf16>
      %cst_50 = arith.constant dense<0.000000e+00> : vector<64x8xf32>
      %113 = tpu.matmul %110, %112, %cst_50 {dimension_numbers = #tpu.dot_dimension_numbers<[1], [0], [0], [1], [0, 0, 1, 1], [], []>} : vector<64x8xbf16>, vector<8x8xbf16>, vector<64x8xf32> -> vector<64x8xf32>
      %114 = arith.addf %108, %113 : vector<64x8xf32>
      %115 = vector.extract_strided_slice %65 {offsets = [0, 2, 2, 0], sizes = [2, 4, 8, 8], strides = [1, 1, 1, 1]} : vector<2x6x10x8xbf16> to vector<2x4x8x8xbf16>
      %116 = vector.shape_cast %115 : vector<2x4x8x8xbf16> to vector<64x8xbf16>
      %c8 = arith.constant 8 : index
      %c0_51 = arith.constant 0 : index
      %c0_52 = arith.constant 0 : index
      %117 = vector.load %arg6[%c8, %c0_51, %c0_52] : memref<9x8x8xbf16, #tpu.memory_space<vmem>>, vector<1x8x8xbf16>
      %118 = vector.shape_cast %117 : vector<1x8x8xbf16> to vector<8x8xbf16>
      %cst_53 = arith.constant dense<0.000000e+00> : vector<64x8xf32>
      %119 = tpu.matmul %116, %118, %cst_53 {dimension_numbers = #tpu.dot_dimension_numbers<[1], [0], [0], [1], [0, 0, 1, 1], [], []>} : vector<64x8xbf16>, vector<8x8xbf16>, vector<64x8xf32> -> vector<64x8xf32>
      %120 = arith.addf %114, %119 : vector<64x8xf32>
      %c0_54 = arith.constant 0 : index
      %c0_55 = arith.constant 0 : index
      %121 = vector.load %arg14[%c0_54, %c0_55] : memref<2x8xf32, #tpu.memory_space<vmem>>, vector<1x8xf32>
      %cst_56 = arith.constant dense<0.000000e+00> : vector<8xf32>
      %122 = vector.multi_reduction <add>, %120, %cst_56 [0] : vector<64x8xf32> to vector<8xf32>
      %123 = vector.shape_cast %122 : vector<8xf32> to vector<1x8xf32>
      %124 = arith.addf %121, %123 : vector<1x8xf32>
      %c0_57 = arith.constant 0 : index
      %c0_58 = arith.constant 0 : index
      %125 = vector.load %arg14[%c0_57, %c0_58] : memref<2x8xf32, #tpu.memory_space<vmem>>, vector<1x8xf32>
      tpu.vector_store %arg14[%c0_57, %c0_58], %124 {strides = array<i32>} : memref<2x8xf32, #tpu.memory_space<vmem>>, vector<1x8xf32>,
      %c1_59 = arith.constant 1 : index
      %c0_60 = arith.constant 0 : index
      %126 = vector.load %arg14[%c1_59, %c0_60] : memref<2x8xf32, #tpu.memory_space<vmem>>, vector<1x8xf32>
      %127 = arith.mulf %120, %120 : vector<64x8xf32>
      %cst_61 = arith.constant dense<0.000000e+00> : vector<8xf32>
      %128 = vector.multi_reduction <add>, %127, %cst_61 [0] : vector<64x8xf32> to vector<8xf32>
      %129 = vector.shape_cast %128 : vector<8xf32> to vector<1x8xf32>
      %130 = arith.addf %126, %129 : vector<1x8xf32>
      %c1_62 = arith.constant 1 : index
      %c0_63 = arith.constant 0 : index
      %131 = vector.load %arg14[%c1_62, %c0_63] : memref<2x8xf32, #tpu.memory_space<vmem>>, vector<1x8xf32>
      tpu.vector_store %arg14[%c1_62, %c0_63], %130 {strides = array<i32>} : memref<2x8xf32, #tpu.memory_space<vmem>>, vector<1x8xf32>,
      %132 = vector.shape_cast %120 : vector<64x8xf32> to vector<2x4x8x8xf32>
      %c0_64 = arith.constant 0 : index
      %133 = arith.index_cast %0 : i32 to index
      %c0_65 = arith.constant 0 : index
      %c0_66 = arith.constant 0 : index
      %134 = vector.load %arg12[%c0_64, %133, %c0_65, %c0_66] : memref<2x8x8x8xf32, #tpu.memory_space<vmem>>, vector<2x4x8x8xf32>
      tpu.vector_store %arg12[%c0_64, %133, %c0_65, %c0_66], %132 {strides = array<i32>} : memref<2x8x8x8xf32, #tpu.memory_space<vmem>>, vector<2x4x8x8xf32>,
    } else {
    }
    %c3_i32 = arith.constant 3 : i32
    %15 = arith.cmpi eq, %arg0, %c3_i32 : i32
    %16 = arith.extui %15 : i1 to i32
    %c0_i32_6 = arith.constant 0 : i32
    %17 = arith.cmpi ne, %16, %c0_i32_6 : i32
    scf.if %17 {
      %c0 = arith.constant 0 : index
      %c0_7 = arith.constant 0 : index
      %18 = vector.load %arg14[%c0, %c0_7] : memref<2x8xf32, #tpu.memory_space<vmem>>, vector<1x8xf32>
      %cst = arith.constant 7.812500e-03 : f32
      %19 = vector.broadcast %cst : f32 to vector<1x8xf32>
      %20 = arith.mulf %18, %19 : vector<1x8xf32>
      %c1 = arith.constant 1 : index
      %c0_8 = arith.constant 0 : index
      %21 = vector.load %arg14[%c1, %c0_8] : memref<2x8xf32, #tpu.memory_space<vmem>>, vector<1x8xf32>
      %cst_9 = arith.constant 7.812500e-03 : f32
      %22 = vector.broadcast %cst_9 : f32 to vector<1x8xf32>
      %23 = arith.mulf %21, %22 : vector<1x8xf32>
      %24 = arith.mulf %20, %20 : vector<1x8xf32>
      %25 = arith.subf %23, %24 : vector<1x8xf32>
      %cst_10 = arith.constant 0.000000e+00 : f32
      %26 = vector.broadcast %cst_10 : f32 to vector<1x8xf32>
      %27 = arith.maximumf %25, %26 : vector<1x8xf32>
      %c0_11 = arith.constant 0 : index
      %c0_12 = arith.constant 0 : index
      %28 = vector.load %arg7[%c0_11, %c0_12] : memref<1x8xf32, #tpu.memory_space<vmem>>, vector<1x8xf32>
      %cst_13 = arith.constant 9.99999974E-6 : f32
      %29 = vector.broadcast %cst_13 : f32 to vector<1x8xf32>
      %30 = arith.addf %27, %29 : vector<1x8xf32>
      %31 = math.rsqrt %30 : vector<1x8xf32>
      %32 = arith.mulf %28, %31 : vector<1x8xf32>
      %33 = vector.shape_cast %32 : vector<1x8xf32> to vector<1x1x1x8xf32>
      %c0_14 = arith.constant 0 : index
      %c0_15 = arith.constant 0 : index
      %34 = vector.load %arg8[%c0_14, %c0_15] : memref<1x8xf32, #tpu.memory_space<vmem>>, vector<1x8xf32>
      %35 = vector.shape_cast %34 : vector<1x8xf32> to vector<1x1x1x8xf32>
      %36 = vector.shape_cast %20 : vector<1x8xf32> to vector<1x1x1x8xf32>
      %37 = arith.mulf %36, %33 : vector<1x1x1x8xf32>
      %38 = arith.subf %35, %37 : vector<1x1x1x8xf32>
      %c0_16 = arith.constant 0 : index
      %39 = arith.index_cast %0 : i32 to index
      %c0_17 = arith.constant 0 : index
      %c0_18 = arith.constant 0 : index
      %40 = vector.load %arg12[%c0_16, %39, %c0_17, %c0_18] : memref<2x8x8x8xf32, #tpu.memory_space<vmem>>, vector<2x4x8x8xf32>
      %41 = vector.broadcast %33 : vector<1x1x1x8xf32> to vector<2x4x8x8xf32>
      %42 = arith.mulf %40, %41 : vector<2x4x8x8xf32>
      %43 = vector.broadcast %38 : vector<1x1x1x8xf32> to vector<2x4x8x8xf32>
      %44 = arith.addf %42, %43 : vector<2x4x8x8xf32>
      %cst_19 = arith.constant 0.000000e+00 : f32
      %45 = vector.broadcast %cst_19 : f32 to vector<2x4x8x8xf32>
      %46 = arith.maximumf %44, %45 : vector<2x4x8x8xf32>
      %c0_20 = arith.constant 0 : index
      %c0_21 = arith.constant 0 : index
      %c0_22 = arith.constant 0 : index
      %c0_23 = arith.constant 0 : index
      %47 = vector.load %arg9[%c0_20, %c0_21, %c0_22, %c0_23] : memref<2x4x8x8xf32, #tpu.memory_space<vmem>>, vector<2x4x8x8xf32>
      tpu.vector_store %arg9[%c0_20, %c0_21, %c0_22, %c0_23], %46 {strides = array<i32>} : memref<2x4x8x8xf32, #tpu.memory_space<vmem>>, vector<2x4x8x8xf32>,
    } else {
    }
    return
  }
  func.func @transform_0(%arg0: i32, %arg1: i32) -> (i32, i32, i32, i32) {
    %c0_i32 = arith.constant 0 : i32
    %0 = arith.cmpi eq, %arg0, %c0_i32 : i32
    %c0_i32_0 = arith.constant 0 : i32
    %1 = arith.select %0, %arg1, %c0_i32_0 : i32
    %c0_i32_1 = arith.constant 0 : i32
    %c0_i32_2 = arith.constant 0 : i32
    %c0_i32_3 = arith.constant 0 : i32
    %c0_i32_4 = arith.constant 0 : i32
    return %c0_i32_1, %1, %c0_i32_2, %c0_i32_3 : i32, i32, i32, i32
  }
  func.func @transform_1(%arg0: i32, %arg1: i32) -> (i32, i32, i32) {
    %c0_i32 = arith.constant 0 : i32
    %c0_i32_0 = arith.constant 0 : i32
    %c0_i32_1 = arith.constant 0 : i32
    %c0_i32_2 = arith.constant 0 : i32
    return %c0_i32, %c0_i32_0, %c0_i32_1 : i32, i32, i32
  }
  func.func @transform_2(%arg0: i32, %arg1: i32) -> (i32, i32) {
    %c0_i32 = arith.constant 0 : i32
    %c0_i32_0 = arith.constant 0 : i32
    %c0_i32_1 = arith.constant 0 : i32
    return %c0_i32, %c0_i32_0 : i32, i32
  }
  func.func @transform_3(%arg0: i32, %arg1: i32) -> (i32, i32) {
    %c0_i32 = arith.constant 0 : i32
    %c0_i32_0 = arith.constant 0 : i32
    %c0_i32_1 = arith.constant 0 : i32
    return %c0_i32, %c0_i32_0 : i32, i32
  }
  func.func @transform_4(%arg0: i32, %arg1: i32) -> (i32, i32, i32) {
    %c0_i32 = arith.constant 0 : i32
    %c0_i32_0 = arith.constant 0 : i32
    %c0_i32_1 = arith.constant 0 : i32
    %c0_i32_2 = arith.constant 0 : i32
    return %c0_i32, %c0_i32_0, %c0_i32_1 : i32, i32, i32
  }
  func.func @transform_5(%arg0: i32, %arg1: i32) -> (i32, i32) {
    %c0_i32 = arith.constant 0 : i32
    %c0_i32_0 = arith.constant 0 : i32
    %c0_i32_1 = arith.constant 0 : i32
    return %c0_i32, %c0_i32_0 : i32, i32
  }
  func.func @transform_6(%arg0: i32, %arg1: i32) -> (i32, i32) {
    %c0_i32 = arith.constant 0 : i32
    %c0_i32_0 = arith.constant 0 : i32
    %c0_i32_1 = arith.constant 0 : i32
    return %c0_i32, %c0_i32_0 : i32, i32
  }
  func.func @transform_7(%arg0: i32, %arg1: i32) -> (i32, i32, i32, i32) {
    %c3_i32 = arith.constant 3 : i32
    %0 = arith.cmpi eq, %arg0, %c3_i32 : i32
    %c0_i32 = arith.constant 0 : i32
    %1 = arith.select %0, %arg1, %c0_i32 : i32
    %c0_i32_0 = arith.constant 0 : i32
    %c0_i32_1 = arith.constant 0 : i32
    %c0_i32_2 = arith.constant 0 : i32
    %c0_i32_3 = arith.constant 0 : i32
    return %c0_i32_0, %1, %c0_i32_1, %c0_i32_2 : i32, i32, i32, i32
  }
}

</mosaic_0001>

<bundles_post_ra>
// kernel: down_block_forward.1
= control target key start
LH: loop header
LB: loop body
LE: loop exit
PB: predicated region body
PF: predicated region fallthrough
CT: control target
= control target key end

     0   :  { %s4088_s24 = smov 0   ;;  %s4090_s25 = smov 0   ;;  %s5758_s0 = inlined_call_operand.vmem [shape: bf16[2,16,8,8], index: 0, kind: input, shape index: {}]   ;;  %s5759_s1 = inlined_call_operand.vmem [shape: bf16[9,4,8], index: 1, kind: input, shape index: {}]   ;;  %s5760_s2 = inlined_call_operand.vmem [shape: f32[1,8], index: 2, kind: input, shape index: {}]   ;;  %s5761_s3 = inlined_call_operand.vmem [shape: f32[1,8], index: 3, kind: input, shape index: {}]   ;;  %s5762_s4 = inlined_call_operand.vmem [shape: bf16[9,8,8], index: 4, kind: input, shape index: {}]   ;;  %s5763_s5 = inlined_call_operand.vmem [shape: f32[1,8], index: 5, kind: input, shape index: {}]   ;;  %s5764_s6 = inlined_call_operand.vmem [shape: f32[1,8], index: 6, kind: input, shape index: {}]   ;;  %s5765_s7 = inlined_call_operand.vmem [shape: f32[2,8,8,8], index: 7, kind: output, shape index: {}]  }
   0x1   :  { %s4092_s26 = smov 0   ;;  %s4094_s27 = smov 0  }
   0x2   :  { %s4096_s28 = smov 0   ;;  %s4098_s29 = smov 0  }
   0x3   :  { %s4100_s30 = smov 0   ;;  %s4102_s8 = smov 0  }
   0x4   :  { %s4104_s9 = smov 0  }
   0x5 LB: > { %5767 = sst [smem:[#allocation9_spill]] %s4039_s8  ;;  %s3471_s10 = sadd.s32 4294967295, %s4043_s9   ;;  %s4043_s9 = sphi %s4104_s9, %s17_s9   ;;  %s4039_s8 = sphi %s4102_s8, %s5829_s8   ;;  %s4035_s30 = sphi %s4100_s30, %s5828_s30   ;;  %s4031_s29 = sphi %s4098_s29, %s5822_s29   ;;  %s4027_s28 = sphi %s4096_s28, %s5827_s28   ;;  %s4023_s27 = sphi %s4094_s27, %s5826_s27   ;;  %s4019_s26 = sphi %s4092_s26, %s5825_s26   ;;  %s4015_s25 = sphi %s4090_s25, %s5824_s25   ;;  %s4011_s24 = sphi %s4088_s24, %s5823_s24  }
   0x6   : > { %s26_s11 = sadd.s32 1, %s4035_s30  ;;  %s29_s12 = sadd.s32 1, %s4039_s8 }
   0x7   : > { %p27_p0 = scmp.ge.s32.totalorder %s26_s11, 2  ;;  %p33_p1 = scmp.eq.s32.totalorder %s4039_s8, 0 }
   0x8   : > { %s40_s13 = sadd.s32 1, %s4023_s27  ;;  %p47_p3 = scmp.ne.s32.totalorder %s4023_s27, %s4019_s26 }
   0x9   : > { %s5831_s11 = smov (%p27_p0, %s26_s11), 0  ;;  %s5833_s12 = smov (!%p27_p0, %s29_s12), %s4039_s8 }
   0xa   : > { %s4142_s14 = scalar_select %p33_p1, %s4035_s30, 0 }
   0xb   : > { %p31_p2 = scmp.ge.s32.totalorder %s5833_s12, 4  ;;  %p48_p4 = scmp.eq.s32.totalorder %s4043_s9, 0 }
   0xc   : > { %p189_p5 = scmp.eq.s32.totalorder %s4039_s8, 3  ;;  %s196_s16 = sadd.s32 1, %s4015_s25 }
   0xd   : > { %s5835_s12 = smov (%p31_p2, %s5833_s12), 0  ;;  %p4150_p6 = por %p48_p4, %p47_p3 }
   0xe   : > { %p35_p7 = scmp.eq.s32.totalorder %s5835_s12, 0  ;;  %p191_p8 = scmp.eq.s32.totalorder %s5835_s12, 3 }
   0xf   : > { %s190_s17 = scalar_select %p189_p5, %s4035_s30, 0 }
  0x10   : > { %s36_s18 = scalar_select %p35_p7, %s5831_s11, 0 }
  0x11   : > { %s192_s19 = scalar_select %p191_p8, %s5831_s11, 0 }
  0x12   : > { %s37_s20 = ssub.s32 %s4142_s14, %s36_s18  ;;  %p206_p9 = scmp.ne.s32.totalorder %s4015_s25, %s4011_s24 }
  0x13   : > { %p38_p10 = scmp.eq.s32.totalorder %s37_s20, 0  ;;  %s193_s21 = ssub.s32 %s190_s17, %s192_s19 }
  0x14   : > { %p194_p11 = scmp.eq.s32.totalorder %s193_s21, 0  ;;  %p207_p12 = scmp.eq.s32.totalorder %s3471_s10, 7 }
  0x15   : > { %s4164_s22 = scalar_select %p38_p10, %s4023_s27, %s40_s13  }
  0x16   : > { %s4167_s23 = scalar_select %p194_p11, %s4015_s25, %s196_s16  }
  0x17   : > { %p4169_p13 = por %p207_p12, %p206_p9  ;;  %p3474_p0 = scmp.ge.s32.totalorder %s4043_s9, 8 }
  0x19   : > { %247 = sbr.rel (%p3474_p0) target bundleno = 42 (0x2a), region = 40 }
  0x1e   : > { %250 = sbr.rel (!%p4150_p6) target bundleno = 42 (0x2a), region = 44  ;;  %s252_s18 = sand.u32 (%p4150_p6), 1, %s4023_s27  }
  0x1f   : > { %s3805_s17 = sshll.u32 (%p4150_p6), %s4142_s14, 5  ;;  %s3475_s19 = sshll.u32 (%p4150_p6), %s252_s18, 6 }
  0x20   : > { %s259_s16 = scalar_lea.vmem (%p4150_p6), %s5758_s0, %s3805_s17  ;;  %s254_s20 = scalar_lea.vmem (%p4150_p6), [#allocation7], %s3475_s19 }
  0x21   : > { %v276_v0 = vld [vmem:[%s259_s16] sm:$0xff] (%p4150_p6)   ;;  %v280_v1 = vld [vmem:[%s259_s16 + $0x8] sm:$0xff] (%p4150_p6)   ;;  %v284_v2 = vld [vmem:[%s259_s16 + $0x10] sm:$0xff] (%p4150_p6)  }
  0x22   : > { %277 = vst [vmem:[%s254_s20] sm:$0xff] (%p4150_p6), %v276_v0   ;;  %v288_v3 = vld [vmem:[%s259_s16 + $0x18] sm:$0xff] (%p4150_p6)   ;;  %v292_v4 = vld [vmem:[%s259_s16 + $0x40] sm:$0xff] (%p4150_p6)   ;;  %v296_v5 = vld [vmem:[%s259_s16 + $0x48] sm:$0xff] (%p4150_p6)  }
  0x23   : > { %281 = vst [vmem:[%s254_s20 + $0x8] sm:$0xff] %v280_v1   ;;  %v300_v6 = vld [vmem:[%s259_s16 + $0x50] sm:$0xff]   ;;  %v304_v7 = vld [vmem:[%s259_s16 + $0x58] sm:$0xff]  }
  0x24   : > { %285 = vst [vmem:[%s254_s20 + $0x10] sm:$0xff] %v284_v2  }
  0x25   : > { %289 = vst [vmem:[%s254_s20 + $0x18] sm:$0xff] %v288_v3  }
  0x26   : > { %293 = vst [vmem:[%s254_s20 + $0x20] sm:$0xff] %v292_v4  }
  0x27   : > { %297 = vst [vmem:[%s254_s20 + $0x28] sm:$0xff] %v296_v5  }
  0x28   : > { %301 = vst [vmem:[%s254_s20 + $0x30] sm:$0xff] %v300_v6  }
  0x29   : > { %305 = vst [vmem:[%s254_s20 + $0x38] sm:$0xff] %v304_v7  }
  0x2a PF: > { %p3478_p1 = scmp.ge.s32.totalorder %s4043_s9, 1  ;;  %p362_p2 = scmp.lt.s32.totalorder %s4043_s9, 9 }
  0x2c   : > { %p363_p3 = pnand %p3478_p1, %p362_p2 }
  0x2d   : > { %s369_s14 = sand.u32 (!%p363_p3), 1, %s4019_s26   ;;  %s396_s15 = sand.u32 (!%p363_p3), 1, %s4011_s24  }
  0x2e   : > { %366 = sbr.rel (%p363_p3) target bundleno = 1074 (0x432), region = 85  ;;  %s3479_s21 = sshll.u32 (!%p363_p3), %s369_s14, 6 }
  0x2f   : > { %s3480_s18 = sshll.u32 (!%p363_p3), %s396_s15, 6  ;;  %s3481_s17 = sshll.u32 (!%p363_p3), %s4027_s28, 2 }
  0x30   : > { %p407_p4 = scmp.eq.s32.totalorder (!%p363_p3), %s4031_s29, 0  ;;  %p408_p5 = scmp.eq.s32.totalorder (!%p363_p3), %s4027_s28, 0 }
  0x31   : > { %s4188_s19 = scalar_lea.vmem (!%p363_p3), [#allocation7], %s3479_s21  ;;  %s4190_s10 = scalar_lea.vmem (!%p363_p3), [#allocation8], %s3480_s18 }
  0x32   : > { %p409_p6 = pnand (!%p363_p3), %p408_p5, %p407_p4 }
  0x34   : > { %412 = sbr.rel (%p409_p6) target bundleno = 140 (0x8c), region = 93 }
  0x39   : > { %vm413_vm0 = vcmask 27648   ;;  %v4045_v8 = vmov 0   ;;  %vm415_vm1 = vcmask 24576   ;;  %vm455_vm2 = vcmask 60416  }
  0x3a   : > { %414 = vst.msk [vmem:[#allocation2] sm:$0xf] %vm413_vm0, %v4045_v8  ;;  %vm457_vm3 = vcmask 57344   ;;  %vm497_vm4 = vcmask 58368   ;;  %v4046_v9 = vmov 0.0  }
  0x3b   : > { %417 = vst.msk [vmem:[#allocation2 + $0x8] sm:$0xf] %vm413_vm0, %v4045_v8 }
  0x3c   : > { %419 = vst.msk [vmem:[#allocation2 + $0x10] sm:$0xf] %vm413_vm0, %v4045_v8 }
  0x3d   : > { %421 = vst.msk [vmem:[#allocation2 + $0x18] sm:$0xf] %vm413_vm0, %v4045_v8 }
  0x3e   : > { %423 = vst.msk [vmem:[#allocation2 + $0x20] sm:$0xf] %vm413_vm0, %v4045_v8 }
  0x3f   : > { %425 = vst.msk [vmem:[#allocation2 + $0x28] sm:$0xf] %vm413_vm0, %v4045_v8 }
  0x40   : > { %427 = vst.msk [vmem:[#allocation2 + $0x30] sm:$0xf] %vm413_vm0, %v4045_v8 }
  0x41   : > { %429 = vst.msk [vmem:[#allocation2 + $0x38] sm:$0xf] %vm413_vm0, %v4045_v8 }
  0x42   : > { %431 = vst.msk [vmem:[#allocation2 + $0x40] sm:$0xf] %vm413_vm0, %v4045_v8 }
  0x43   : > { %433 = vst.msk [vmem:[#allocation2 + $0x48] sm:$0xf] %vm413_vm0, %v4045_v8 }
  0x44   : > { %435 = vst.msk [vmem:[#allocation2 + $0x50] sm:$0xf] %vm413_vm0, %v4045_v8 }
  0x45   : > { %437 = vst.msk [vmem:[#allocation2 + $0x58] sm:$0xf] %vm413_vm0, %v4045_v8 }
  0x46   : > { %439 = vst.msk [vmem:[#allocation2 + $0x60] sm:$0xf] %vm413_vm0, %v4045_v8 }
  0x47   : > { %441 = vst.msk [vmem:[#allocation2 + $0x68] sm:$0xf] %vm413_vm0, %v4045_v8 }
  0x48   : > { %443 = vst.msk [vmem:[#allocation2 + $0x70] sm:$0xf] %vm413_vm0, %v4045_v8 }
  0x49   : > { %445 = vst.msk [vmem:[#allocation2 + $0x78] sm:$0xf] %vm413_vm0, %v4045_v8 }
  0x4a   : > { %447 = vst.msk [vmem:[#allocation2 + $0x80] sm:$0xf] %vm413_vm0, %v4045_v8 }
  0x4b   : > { %449 = vst.msk [vmem:[#allocation2 + $0x88] sm:$0xf] %vm413_vm0, %v4045_v8 }
  0x4c   : > { %451 = vst.msk [vmem:[#allocation2 + $0x90] sm:$0xf] %vm413_vm0, %v4045_v8 }
  0x4d   : > { %453 = vst.msk [vmem:[#allocation2 + $0x98] sm:$0xf] %vm413_vm0, %v4045_v8 }
  0x4e   : > { %416 = vst.msk [vmem:[#allocation2 + $0x4] sm:$0x1] %vm415_vm1, %v4045_v8 }
  0x4f   : > { %418 = vst.msk [vmem:[#allocation2 + $0xc] sm:$0x1] %vm415_vm1, %v4045_v8 }
  0x50   : > { %420 = vst.msk [vmem:[#allocation2 + $0x14] sm:$0x1] %vm415_vm1, %v4045_v8 }
  0x51   : > { %422 = vst.msk [vmem:[#allocation2 + $0x1c] sm:$0x1] %vm415_vm1, %v4045_v8 }
  0x52   : > { %424 = vst.msk [vmem:[#allocation2 + $0x24] sm:$0x1] %vm415_vm1, %v4045_v8 }
  0x53   : > { %426 = vst.msk [vmem:[#allocation2 + $0x2c] sm:$0x1] %vm415_vm1, %v4045_v8 }
  0x54   : > { %428 = vst.msk [vmem:[#allocation2 + $0x34] sm:$0x1] %vm415_vm1, %v4045_v8 }
  0x55   : > { %430 = vst.msk [vmem:[#allocation2 + $0x3c] sm:$0x1] %vm415_vm1, %v4045_v8 }
  0x56   : > { %432 = vst.msk [vmem:[#allocation2 + $0x44] sm:$0x1] %vm415_vm1, %v4045_v8 }
  0x57   : > { %434 = vst.msk [vmem:[#allocation2 + $0x4c] sm:$0x1] %vm415_vm1, %v4045_v8 }
  0x58   : > { %436 = vst.msk [vmem:[#allocation2 + $0x54] sm:$0x1] %vm415_vm1, %v4045_v8 }
  0x59   : > { %438 = vst.msk [vmem:[#allocation2 + $0x5c] sm:$0x1] %vm415_vm1, %v4045_v8 }
  0x5a   : > { %440 = vst.msk [vmem:[#allocation2 + $0x64] sm:$0x1] %vm415_vm1, %v4045_v8 }
  0x5b   : > { %442 = vst.msk [vmem:[#allocation2 + $0x6c] sm:$0x1] %vm415_vm1, %v4045_v8 }
  0x5c   : > { %444 = vst.msk [vmem:[#allocation2 + $0x74] sm:$0x1] %vm415_vm1, %v4045_v8 }
  0x5d   : > { %446 = vst.msk [vmem:[#allocation2 + $0x7c] sm:$0x1] %vm415_vm1, %v4045_v8 }
  0x5e   : > { %448 = vst.msk [vmem:[#allocation2 + $0x84] sm:$0x1] %vm415_vm1, %v4045_v8 }
  0x5f   : > { %450 = vst.msk [vmem:[#allocation2 + $0x8c] sm:$0x1] %vm415_vm1, %v4045_v8 }
  0x60   : > { %452 = vst.msk [vmem:[#allocation2 + $0x94] sm:$0x1] %vm415_vm1, %v4045_v8 }
  0x61   : > { %454 = vst.msk [vmem:[#allocation2 + $0x9c] sm:$0x1] %vm415_vm1, %v4045_v8 }
  0x62   : > { %456 = vst.msk [vmem:[#allocation3] sm:$0xf] %vm455_vm2, %v4045_v8 }
  0x63   : > { %459 = vst.msk [vmem:[#allocation3 + $0x8] sm:$0xf] %vm455_vm2, %v4045_v8 }
  0x64   : > { %461 = vst.msk [vmem:[#allocation3 + $0x10] sm:$0xf] %vm455_vm2, %v4045_v8 }
  0x65   : > { %463 = vst.msk [vmem:[#allocation3 + $0x18] sm:$0xf] %vm455_vm2, %v4045_v8 }
  0x66   : > { %465 = vst.msk [vmem:[#allocation3 + $0x20] sm:$0xf] %vm455_vm2, %v4045_v8 }
  0x67   : > { %467 = vst.msk [vmem:[#allocation3 + $0x28] sm:$0xf] %vm455_vm2, %v4045_v8 }
  0x68   : > { %469 = vst.msk [vmem:[#allocation3 + $0x30] sm:$0xf] %vm455_vm2, %v4045_v8 }
  0x69   : > { %471 = vst.msk [vmem:[#allocation3 + $0x38] sm:$0xf] %vm455_vm2, %v4045_v8 }
  0x6a   : > { %473 = vst.msk [vmem:[#allocation3 + $0x40] sm:$0xf] %vm455_vm2, %v4045_v8 }
  0x6b   : > { %475 = vst.msk [vmem:[#allocation3 + $0x48] sm:$0xf] %vm455_vm2, %v4045_v8 }
  0x6c   : > { %477 = vst.msk [vmem:[#allocation3 + $0x50] sm:$0xf] %vm455_vm2, %v4045_v8 }
  0x6d   : > { %479 = vst.msk [vmem:[#allocation3 + $0x58] sm:$0xf] %vm455_vm2, %v4045_v8 }
  0x6e   : > { %481 = vst.msk [vmem:[#allocation3 + $0x60] sm:$0xf] %vm455_vm2, %v4045_v8 }
  0x6f   : > { %483 = vst.msk [vmem:[#allocation3 + $0x68] sm:$0xf] %vm455_vm2, %v4045_v8 }
  0x70   : > { %485 = vst.msk [vmem:[#allocation3 + $0x70] sm:$0xf] %vm455_vm2, %v4045_v8 }
  0x71   : > { %487 = vst.msk [vmem:[#allocation3 + $0x78] sm:$0xf] %vm455_vm2, %v4045_v8 }
  0x72   : > { %489 = vst.msk [vmem:[#allocation3 + $0x80] sm:$0xf] %vm455_vm2, %v4045_v8 }
  0x73   : > { %491 = vst.msk [vmem:[#allocation3 + $0x88] sm:$0xf] %vm455_vm2, %v4045_v8 }
  0x74   : > { %493 = vst.msk [vmem:[#allocation3 + $0x90] sm:$0xf] %vm455_vm2, %v4045_v8 }
  0x75   : > { %495 = vst.msk [vmem:[#allocation3 + $0x98] sm:$0xf] %vm455_vm2, %v4045_v8 }
  0x76   : > { %458 = vst.msk [vmem:[#allocation3 + $0x4] sm:$0x1] %vm457_vm3, %v4045_v8 }
  0x77   : > { %460 = vst.msk [vmem:[#allocation3 + $0xc] sm:$0x1] %vm457_vm3, %v4045_v8 }
  0x78   : > { %462 = vst.msk [vmem:[#allocation3 + $0x14] sm:$0x1] %vm457_vm3, %v4045_v8 }
  0x79   : > { %464 = vst.msk [vmem:[#allocation3 + $0x1c] sm:$0x1] %vm457_vm3, %v4045_v8 }
  0x7a   : > { %466 = vst.msk [vmem:[#allocation3 + $0x24] sm:$0x1] %vm457_vm3, %v4045_v8 }
  0x7b   : > { %468 = vst.msk [vmem:[#allocation3 + $0x2c] sm:$0x1] %vm457_vm3, %v4045_v8 }
  0x7c   : > { %470 = vst.msk [vmem:[#allocation3 + $0x34] sm:$0x1] %vm457_vm3, %v4045_v8 }
  0x7d   : > { %472 = vst.msk [vmem:[#allocation3 + $0x3c] sm:$0x1] %vm457_vm3, %v4045_v8 }
  0x7e   : > { %474 = vst.msk [vmem:[#allocation3 + $0x44] sm:$0x1] %vm457_vm3, %v4045_v8 }
  0x7f   : > { %476 = vst.msk [vmem:[#allocation3 + $0x4c] sm:$0x1] %vm457_vm3, %v4045_v8 }
  0x80   : > { %478 = vst.msk [vmem:[#allocation3 + $0x54] sm:$0x1] %vm457_vm3, %v4045_v8 }
  0x81   : > { %480 = vst.msk [vmem:[#allocation3 + $0x5c] sm:$0x1] %vm457_vm3, %v4045_v8 }
  0x82   : > { %482 = vst.msk [vmem:[#allocation3 + $0x64] sm:$0x1] %vm457_vm3, %v4045_v8 }
  0x83   : > { %484 = vst.msk [vmem:[#allocation3 + $0x6c] sm:$0x1] %vm457_vm3, %v4045_v8 }
  0x84   : > { %486 = vst.msk [vmem:[#allocation3 + $0x74] sm:$0x1] %vm457_vm3, %v4045_v8 }
  0x85   : > { %488 = vst.msk [vmem:[#allocation3 + $0x7c] sm:$0x1] %vm457_vm3, %v4045_v8 }
  0x86   : > { %490 = vst.msk [vmem:[#allocation3 + $0x84] sm:$0x1] %vm457_vm3, %v4045_v8 }
  0x87   : > { %492 = vst.msk [vmem:[#allocation3 + $0x8c] sm:$0x1] %vm457_vm3, %v4045_v8 }
  0x88   : > { %494 = vst.msk [vmem:[#allocation3 + $0x94] sm:$0x1] %vm457_vm3, %v4045_v8 }
  0x89   : > { %496 = vst.msk [vmem:[#allocation3 + $0x9c] sm:$0x1] %vm457_vm3, %v4045_v8 }
  0x8a   : > { %498 = vst.msk [vmem:[#allocation5] sm:$0x3] %vm497_vm4, %v4046_v9 }
  0x8b   : > { %499 = vst.msk [vmem:[#allocation6] sm:$0x3] %vm497_vm4, %v4046_v9 }
  0x8c PF: > { %p3482_p7 = scmp.ne.s32.totalorder %s4031_s29, 0 }
  0x8d   : > { %s4047_s24 = smov (!%p3482_p7), 124   ;;  %s3806_s26 = sshll.u32 (!%p3482_p7), %s4027_s28, 5 }
  0x8e   : > { %502 = sbr.rel (%p3482_p7) target bundleno = 302 (0x12e), region = 97  ;;  %s4380_s13 = scalar_lea.vmem (!%p3482_p7), [#allocation2], %s3806_s26 }
  0x93   : > { %v3864_v10 = vld [vmem:[%s4188_s19 + $0x20] sm:$0xff]   ;;  %v3865_v11 = vld [vmem:[%s4188_s19 + $0x28] sm:$0xff]   ;;  %v3866_v18 = vld [vmem:[%s4188_s19 + $0x30] sm:$0xff]   ;;  %vm691_vm5 = vcmask 27648   ;;  %vm692_vm6 = vsmask.f32 7938 }
  0x94   : > { %v3830_v12 = vld [vmem:[%s4188_s19] sm:$0xff]   ;;  %v3847_v13 = vunpack.c.l.bf16 %v3864_v10  ;;  %v3848_v14 = vunpack.c.h.bf16 %v3864_v10  ;;  %v3851_v15 = vunpack.c.l.bf16 %v3865_v11  ;;  %v3852_v16 = vunpack.c.h.bf16 %v3865_v11  ;;  %v3861_v17 = vld [vmem:[%s4188_s19 + $0x8] sm:$0xff]   ;;  %v3867_v19 = vld [vmem:[%s4188_s19 + $0x38] sm:$0xff]  }
  0x95   : > { %v3831_v20 = vunpack.c.l.bf16 %v3830_v12  ;;  %v3832_v21 = vunpack.c.h.bf16 %v3830_v12  ;;  %v3835_v22 = vunpack.c.l.bf16 %v3861_v17  ;;  %v3836_v23 = vunpack.c.h.bf16 %v3861_v17  ;;  %v3862_v24 = vld [vmem:[%s4188_s19 + $0x10] sm:$0xff]   ;;  %v3863_v33 = vld [vmem:[%s4188_s19 + $0x18] sm:$0xff]   ;;  %vm4376_vm9 = vmand %vm691_vm5, %vm692_vm6 }
  0x96   : > { %v539_v25 = vmax.f32 %v3847_v13, %v3848_v14  ;;  %v540_v26 = vmax.f32 %v3851_v15, %v3852_v16  ;;  %v3855_v27 = vunpack.c.l.bf16 %v3866_v18  ;;  %v3856_v28 = vunpack.c.h.bf16 %v3866_v18  ;;  %v3501_v6 = vld [vmem:[%s4380_s13 + $0x58] sm:$0xf]  ;;  %v3505_v13 = vld [vmem:[%s4380_s13 + $0x60] sm:$0xf]  ;;  %v3507_v14 = vld [vmem:[%s4380_s13 + $0x64] sm:$0x1] }
  0x97   : > { %v535_v29 = vmax.f32 %v3831_v20, %v3832_v21  ;;  %v536_v30 = vmax.f32 %v3835_v22, %v3836_v23  ;;  %v3859_v31 = vunpack.c.l.bf16 %v3867_v19  ;;  %v3860_v32 = vunpack.c.h.bf16 %v3867_v19  ;;  %v3503_v19 = vld [vmem:[%s4380_s13 + $0x5c] sm:$0x1] }
  0x98   : > { %v4361_v34 = vmax.f32 %v3855_v27, %v3856_v28  ;;  %v3839_v35 = vunpack.c.l.bf16 %v3862_v24  ;;  %v3840_v37 = vunpack.c.h.bf16 %v3862_v24  ;;  %v3843_v38 = vunpack.c.l.bf16 %v3863_v33  ;;  %v3489_v24 = vld [vmem:[%s4380_s13 + $0x10] sm:$0xf] }
  0x99   : > { %v4363_v36 = vmax.f32 %v3859_v31, %v3860_v32  ;;  %v3844_v39 = vunpack.c.h.bf16 %v3863_v33  ;;  %v3959_v40 = vpack.i.bf16 %v540_v26, %v539_v25  ;;  %v3949_v42 = vpack.i.bf16 %v536_v30, %v535_v29  ;;  %v3485_v31 = vld [vmem:[%s4380_s13 + $0x8] sm:$0xf]  ;;  %v3491_v32 = vld [vmem:[%s4380_s13 + $0x14] sm:$0x1] }
  0x9a   : > { %v4365_v41 = vmax.f32 %v3839_v35, %v3840_v37  ;;  %vm697_vm7 = vcmask 24576   ;;  %vm698_vm8 = vsmask.f32 256 }
  0x9b   : > { %v4367_v43 = vmax.f32 %v3843_v38, %v3844_v39  ;;  %3960 = vrot.lane.b32.xlu1 %v3959_v40, %s4047_s24  ;;  %3950 = vrot.lane.b32.xlu0 %v3949_v42, %s4047_s24  ;;  %v3964_v44 = vpack.i.bf16 %v4363_v36, %v4361_v34  ;;  %vm4385_vm10 = vmand %vm697_vm7, %vm698_vm8  ;;  %v3487_v38 = vld [vmem:[%s4380_s13 + $0xc] sm:$0x1] }
  0x9d   : > { %v3954_v45 = vpack.i.bf16 %v4367_v43, %v4365_v41 }
  0xa3   : > { %3965 = vrot.lane.b32.xlu1 %v3964_v44, %s4047_s24  ;;  %3955 = vrot.lane.b32.xlu0 %v3954_v45, %s4047_s24 }
 0x10d   : > { %v3961_v46 = vpop.permute.xlu1 %3960  ;;  %v3951_v49 = vpop.permute.xlu0 %3950 }
 0x10e   : > { %v3963_v47 = vunpack.i.h.bf16 %v3961_v46  ;;  %v3962_v48 = vunpack.i.l.bf16 %v3961_v46  ;;  %v3953_v50 = vunpack.i.h.bf16 %v3951_v49  ;;  %v3952_v51 = vunpack.i.l.bf16 %v3951_v49 }
 0x110   : > { %v596_v52 = vmax.f32 %v540_v26, %v3963_v47  ;;  %v595_v53 = vmax.f32 %v539_v25, %v3962_v48  ;;  %v592_v54 = vmax.f32 %v536_v30, %v3953_v50  ;;  %v591_v55 = vmax.f32 %v535_v29, %v3952_v51  ;;  %v3509_v50 = vld [vmem:[%s4380_s13 + $0x68] sm:$0xf]  ;;  %v3513_v51 = vld [vmem:[%s4380_s13 + $0x70] sm:$0xf] }
 0x112   : > { %v604_v56 = vpack.c.bf16 %v596_v52, %v596_v52  ;;  %v603_v57 = vpack.c.bf16 %v595_v53, %v595_v53  ;;  %v600_v58 = vpack.c.bf16 %v592_v54, %v592_v54  ;;  %v599_v59 = vpack.c.bf16 %v591_v55, %v591_v55 }
 0x114   : > { %v649_v60 = vshrl.u32 %v604_v56, 16  ;;  %v652_v61 = vshll.u32 %v604_v56, 16  ;;  %v641_v62 = vshrl.u32 %v603_v57, 16  ;;  %v644_v63 = vshll.u32 %v603_v57, 16 }
 0x115   : > { %v617_v0 = vshrl.u32 %v600_v58, 16  ;;  %v620_v1 = vshll.u32 %v600_v58, 16  ;;  %v609_v2 = vshrl.u32 %v599_v59, 16  ;;  %v612_v3 = vshll.u32 %v599_v59, 16  ;;  %v3966_v4 = vpop.permute.xlu1 %3965  ;;  %v3956_v11 = vpop.permute.xlu0 %3955  ;;  %v3515_v58 = vld [vmem:[%s4380_s13 + $0x74] sm:$0x1] }
 0x116   : > { %v651_v7 = vrot.slane %v649_v60, 7  ;;  %v643_v8 = vrot.slane %v641_v62, 7  ;;  %v3968_v9 = vunpack.i.h.bf16 %v3966_v4  ;;  %v3967_v10 = vunpack.i.l.bf16 %v3966_v4  ;;  %v3497_v4 = vld [vmem:[%s4380_s13 + $0x20] sm:$0xf] }
 0x117   : > { %v619_v15 = vrot.slane %v617_v0, 7  ;;  %v611_v16 = vrot.slane %v609_v2, 7  ;;  %v3958_v17 = vunpack.i.h.bf16 %v3956_v11  ;;  %v3957_v18 = vunpack.i.l.bf16 %v3956_v11  ;;  %v3499_v11 = vld [vmem:[%s4380_s13 + $0x24] sm:$0x1] }
 0x118   : > { %v654_v20 = vor.u32 %v652_v61, %v651_v7  ;;  %v655_v21 = vrot.slane %v651_v7, 4  ;;  %v646_v22 = vor.u32 %v644_v63, %v643_v8  ;;  %v647_v23 = vrot.slane %v643_v8, 4  ;;  %v3511_v63 = vld [vmem:[%s4380_s13 + $0x6c] sm:$0x1] }
 0x119   : > { %v622_v25 = vor.u32 %v620_v1, %v619_v15  ;;  %v623_v26 = vrot.slane %v619_v15, 4  ;;  %v614_v27 = vor.u32 %v612_v3, %v611_v16  ;;  %v615_v37 = vrot.slane %v611_v16, 4  ;;  %v3493_v15 = vld [vmem:[%s4380_s13 + $0x18] sm:$0xf] }
 0x11a   : > { %v728_v28 = vsel %vm4376_vm9, %v654_v20, %v3505_v13  ;;  %v731_v29 = vsel %vm4385_vm10, %v655_v21, %v3507_v14  ;;  %v722_v30 = vsel %vm4376_vm9, %v646_v22, %v3501_v6  ;;  %v725_v33 = vsel %vm4385_vm10, %v647_v23, %v3503_v19 }
 0x11b   : > { %3506 = vst [vmem:[%s4380_s13 + $0x60] sm:$0xf] %v728_v28  ;;  %v704_v35 = vsel %vm4376_vm9, %v622_v25, %v3489_v24  ;;  %v598_v39 = vmax.f32 %v4363_v36, %v3968_v9  ;;  %v597_v40 = vmax.f32 %v4361_v34, %v3967_v10  ;;  %v594_v42 = vmax.f32 %v4367_v43, %v3958_v17  ;;  %v3495_v17 = vld [vmem:[%s4380_s13 + $0x1c] sm:$0x1] }
 0x11c   : > { %3508 = vst [vmem:[%s4380_s13 + $0x64] sm:$0x1] %v731_v29  ;;  %v593_v44 = vmax.f32 %v4365_v41, %v3957_v18  ;;  %v707_v45 = vsel %vm4385_vm10, %v623_v26, %v3491_v32  ;;  %v695_v46 = vsel %vm4376_vm9, %v614_v27, %v3485_v31  ;;  %v701_v43 = vsel %vm4385_vm10, %v615_v37, %v3487_v38 }
 0x11d   : > { %3502 = vst [vmem:[%s4380_s13 + $0x58] sm:$0xf] %v722_v30  ;;  %v606_v47 = vpack.c.bf16 %v598_v39, %v598_v39  ;;  %v605_v36 = vpack.c.bf16 %v597_v40, %v597_v40  ;;  %v602_v48 = vpack.c.bf16 %v594_v42, %v594_v42 }
 0x11e   : > { %3504 = vst [vmem:[%s4380_s13 + $0x5c] sm:$0x1] %v725_v33  ;;  %v601_v34 = vpack.c.bf16 %v593_v44, %v593_v44 }
 0x11f   : > { %3490 = vst [vmem:[%s4380_s13 + $0x10] sm:$0xf] %v704_v35  ;;  %v665_v41 = vshrl.u32 %v606_v47, 16  ;;  %v657_v49 = vshrl.u32 %v605_v36, 16  ;;  %v633_v52 = vshrl.u32 %v602_v48, 16  ;;  %v668_v55 = vshll.u32 %v606_v47, 16 }
 0x120   : > { %3492 = vst [vmem:[%s4380_s13 + $0x14] sm:$0x1] %v707_v45  ;;  %v625_v53 = vshrl.u32 %v601_v34, 16  ;;  %v660_v57 = vshll.u32 %v605_v36, 16  ;;  %v636_v60 = vshll.u32 %v602_v48, 16  ;;  %v628_v62 = vshll.u32 %v601_v34, 16 }
 0x121   : > { %3486 = vst [vmem:[%s4380_s13 + $0x8] sm:$0xf] %v695_v46  ;;  %v667_v54 = vrot.slane %v665_v41, 7  ;;  %v659_v56 = vrot.slane %v657_v49, 7  ;;  %v635_v59 = vrot.slane %v633_v52, 7 }
 0x122   : > { %3488 = vst [vmem:[%s4380_s13 + $0xc] sm:$0x1] %v701_v43  ;;  %v627_v61 = vrot.slane %v625_v53, 7 }
 0x123   : > { %v670_v0 = vor.u32 %v668_v55, %v667_v54  ;;  %v671_v1 = vrot.slane %v667_v54, 4  ;;  %v662_v2 = vor.u32 %v660_v57, %v659_v56  ;;  %v663_v3 = vrot.slane %v659_v56, 4 }
 0x124   : > { %v638_v6 = vor.u32 %v636_v60, %v635_v59  ;;  %v639_v7 = vrot.slane %v635_v59, 4  ;;  %v630_v13 = vor.u32 %v628_v62, %v627_v61  ;;  %v631_v16 = vrot.slane %v627_v61, 4 }
 0x125   : > { %v740_v8 = vsel %vm4376_vm9, %v670_v0, %v3513_v51  ;;  %v743_v9 = vsel %vm4385_vm10, %v671_v1, %v3515_v58  ;;  %v734_v10 = vsel %vm4376_vm9, %v662_v2, %v3509_v50  ;;  %v737_v14 = vsel %vm4385_vm10, %v663_v3, %v3511_v63 }
 0x126   : > { %3514 = vst [vmem:[%s4380_s13 + $0x70] sm:$0xf] %v740_v8  ;;  %v716_v18 = vsel %vm4376_vm9, %v638_v6, %v3497_v4  ;;  %v719_v19 = vsel %vm4385_vm10, %v639_v7, %v3499_v11  ;;  %v710_v20 = vsel %vm4376_vm9, %v630_v13, %v3493_v15  ;;  %v713_v21 = vsel %vm4385_vm10, %v631_v16, %v3495_v17 }
 0x127   : > { %3516 = vst [vmem:[%s4380_s13 + $0x74] sm:$0x1] %v743_v9 }
 0x128   : > { %3510 = vst [vmem:[%s4380_s13 + $0x68] sm:$0xf] %v734_v10 }
 0x129   : > { %3512 = vst [vmem:[%s4380_s13 + $0x6c] sm:$0x1] %v737_v14 }
 0x12a   : > { %3498 = vst [vmem:[%s4380_s13 + $0x20] sm:$0xf] %v716_v18 }
 0x12b   : > { %3500 = vst [vmem:[%s4380_s13 + $0x24] sm:$0x1] %v719_v19 }
 0x12c   : > { %3494 = vst [vmem:[%s4380_s13 + $0x18] sm:$0xf] %v710_v20 }
 0x12d   : > { %3496 = vst [vmem:[%s4380_s13 + $0x1c] sm:$0x1] %v713_v21 }
 0x12e PF: > { %p3517_p8 = scmp.ne.s32.totalorder %s4031_s29, 1 }
 0x12f   : > { %s3808_s14 = sshll.u32 (!%p3517_p8), %s4027_s28, 5 }
 0x130   : > { %748 = sbr.rel (%p3517_p8) target bundleno = 628 (0x274), region = 101  ;;  %s4464_s15 = scalar_lea.vmem (!%p3517_p8), [#allocation2], %s3808_s14 }
 0x135   : > { %v3520_v22 = vld [vmem:[%s5759_s1 + $0x2] sm:$0x3]  ;;  %vm911_vm11 = vcmask 1041408   ;;  %vm769_vm12 = vsmask.f32 3328  ;;  %vm898_vm14 = vcmask 31744  }
 0x136   : > { %v913_v5 = vsel %vm911_vm11, %v3520_v22, 0  ;;  %vm770_vm13 = vsmask.f32 7440  ;;  %v754_v12 = vld [vmem:[%s4464_s15 + $0x10] sm:$0xf]  ;;  %vm1032_vm0 = vcmask 1042432  }
 0x137   : > { %3868 = vmatpush.bf16.msra.mxu1 %v913_v5  ;;  %3869 = vmatpush.bf16.msra.mxu2 %v913_v5  ;;  %v755_v23 = vld [vmem:[%s4464_s15 + $0x18] sm:$0xf]  ;;  %v4469_v24 = vld [vmem:[%s4464_s15 + $0x14] sm:$0x1]  ;;  %v4472_v25 = vld [vmem:[%s4464_s15 + $0x1c] sm:$0x1] }
 0x138   : > { %3870 = vmatpush.bf16.msra.mxu3 %v913_v5  ;;  %922 = vmatpush.bf16.msra.mxu0 %v913_v5  ;;  %v801_v26 = vshrl.u32 %v754_v12, 16  ;;  %v804_v27 = vshll.u32 %v754_v12, 16  ;;  %v810_v28 = vshll.u32 %v4469_v24, 16  ;;  %v815_v29 = vshrl.u32 %v755_v23, 16  ;;  %v756_v32 = vld [vmem:[%s4464_s15 + $0x50] sm:$0xf]  ;;  %vm4488_vm15 = vmor %vm769_vm12, %vm770_vm13 }
 0x139   : > { %v818_v30 = vshll.u32 %v755_v23, 16  ;;  %v824_v31 = vshll.u32 %v4472_v25, 16  ;;  %v757_v33 = vld [vmem:[%s4464_s15 + $0x58] sm:$0xf]  ;;  %v4479_v40 = vld [vmem:[%s4464_s15 + $0x54] sm:$0x1] }
 0x13a   : > { %v803_v35 = vrot.slane %v801_v26, 4  ;;  %v806_v37 = vrot.slane %v804_v27, 5  ;;  %v812_v38 = vrot.slane %v810_v28, 5  ;;  %v817_v39 = vrot.slane %v815_v29, 4  ;;  %v4482_v45 = vld [vmem:[%s4464_s15 + $0x5c] sm:$0x1] }
 0x13b   : > { %v820_v42 = vrot.slane %v818_v30, 5  ;;  %v826_v44 = vrot.slane %v824_v31, 5  ;;  %v829_v46 = vshrl.u32 %v756_v32, 16  ;;  %v832_v47 = vshll.u32 %v756_v32, 16  ;;  %v758_v41 = vld [vmem:[%s4464_s15 + $0x60] sm:$0xf] }
 0x13c   : > { %v807_v36 = vor.u32 %v806_v37, %v803_v35  ;;  %v838_v48 = vshll.u32 %v4479_v40, 16  ;;  %v843_v34 = vshrl.u32 %v757_v33, 16  ;;  %v846_v43 = vshll.u32 %v757_v33, 16  ;;  %v4494_v58 = vld [vmem:[%s4464_s15 + $0x64] sm:$0x1] }
 0x13d   : > { %v821_v50 = vor.u32 %v820_v42, %v817_v39  ;;  %v831_v51 = vrot.slane %v829_v46, 4  ;;  %v834_v52 = vrot.slane %v832_v47, 5  ;;  %v852_v53 = vshll.u32 %v4482_v45, 16  ;;  %v759_v1 = vld [vmem:[%s4464_s15 + $0x68] sm:$0xf] }
 0x13e   : > { %v808_v54 = vrot.slane %v807_v36, 4  ;;  %v840_v55 = vrot.slane %v838_v48, 5  ;;  %v845_v56 = vrot.slane %v843_v34, 4  ;;  %v848_v57 = vrot.slane %v846_v43, 5  ;;  %v4500_v2 = vld [vmem:[%s4464_s15 + $0x6c] sm:$0x1] }
 0x13f   : > { %v822_v59 = vrot.slane %v821_v50, 4  ;;  %v835_v60 = vor.u32 %v834_v52, %v831_v51  ;;  %v854_v61 = vrot.slane %v852_v53, 5  ;;  %v857_v62 = vshrl.u32 %v758_v41, 16  ;;  %v3553_v15 = vld [vmem:[%s5759_s1 + $0x4] sm:$0x3] }
 0x140   : > { %v813_v63 = vsel %vm4488_vm15, %v808_v54, %v812_v38  ;;  %v849_v0 = vor.u32 %v848_v57, %v845_v56  ;;  %v860_v3 = vshll.u32 %v758_v41, 16  ;;  %v866_v4 = vshll.u32 %v4494_v58, 16  ;;  %v752_v20 = vld [vmem:[%s4464_s15] sm:$0xf]  ;;  %v753_v23 = vld [vmem:[%s4464_s15 + $0x8] sm:$0xf] }
 0x141   : > { %v827_v6 = vsel %vm4488_vm15, %v822_v59, %v826_v44  ;;  %v888_v7 = vunpack.c.l.b16 %v813_v63  ;;  %v836_v8 = vrot.slane %v835_v60, 4  ;;  %v859_v9 = vrot.slane %v857_v62, 4  ;;  %v761_v26 = vld [vmem:[%s4464_s15 + $0x4] sm:$0x1]  ;;  %v762_v39 = vld [vmem:[%s4464_s15 + $0xc] sm:$0x1] }
 0x142   : > { %v889_v10 = vunpack.c.l.b16 %v827_v6  ;;  %v850_v11 = vrot.slane %v849_v0, 4  ;;  %v862_v13 = vrot.slane %v860_v3, 5  ;;  %v868_v14 = vrot.slane %v866_v4, 5  ;;  %v3568_v46 = vld [vmem:[%s5759_s1 + $0x6] sm:$0x3] }
 0x143   : > { %v841_v16 = vsel %vm4488_vm15, %v836_v8, %v840_v55  ;;  %v871_v17 = vshrl.u32 %v759_v1, 16  ;;  %v874_v18 = vshll.u32 %v759_v1, 16  ;;  %v880_v19 = vshll.u32 %v4500_v2, 16  ;;  %v760_v43 = vld [vmem:[%s5759_s1] sm:$0x3] }
 0x144   : > { %v895_v21 = vpack.c.b16 %v889_v10, %v888_v7  ;;  %v855_v22 = vsel %vm4488_vm15, %v850_v11, %v854_v61  ;;  %v890_v5 = vunpack.c.l.b16 %v841_v16  ;;  %v863_v12 = vor.u32 %v862_v13, %v859_v9  ;;  %v3605_v53 = vld [vmem:[%s5759_s1 + $0x8] sm:$0x3]  ;;  %v3527_v59 = vld [vmem:[%s4464_s15] sm:$0xf]  ;;  %v3641_v9 = vld [vmem:[%s5759_s1 + $0xc] sm:$0x3] }
 0x145   : > { %v891_v27 = vunpack.c.l.b16 %v855_v22  ;;  %v873_v28 = vrot.slane %v871_v17, 4  ;;  %v876_v29 = vrot.slane %v874_v18, 5  ;;  %v882_v30 = vrot.slane %v880_v19, 5  ;;  %v1008_v60 = vld [vmem:[%s4464_s15] sm:$0xe] }
 0x146   : > { %3522 = vmatmul.msk.bf16.vlgmr.msra.gmra.mxu1 %vm898_vm14, %v895_v21  ;;  %v864_v31 = vrot.slane %v863_v12, 4  ;;  %v1094_v32 = vsel %vm911_vm11, %v3553_v15, 0  ;;  %v773_v33 = vshrl.u32 %v752_v20, 16  ;;  %v776_v35 = vshll.u32 %v752_v20, 16  ;;  %v1009_v1 = vld [vmem:[%s4464_s15 + $0x8] sm:$0xe] }
 0x147   : > { %v896_v37 = vpack.c.b16 %v891_v27, %v890_v5  ;;  %v877_v38 = vor.u32 %v876_v29, %v873_v28  ;;  %1103 = vmatpush.bf16.msrb.mxu2 %v1094_v32  ;;  %v782_v42 = vshll.u32 %v761_v26, 16  ;;  %v787_v44 = vshrl.u32 %v753_v23, 16  ;;  %v3809_v8 = vld [vmem:[%s4464_s15 + $0x4] sm:$0xf0]  ;;  %v4552_v19 = vld [vmem:[%s4464_s15 + $0xc] sm:$0x1] }
 0x148   : > { %v869_v47 = vsel %vm4488_vm15, %v864_v31, %v868_v14  ;;  %v775_v36 = vrot.slane %v773_v33, 4  ;;  %v778_v48 = vrot.slane %v776_v35, 5  ;;  %v790_v34 = vshll.u32 %v753_v23, 16  ;;  %v3589_v13 = vld [vmem:[%s4464_s15 + $0x8] sm:$0xf] }
 0x149   : > { %3523 = vmatmul.msk.bf16.vlgmr.msra.gmra.mxu2 %vm898_vm14, %v896_v37  ;;  %v878_v41 = vrot.slane %v877_v38, 4  ;;  %v892_v50 = vunpack.c.l.b16 %v869_v47  ;;  %v784_v51 = vrot.slane %v782_v42, 5  ;;  %v789_v52 = vrot.slane %v787_v44, 4  ;;  %v3591_v12 = vld [vmem:[%s4464_s15 + $0x10] sm:$0xf] }
 0x14a   : > { %v779_v54 = vor.u32 %v778_v48, %v775_v36  ;;  %v792_v55 = vrot.slane %v790_v34, 5  ;;  %v796_v56 = vshll.u32 %v762_v39, 16  ;;  %v1037_v57 = vrot.slane %v761_v26, 5  ;;  %v4559_v23 = vld [vmem:[%s4464_s15 + $0x14] sm:$0x1] }
 0x14b   : > { %v883_v61 = vsel %vm4488_vm15, %v878_v41, %v882_v30  ;;  %v1041_v62 = vrot.slane %v762_v39, 5  ;;  %v1180_v63 = vsel %vm911_vm11, %v3568_v46, 0  ;;  %v977_v0 = vsel %vm911_vm11, %v760_v43, 0  ;;  %v3678_v35 = vld [vmem:[%s5759_s1 + $0xe] sm:$0x3] }
 0x14c   : > { %v893_v3 = vunpack.c.l.b16 %v883_v61  ;;  %v780_v4 = vrot.slane %v779_v54, 4  ;;  %v793_v6 = vor.u32 %v792_v55, %v789_v52  ;;  %v798_v7 = vrot.slane %v796_v56, 5  ;;  %1189 = vmatpush.bf16.msrb.mxu3 %v1180_v63  ;;  %986 = vmatpush.bf16.msrb.mxu1 %v977_v0  ;;  %v3626_v44 = vld [vmem:[%s5759_s1 + $0xa] sm:$0x3]  ;;  %v3699_v36 = vld [vmem:[%s5759_s1 + $0x10] sm:$0x3] }
 0x14d   : > { %v1374_v10 = vsel %vm911_vm11, %v3605_v53, 0  ;;  %vm1033_vm1 = vcmask 1046532   ;;  %v3545_v11 = vrot.slane %v1008_v60, 9  ;;  %v3546_v18 = vrot.slane %v1009_v1, 9  ;;  %v1010_v52 = vld [vmem:[%s4464_s15 + $0x10] sm:$0xe] }
 0x14e   : > { %v897_v14 = vpack.c.b16 %v893_v3, %v892_v50  ;;  %v785_v15 = vsel %vm4488_vm15, %v780_v4, %v784_v51  ;;  %v794_v16 = vrot.slane %v793_v6, 4  ;;  %1383 = vmatpush.bf16.msrb.mxu0 %v1374_v10  ;;  %vm4547_vm2 = vmor %vm1032_vm0, %vm1033_vm1  ;;  %v3528_v21 = vor.u32 %v3809_v8, %v3527_v59  ;;  %v3593_v60 = vld [vmem:[%s4464_s15 + $0x18] sm:$0xf]  ;;  %v3571_v61 = vld [vmem:[%s4464_s15 + $0x8] sm:$0xf] }
 0x14f   : > { %v886_v20 = vunpack.c.l.b16 %v785_v15  ;;  %v1038_v22 = vsel %vm4547_vm2, %v3545_v11, %v1037_v57  ;;  %v1582_v5 = vsel %vm911_vm11, %v3641_v9, 0  ;;  %v1042_v27 = vsel %vm4547_vm2, %v3546_v18, %v1041_v62  ;;  %v1011_v57 = vld [vmem:[%s4464_s15 + $0x18] sm:$0xe]  ;;  %v3814_v62 = vld [vmem:[%s4464_s15 + $0xc] sm:$0xf0] }
 0x150   : > { %3524 = vmatmul.msk.bf16.vlgmr.msra.gmra.mxu3 %vm898_vm14, %v897_v14  ;;  %v799_v26 = vsel %vm4488_vm15, %v794_v16, %v798_v7  ;;  %v1069_v28 = vunpack.c.l.b16 %v1038_v22  ;;  %1591 = vmatpush.bf16.msra.mxu2 %v1582_v5  ;;  %v1236_v29 = vshrl.u32 %v3589_v13, 16  ;;  %v1070_v31 = vunpack.c.l.b16 %v1042_v27  ;;  %v3595_v6 = vld [vmem:[%s4464_s15 + $0x20] sm:$0xf]  ;;  %v3531_v16 = vld [vmem:[%s4464_s15 + $0x10] sm:$0xf] }
 0x151   : > { %v887_v30 = vunpack.c.l.b16 %v799_v26  ;;  %v1239_v32 = vshll.u32 %v3589_v13, 16  ;;  %v1245_v33 = vshll.u32 %v4552_v19, 16  ;;  %v1250_v38 = vshrl.u32 %v3591_v12, 16  ;;  %v4602_v26 = vld [vmem:[%s4464_s15 + $0x1c] sm:$0x1] }
 0x152   : > { %v1238_v37 = vrot.slane %v1236_v29, 4  ;;  %v1253_v39 = vshll.u32 %v3591_v12, 16  ;;  %v1259_v42 = vshll.u32 %v4559_v23, 16  ;;  %v1077_v43 = vpack.c.b16 %v1070_v31, %v1069_v28  ;;  %v4605_v27 = vld [vmem:[%s4464_s15 + $0x24] sm:$0x1] }
 0x153   : > { %v894_v46 = vpack.c.b16 %v887_v30, %v886_v20  ;;  %v1241_v47 = vrot.slane %v1239_v32, 5  ;;  %v1252_v48 = vrot.slane %v1250_v38, 4  ;;  %v1776_v50 = vsel %vm911_vm11, %v3678_v35, 0  ;;  %v3810_v20 = vld [vmem:[%s4464_s15 + $0x14] sm:$0xf0] }
 0x154   : > { %v1255_v34 = vrot.slane %v1253_v39, 5  ;;  %v1496_v51 = vsel %vm911_vm11, %v3626_v44, 0  ;;  %v1247_v53 = vrot.slane %v1245_v33, 5  ;;  %v1261_v55 = vrot.slane %v1259_v42, 5  ;;  %1785 = vmatpush.bf16.msra.mxu3 %v1776_v50  ;;  %v1012_v39 = vld [vmem:[%s4464_s15 + $0x50] sm:$0xe] }
 0x155   : > { %3521 = vmatmul.msk.bf16.vlgmr.msra.gmra.mxu0 %vm898_vm14, %v894_v46  ;;  %v1242_v41 = vor.u32 %v1241_v47, %v1238_v37  ;;  %v1898_v56 = vsel %vm911_vm11, %v3699_v36, 0  ;;  %1505 = vmatpush.bf16.msra.mxu1 %v1496_v51  ;;  %v3547_v0 = vrot.slane %v1010_v52, 9  ;;  %v1045_v1 = vrot.slane %v4469_v24, 5  ;;  %v1013_v42 = vld [vmem:[%s4464_s15 + $0x58] sm:$0xe] }
 0x156   : > { %3541 = vmatmul.msk.bf16.vlgmr.msrb.gmra.mxu1 %vm898_vm14, %v3528_v21  ;;  %v1256_v54 = vor.u32 %v1255_v34, %v1252_v48  ;;  %1907 = vmatpush.bf16.msra.mxu0 %v1898_v56  ;;  %v3548_v3 = vrot.slane %v1011_v57, 9  ;;  %v1049_v4 = vrot.slane %v4472_v25, 5  ;;  %v1264_v9 = vshrl.u32 %v3593_v60, 16  ;;  %v3597_v48 = vld [vmem:[%s4464_s15 + $0x58] sm:$0xf] }
 0x157   : > { %v1243_v59 = vrot.slane %v1242_v41, 4  ;;  %v1267_v10 = vshll.u32 %v3593_v60, 16  ;;  %v3572_v11 = vor.u32 %v3814_v62, %v3571_v61  ;;  %v1278_v13 = vshrl.u32 %v3595_v6, 16  ;;  %v3599_v34 = vld [vmem:[%s4464_s15 + $0x60] sm:$0xf] }
 0x158   : > { %v1257_v63 = vrot.slane %v1256_v54, 4  ;;  %v1281_v14 = vshll.u32 %v3595_v6, 16  ;;  %v1046_v25 = vsel %vm4547_vm2, %v3547_v0, %v1045_v1  ;;  %v1050_v18 = vsel %vm4547_vm2, %v3548_v3, %v1049_v4  ;;  %v3815_v51 = vld [vmem:[%s4464_s15 + $0x1c] sm:$0xf0]  ;;  %v4630_v0 = vld [vmem:[%s4464_s15 + $0x5c] sm:$0x1] }
 0x159   : > { %3554 = vmatmul.msk.bf16.vlgmr.msrb.gmra.mxu2 %vm898_vm14, %v1077_v43  ;;  %v1248_v7 = vsel %vm4488_vm15, %v1243_v59, %v1247_v53  ;;  %v1266_v21 = vrot.slane %v1264_v9, 4  ;;  %v1269_v22 = vrot.slane %v1267_v10, 5  ;;  %v1280_v5 = vrot.slane %v1278_v13, 4  ;;  %v3575_v43 = vld [vmem:[%s4464_s15 + $0x18] sm:$0xf] }
 0x15a   : > { %v1262_v8 = vsel %vm4488_vm15, %v1257_v63, %v1261_v55  ;;  %v1349_v15 = vunpack.c.l.b16 %v1248_v7  ;;  %v1283_v12 = vrot.slane %v1281_v14, 5  ;;  %v3532_v29 = vor.u32 %v3810_v20, %v3531_v16  ;;  %v4633_v1 = vld [vmem:[%s4464_s15 + $0x64] sm:$0x1]  ;;  %v3811_v9 = vld [vmem:[%s4464_s15 + $0x54] sm:$0xf0] }
 0x15b   : > { %v1350_v24 = vunpack.c.l.b16 %v1262_v8  ;;  %v1071_v30 = vunpack.c.l.b16 %v1046_v25  ;;  %v1072_v31 = vunpack.c.l.b16 %v1050_v18  ;;  %v1270_v32 = vor.u32 %v1269_v22, %v1266_v21  ;;  %v3535_v8 = vld [vmem:[%s4464_s15 + $0x50] sm:$0xf]  ;;  %v3601_v18 = vld [vmem:[%s4464_s15 + $0x68] sm:$0xf] }
 0x15c   : > { %v1273_v33 = vshll.u32 %v4602_v26, 16  ;;  %v1284_v35 = vor.u32 %v1283_v12, %v1280_v5  ;;  %v1287_v37 = vshll.u32 %v4605_v27, 16  ;;  %v3549_v41 = vrot.slane %v1012_v39, 9  ;;  %v3603_v5 = vld [vmem:[%s4464_s15 + $0x70] sm:$0xf] }
 0x15d   : > { %v1357_v28 = vpack.c.b16 %v1350_v24, %v1349_v15  ;;  %v1078_v38 = vpack.c.b16 %v1072_v31, %v1071_v30  ;;  %v1271_v44 = vrot.slane %v1270_v32, 4  ;;  %v1053_v50 = vrot.slane %v4479_v40, 5  ;;  %v1015_v30 = vld [vmem:[%s4464_s15 + $0x68] sm:$0xe] }
 0x15e   : > { %v1275_v46 = vrot.slane %v1273_v33, 5  ;;  %v1285_v47 = vrot.slane %v1284_v35, 4  ;;  %v1289_v36 = vrot.slane %v1287_v37, 5  ;;  %v3550_v52 = vrot.slane %v1013_v42, 9  ;;  %v3579_v33 = vld [vmem:[%s4464_s15 + $0x58] sm:$0xf] }
 0x15f   : > { %v1057_v53 = vrot.slane %v4482_v45, 5  ;;  %v1292_v54 = vshrl.u32 %v3597_v48, 16  ;;  %v1295_v55 = vshll.u32 %v3597_v48, 16  ;;  %v1306_v59 = vshrl.u32 %v3599_v34, 16 }
 0x160   : > { %3585 = vmatmul.msk.bf16.vlgmr.msrb.gmra.mxu3 %vm898_vm14, %v3572_v11  ;;  %v1276_v56 = vsel %vm4488_vm15, %v1271_v44, %v1275_v46  ;;  %v1290_v57 = vsel %vm4488_vm15, %v1285_v47, %v1289_v36  ;;  %v1309_v40 = vshll.u32 %v3599_v34, 16  ;;  %v3576_v60 = vor.u32 %v3815_v51, %v3575_v43 }
 0x161   : > { %v1351_v61 = vunpack.c.l.b16 %v1276_v56  ;;  %v1352_v62 = vunpack.c.l.b16 %v1290_v57  ;;  %v1054_v63 = vsel %vm4547_vm2, %v3549_v41, %v1053_v50  ;;  %v1058_v45 = vsel %vm4547_vm2, %v3550_v52, %v1057_v53  ;;  %v4656_v41 = vld [vmem:[%s4464_s15 + $0x6c] sm:$0x1]  ;;  %v3812_v56 = vld [vmem:[%s4464_s15 + $0x64] sm:$0xf0] }
 0x162   : > { %v1294_v3 = vrot.slane %v1292_v54, 4  ;;  %v1297_v4 = vrot.slane %v1295_v55, 5  ;;  %v1308_v6 = vrot.slane %v1306_v59, 4  ;;  %v1311_v7 = vrot.slane %v1309_v40, 5  ;;  %v4663_v54 = vld [vmem:[%s4464_s15 + $0x74] sm:$0x1] }
 0x163   : > { %v1073_v10 = vunpack.c.l.b16 %v1054_v63  ;;  %v1358_v11 = vpack.c.b16 %v1352_v62, %v1351_v61  ;;  %v1074_v13 = vunpack.c.l.b16 %v1058_v45  ;;  %v1301_v14 = vshll.u32 %v4630_v0, 16  ;;  %v3539_v55 = vld [vmem:[%s4464_s15 + $0x60] sm:$0xf] }
 0x164   : > { %v1315_v15 = vshll.u32 %v4633_v1, 16  ;;  %v3536_v24 = vor.u32 %v3811_v9, %v3535_v8  ;;  %v1298_v16 = vor.u32 %v1297_v4, %v1294_v3  ;;  %v1312_v25 = vor.u32 %v1311_v7, %v1308_v6  ;;  %v3662_v3 = vld [vmem:[%s4464_s15 + $0x10] sm:$0xf]  ;;  %v3664_v4 = vld [vmem:[%s4464_s15 + $0x18] sm:$0xf] }
 0x165   : > { %3606 = vmatmul.msk.bf16.vlgmr.msrb.gmra.mxu0 %vm898_vm14, %v1357_v28  ;;  %v1079_v20 = vpack.c.b16 %v1074_v13, %v1073_v10  ;;  %v1303_v21 = vrot.slane %v1301_v14, 5  ;;  %v1320_v31 = vshrl.u32 %v3601_v18, 16  ;;  %v1323_v32 = vshll.u32 %v3601_v18, 16  ;;  %v3611_v13 = vld [vmem:[%s4464_s15 + $0x10] sm:$0xe] }
 0x166   : > { %3542 = vmatmul.msk.bf16.gmra.mxu1 %vm898_vm14, %v3532_v29  ;;  %v1317_v22 = vrot.slane %v1315_v15, 5  ;;  %v1299_v12 = vrot.slane %v1298_v16, 4  ;;  %v1313_v28 = vrot.slane %v1312_v25, 4  ;;  %v1014_v29 = vld [vmem:[%s4464_s15 + $0x60] sm:$0xe]  ;;  %v1334_v35 = vshrl.u32 %v3603_v5, 16 }
 0x167   : > { %v1337_v37 = vshll.u32 %v3603_v5, 16  ;;  %v3551_v39 = vrot.slane %v1014_v29, 9  ;;  %v1061_v42 = vrot.slane %v4494_v58, 5  ;;  %v3552_v44 = vrot.slane %v1015_v30, 9 }
 0x168   : > { %v1065_v46 = vrot.slane %v4500_v2, 5  ;;  %v1304_v47 = vsel %vm4488_vm15, %v1299_v12, %v1303_v21  ;;  %v1318_v36 = vsel %vm4488_vm15, %v1313_v28, %v1317_v22  ;;  %v1322_v48 = vrot.slane %v1320_v31, 4  ;;  %v3583_v22 = vld [vmem:[%s4464_s15 + $0x68] sm:$0xf]  ;;  %v3817_v28 = vld [vmem:[%s4464_s15 + $0x6c] sm:$0xf0] }
 0x169   : > { %3555 = vmatmul.msk.bf16.gmra.mxu2 %vm898_vm14, %v1078_v38  ;;  %v3816_v38 = vld [vmem:[%s4464_s15 + $0x5c] sm:$0xf0]  ;;  %v1325_v34 = vrot.slane %v1323_v32, 5  ;;  %v1336_v50 = vrot.slane %v1334_v35, 4  ;;  %v1339_v51 = vrot.slane %v1337_v37, 5  ;;  %v1353_v52 = vunpack.c.l.b16 %v1304_v47 }
 0x16a   : > { %v3580_v43 = vor.u32 %v3816_v38, %v3579_v33  ;;  %v1354_v58 = vunpack.c.l.b16 %v1318_v36  ;;  %v1062_v2 = vsel %vm4547_vm2, %v3551_v39, %v1061_v42  ;;  %v1066_v53 = vsel %vm4547_vm2, %v3552_v44, %v1065_v46 }
 0x16b   : > { %v1326_v57 = vor.u32 %v1325_v34, %v1322_v48  ;;  %v1329_v59 = vshll.u32 %v4656_v41, 16  ;;  %v1075_v40 = vunpack.c.l.b16 %v1062_v2  ;;  %v1340_v61 = vor.u32 %v1339_v51, %v1336_v50  ;;  %v3644_v34 = vld [vmem:[%s4464_s15 + $0x10] sm:$0xf]  ;;  %v3819_v50 = vld [vmem:[%s4464_s15 + $0x14] sm:$0xf0] }
 0x16c   : > { %v1343_v62 = vshll.u32 %v4663_v54, 16  ;;  %v1359_v63 = vpack.c.b16 %v1354_v58, %v1353_v52  ;;  %v3540_v45 = vor.u32 %v3812_v56, %v3539_v55  ;;  %v1638_v14 = vshrl.u32 %v3662_v3, 16  ;;  %v3666_v51 = vld [vmem:[%s4464_s15 + $0x20] sm:$0xf]  ;;  %v3668_v52 = vld [vmem:[%s4464_s15 + $0x28] sm:$0xf] }
 0x16d   : > { %v1327_v6 = vrot.slane %v1326_v57, 4  ;;  %v1331_v7 = vrot.slane %v1329_v59, 5  ;;  %v1341_v9 = vrot.slane %v1340_v61, 4  ;;  %v1641_v15 = vshll.u32 %v3662_v3, 16  ;;  %v3683_v56 = vld [vmem:[%s4464_s15 + $0x10] sm:$0xe] }
 0x16e   : > { %v1345_v10 = vrot.slane %v1343_v62, 5  ;;  %v1655_v16 = vshll.u32 %v3664_v4, 16  ;;  %v1439_v25 = vrot.slane %v4552_v19, 5  ;;  %v1443_v18 = vrot.slane %v4559_v23, 5  ;;  %v3663_v19 = vld [vmem:[%s4464_s15 + $0x14] sm:$0x1] }
 0x16f   : > { %v3619_v21 = vrot.slane %v3611_v13, 9  ;;  %v1332_v5 = vsel %vm4488_vm15, %v1327_v6, %v1331_v7  ;;  %v1640_v29 = vrot.slane %v1638_v14, 4  ;;  %v1643_v30 = vrot.slane %v1641_v15, 5  ;;  %v3665_v23 = vld [vmem:[%s4464_s15 + $0x1c] sm:$0x1] }
 0x170   : > { %3586 = vmatmul.msk.bf16.gmra.mxu3 %vm898_vm14, %v3576_v60  ;;  %v1076_v60 = vunpack.c.l.b16 %v1066_v53  ;;  %v1346_v12 = vsel %vm4488_vm15, %v1341_v9, %v1345_v10  ;;  %v1657_v32 = vrot.slane %v1655_v16, 5  ;;  %v3584_v37 = vor.u32 %v3817_v28, %v3583_v22  ;;  %v3684_v59 = vld [vmem:[%s4464_s15 + $0x18] sm:$0xe]  ;;  %v3667_v22 = vld [vmem:[%s4464_s15 + $0x24] sm:$0x1] }
 0x171   : > { %v1444_v35 = vsel %vm4547_vm2, %v3619_v21, %v1443_v18  ;;  %v1355_v38 = vunpack.c.l.b16 %v1332_v5  ;;  %v1356_v39 = vunpack.c.l.b16 %v1346_v12  ;;  %v1644_v42 = vor.u32 %v1643_v30, %v1640_v29  ;;  %v3669_v5 = vld [vmem:[%s4464_s15 + $0x2c] sm:$0x1] }
 0x172   : > { %v1080_v8 = vpack.c.b16 %v1076_v60, %v1075_v40  ;;  %v1647_v44 = vshll.u32 %v3663_v19, 16  ;;  %v1661_v47 = vshll.u32 %v3665_v23, 16  ;;  %v1472_v48 = vunpack.c.l.b16 %v1444_v35  ;;  %v3612_v40 = vld [vmem:[%s4464_s15 + $0x18] sm:$0xe]  ;;  %v3613_v60 = vld [vmem:[%s4464_s15 + $0x20] sm:$0xe] }
 0x173   : > { %v1645_v58 = vrot.slane %v1644_v42, 4  ;;  %v1666_v61 = vshrl.u32 %v3666_v51, 16  ;;  %v1669_v62 = vshll.u32 %v3666_v51, 16  ;;  %v3645_v3 = vor.u32 %v3819_v50, %v3644_v34  ;;  %v3648_v34 = vld [vmem:[%s4464_s15 + $0x20] sm:$0xf] }
 0x174   : > { %v1649_v2 = vrot.slane %v1647_v44, 5  ;;  %v1663_v55 = vrot.slane %v1661_v47, 5  ;;  %v1841_v6 = vrot.slane %v3663_v19, 5  ;;  %v3692_v9 = vrot.slane %v3684_v59, 9  ;;  %v3670_v47 = vld [vmem:[%s4464_s15 + $0x60] sm:$0xf] }
 0x175   : > { %3607 = vmatmul.msk.bf16.gmra.mxu0 %vm898_vm14, %v1358_v11  ;;  %v3610_v11 = vld [vmem:[%s4464_s15 + $0x8] sm:$0xe]  ;;  %v1845_v10 = vrot.slane %v3665_v23, 5  ;;  %v1447_v13 = vrot.slane %v4602_v26, 5  ;;  %v3621_v14 = vrot.slane %v3613_v60, 9  ;;  %v1451_v15 = vrot.slane %v4605_v27, 5 }
 0x176   : > { %3543 = vmatmul.msk.bf16.gmra.mxu1 %vm898_vm14, %v3536_v24  ;;  %v1652_v24 = vshrl.u32 %v3664_v4, 16  ;;  %v3691_v4 = vrot.slane %v3683_v56, 9  ;;  %v1650_v7 = vsel %vm4488_vm15, %v1645_v58, %v1649_v2  ;;  %v1671_v16 = vrot.slane %v1669_v62, 5  ;;  %v3685_v50 = vld [vmem:[%s4464_s15 + $0x20] sm:$0xe] }
 0x177   : > { %v1846_v28 = vsel %vm4547_vm2, %v3692_v9, %v1845_v10  ;;  %v1452_v27 = vsel %vm4547_vm2, %v3621_v14, %v1451_v15  ;;  %v1675_v30 = vshll.u32 %v3667_v22, 16  ;;  %v3686_v58 = vld [vmem:[%s4464_s15 + $0x28] sm:$0xe]  ;;  %v3614_v2 = vld [vmem:[%s4464_s15 + $0x58] sm:$0xe]  ;;  %v1697_v56 = vshll.u32 %v3670_v47, 16 }
 0x178   : > { %v1654_v31 = vrot.slane %v1652_v24, 4  ;;  %v1668_v24 = vrot.slane %v1666_v61, 4  ;;  %v1842_v12 = vsel %vm4547_vm2, %v3691_v4, %v1841_v6  ;;  %v3693_v60 = vrot.slane %v3685_v50, 9  ;;  %v3671_v14 = vld [vmem:[%s4464_s15 + $0x64] sm:$0x1] }
 0x179   : > { %3556 = vmatmul.msk.bf16.gmra.mxu2 %vm898_vm14, %v1079_v20  ;;  %v3618_v20 = vrot.slane %v3610_v11, 9  ;;  %v3620_v11 = vrot.slane %v3612_v40, 9  ;;  %v1873_v23 = vunpack.c.l.b16 %v1842_v12  ;;  %v1849_v61 = vrot.slane %v3667_v22, 5  ;;  %v3673_v15 = vld [vmem:[%s4464_s15 + $0x6c] sm:$0x1] }
 0x17a   : > { %v1658_v46 = vor.u32 %v1657_v32, %v1654_v31  ;;  %v1672_v29 = vor.u32 %v1671_v16, %v1668_v24  ;;  %v1689_v32 = vshll.u32 %v3669_v5, 16  ;;  %v3622_v4 = vrot.slane %v3614_v2, 9  ;;  %v3617_v50 = vld [vmem:[%s4464_s15 + $0x70] sm:$0xe] }
 0x17b   : > { %v1440_v33 = vsel %vm4547_vm2, %v3618_v20, %v1439_v25  ;;  %v1751_v20 = vunpack.c.l.b16 %v1650_v7  ;;  %v1448_v26 = vsel %vm4547_vm2, %v3620_v11, %v1447_v13  ;;  %v1455_v6 = vrot.slane %v4630_v0, 5 }
 0x17c   : > { %v1471_v36 = vunpack.c.l.b16 %v1440_v33  ;;  %v1659_v53 = vrot.slane %v1658_v46, 4  ;;  %v1874_v33 = vunpack.c.l.b16 %v1846_v28  ;;  %v1473_v35 = vunpack.c.l.b16 %v1448_v26 }
 0x17d   : > { %v1691_v44 = vrot.slane %v1689_v32, 5  ;;  %v1699_v10 = vrot.slane %v1697_v56, 5  ;;  %v1850_v24 = vsel %vm4547_vm2, %v3693_v60, %v1849_v61  ;;  %v1717_v22 = vshll.u32 %v3673_v15, 16 }
 0x17e   : > { %v1479_v57 = vpack.c.b16 %v1472_v48, %v1471_v36  ;;  %v1881_v46 = vpack.c.b16 %v1874_v33, %v1873_v23  ;;  %v3672_v36 = vld [vmem:[%s4464_s15 + $0x68] sm:$0xf]  ;;  %v3687_v23 = vld [vmem:[%s4464_s15 + $0x60] sm:$0xe]  ;;  %v3625_v56 = vrot.slane %v3617_v50, 9  ;;  %vm2085_vm3 = vcmask 60416  }
 0x17f   : > { %v1711_v59 = vshll.u32 %v3672_v36, 16  ;;  %vm2086_vm4 = vsmask.f32 7938  ;;  %vm1961_vm5 = vcmask 57344   ;;  %vm2092_vm6 = vsmask.f32 256 }
 0x180   : > { %3587 = vmatmul.msk.bf16.gmra.mxu3 %vm898_vm14, %v3580_v43  ;;  %v1360_v43 = vpack.c.b16 %v1356_v39, %v1355_v38  ;;  %v1673_v38 = vrot.slane %v1672_v29, 4  ;;  %v1677_v39 = vrot.slane %v1675_v30, 5  ;;  %v3821_v29 = vld [vmem:[%s4464_s15 + $0x64] sm:$0xf0]  ;;  %vm1938_vm7 = vcmask 64512   ;;  %vm4843_vm8 = vmand %vm2085_vm3, %vm2086_vm4 }
 0x181   : > { %v1713_v13 = vrot.slane %v1711_v59, 5  ;;  %vm4853_vm9 = vmand %vm1961_vm5, %vm2092_vm6 }
 0x182   : > { %v1678_v51 = vsel %vm4488_vm15, %v1673_v38, %v1677_v39  ;;  %v3674_v38 = vld [vmem:[%s4464_s15 + $0x70] sm:$0xf]  ;;  %v3676_v39 = vld [vmem:[%s4464_s15 + $0x78] sm:$0xf] }
 0x183   : > { %v1753_v62 = vunpack.c.l.b16 %v1678_v51  ;;  %v1722_v51 = vshrl.u32 %v3674_v38, 16  ;;  %v1739_v2 = vshll.u32 %v3676_v39, 16 }
 0x185   : > { %3608 = vmatmul.msk.bf16.gmra.mxu0 %vm898_vm14, %v1359_v63  ;;  %v1680_v63 = vshrl.u32 %v3668_v52, 16 }
 0x186   : > { %3544 = vmatmul.msk.bf16.gmra.mxu1 %vm898_vm14, %v3540_v45  ;;  %v1683_v45 = vshll.u32 %v3668_v52, 16 }
 0x187   : > { %v1682_v25 = vrot.slane %v1680_v63, 4 }
 0x188   : > { %v1685_v18 = vrot.slane %v1683_v45, 5  ;;  %v3694_v45 = vrot.slane %v3686_v58, 9  ;;  %v1736_v58 = vshrl.u32 %v3676_v39, 16 }
 0x189   : > { %3557 = vmatmul.msk.bf16.gmra.mxu2 %vm898_vm14, %v1080_v8  ;;  %v1664_v8 = vsel %vm4488_vm15, %v1659_v53, %v1663_v55  ;;  %v3615_v53 = vld [vmem:[%s4464_s15 + $0x60] sm:$0xe]  ;;  %v1694_v55 = vshrl.u32 %v3670_v47, 16 }
 0x18a   : > { %v1752_v21 = vunpack.c.l.b16 %v1664_v8  ;;  %v1686_v31 = vor.u32 %v1685_v18, %v1682_v25  ;;  %v3623_v7 = vrot.slane %v3615_v53, 9  ;;  %v1459_v8 = vrot.slane %v4633_v1, 5 }
 0x18b   : > { %v1696_v9 = vrot.slane %v1694_v55, 4  ;;  %v1456_v1 = vsel %vm4547_vm2, %v3622_v4, %v1455_v6  ;;  %v1463_v55 = vrot.slane %v4656_v41, 5  ;;  %v3675_v4 = vld [vmem:[%s4464_s15 + $0x74] sm:$0x1]  ;;  %v3677_v6 = vld [vmem:[%s4464_s15 + $0x7c] sm:$0x1] }
 0x18c   : > { %v1759_v19 = vpack.c.b16 %v1752_v21, %v1751_v20  ;;  %v1687_v42 = vrot.slane %v1686_v31, 4  ;;  %v1460_v25 = vsel %vm4547_vm2, %v3623_v7, %v1459_v8  ;;  %v1703_v20 = vshll.u32 %v3671_v14, 16 }
 0x18d   : > { %v1700_v18 = vor.u32 %v1699_v10, %v1696_v9  ;;  %v1475_v28 = vunpack.c.l.b16 %v1456_v1  ;;  %v1476_v26 = vunpack.c.l.b16 %v1460_v25 }
 0x18e   : > { %v1692_v52 = vsel %vm4488_vm15, %v1687_v42, %v1691_v44  ;;  %v1705_v31 = vrot.slane %v1703_v20, 5  ;;  %v3695_v44 = vrot.slane %v3687_v23, 9 }
 0x18f   : > { %v1754_v63 = vunpack.c.l.b16 %v1692_v52  ;;  %v1701_v30 = vrot.slane %v1700_v18, 4  ;;  %v1725_v52 = vshll.u32 %v3674_v38, 16 }
 0x190   : > { %3588 = vmatmul.msk.bf16.gmra.mxu3 %vm898_vm14, %v3584_v37  ;;  %v1474_v37 = vunpack.c.l.b16 %v1452_v27  ;;  %v3652_v27 = vld [vmem:[%s4464_s15 + $0x60] sm:$0xf] }
 0x191   : > { %v1760_v0 = vpack.c.b16 %v1754_v63, %v1753_v62  ;;  %v3653_v42 = vor.u32 %v3821_v29, %v3652_v27  ;;  %v1706_v47 = vsel %vm4488_vm15, %v1701_v30, %v1705_v31  ;;  %v1724_v62 = vrot.slane %v1722_v51, 4 }
 0x192   : > { %v1480_v48 = vpack.c.b16 %v1474_v37, %v1473_v35  ;;  %v3688_v35 = vld [vmem:[%s4464_s15 + $0x68] sm:$0xe]  ;;  %v1481_v37 = vpack.c.b16 %v1476_v26, %v1475_v28  ;;  %v1755_v59 = vunpack.c.l.b16 %v1706_v47  ;;  %v1727_v63 = vrot.slane %v1725_v52, 5  ;;  %v3690_v28 = vld [vmem:[%s4464_s15 + $0x78] sm:$0xe] }
 0x193   : > { %v1865_v31 = vrot.slane %v3675_v4, 5 }
 0x194   : > { %v1728_v10 = vor.u32 %v1727_v63, %v1724_v62 }
 0x195   : > { %3609 = vmatmul.msk.bf16.gmra.mxu0 %vm898_vm14, %v1360_v43  ;;  %v3820_v43 = vld [vmem:[%s4464_s15 + $0x24] sm:$0xf0] }
 0x196   : > { %3627 = vmatmul.msk.bf16.vlgmr.msra.gmra.mxu1 %vm898_vm14, %v1479_v57  ;;  %v1708_v57 = vshrl.u32 %v3672_v36, 16  ;;  %v3649_v40 = vor.u32 %v3820_v43, %v3648_v34  ;;  %v1861_v34 = vrot.slane %v3673_v15, 5  ;;  %v3616_v43 = vld [vmem:[%s4464_s15 + $0x68] sm:$0xe] }
 0x197   : > { %v3624_v53 = vrot.slane %v3616_v43, 9 }
 0x198   : > { %v1710_v11 = vrot.slane %v1708_v57, 4  ;;  %v1467_v57 = vrot.slane %v4663_v54, 5 }
 0x199   : > { %3658 = vmatmul.msk.bf16.vlgmr.msra.gmra.mxu2 %vm898_vm14, %v3645_v3  ;;  %v1853_v3 = vrot.slane %v3669_v5, 5  ;;  %v1875_v5 = vunpack.c.l.b16 %v1850_v24  ;;  %v1464_v41 = vsel %vm4547_vm2, %v3624_v53, %v1463_v55 }
 0x19a   : > { %v1714_v21 = vor.u32 %v1713_v13, %v1710_v11  ;;  %v1468_v54 = vsel %vm4547_vm2, %v3625_v56, %v1467_v57  ;;  %v1731_v11 = vshll.u32 %v3675_v4, 16  ;;  %v1477_v15 = vunpack.c.l.b16 %v1464_v41 }
 0x19b   : > { %v1854_v16 = vsel %vm4547_vm2, %v3694_v45, %v1853_v3  ;;  %v1738_v45 = vrot.slane %v1736_v58, 4  ;;  %v1741_v3 = vrot.slane %v1739_v2, 5  ;;  %v1478_v24 = vunpack.c.l.b16 %v1468_v54 }
 0x19c   : > { %v1876_v12 = vunpack.c.l.b16 %v1854_v16  ;;  %v1715_v32 = vrot.slane %v1714_v21, 4  ;;  %v1733_v1 = vrot.slane %v1731_v11, 5  ;;  %v3656_v21 = vld [vmem:[%s4464_s15 + $0x70] sm:$0xf] }
 0x19d   : > { %v1742_v13 = vor.u32 %v1741_v3, %v1738_v45  ;;  %v1482_v20 = vpack.c.b16 %v1478_v24, %v1477_v15 }
 0x19e   : > { %v1882_v33 = vpack.c.b16 %v1876_v12, %v1875_v5  ;;  %v3689_v12 = vld [vmem:[%s4464_s15 + $0x70] sm:$0xe] }
 0x19f   : > { %v1743_v25 = vrot.slane %v1742_v13, 4  ;;  %v3697_v30 = vrot.slane %v3689_v12, 9 }
 0x1a0   : > { %3679 = vmatmul.msk.bf16.vlgmr.msra.gmra.mxu3 %vm898_vm14, %v1759_v19  ;;  %v1719_v19 = vrot.slane %v1717_v22, 5  ;;  %v3822_v22 = vld [vmem:[%s4464_s15 + $0x74] sm:$0xf0]  ;;  %s4849_s15 = scalar_lea.vmem [#allocation3], %s3808_s14 }
 0x1a1   : > { %v3657_v26 = vor.u32 %v3822_v22, %v3656_v21 }
 0x1a2   : > { %v1720_v36 = vsel %vm4488_vm15, %v1715_v32, %v1719_v19  ;;  %v3698_v32 = vrot.slane %v3690_v28, 9  ;;  %v1869_v19 = vrot.slane %v3677_v6, 5 }
 0x1a5   : > { %3700 = vmatmul.msk.bf16.vlgmr.msra.gmra.mxu0 %vm898_vm14, %v1881_v46  ;;  %v1857_v46 = vrot.slane %v3671_v14, 5  ;;  %v1745_v14 = vshll.u32 %v3677_v6, 16 }
 0x1a6   : > { %3628 = vmatmul.msk.bf16.gmra.mxu1 %vm898_vm14, %v1480_v48  ;;  %v3696_v48 = vrot.slane %v3688_v35, 9  ;;  %v1866_v35 = vsel %vm4547_vm2, %v3697_v30, %v1865_v31 }
 0x1a7   : > { %v1858_v60 = vsel %vm4547_vm2, %v3695_v44, %v1857_v46  ;;  %v1747_v18 = vrot.slane %v1745_v14, 5 }
 0x1a8   : > { %v1862_v61 = vsel %vm4547_vm2, %v3696_v48, %v1861_v34  ;;  %v1877_v8 = vunpack.c.l.b16 %v1858_v60 }
 0x1a9   : > { %3659 = vmatmul.msk.bf16.gmra.mxu2 %vm898_vm14, %v3649_v40  ;;  %v1756_v40 = vunpack.c.l.b16 %v1720_v36  ;;  %v1878_v9 = vunpack.c.l.b16 %v1862_v61  ;;  %v1748_v29 = vsel %vm4488_vm15, %v1743_v25, %v1747_v18 }
 0x1ab   : > { %v1761_v7 = vpack.c.b16 %v1756_v40, %v1755_v59  ;;  %v1883_v16 = vpack.c.b16 %v1878_v9, %v1877_v8 }
 0x1b0   : > { %3680 = vmatmul.msk.bf16.gmra.mxu3 %vm898_vm14, %v1760_v0  ;;  %v1729_v0 = vrot.slane %v1728_v10, 4 }
 0x1b2   : > { %v1734_v27 = vsel %vm4488_vm15, %v1729_v0, %v1733_v1 }
 0x1b3   : > { %v1757_v23 = vunpack.c.l.b16 %v1734_v27 }
 0x1b5   : > { %3701 = vmatmul.msk.bf16.gmra.mxu0 %vm898_vm14, %v1882_v33  ;;  %v1758_v33 = vunpack.c.l.b16 %v1748_v29 }
 0x1b6   : > { %3629 = vmatmul.msk.bf16.gmra.mxu1 %vm898_vm14, %v1481_v37  ;;  %v1870_v37 = vsel %vm4547_vm2, %v3698_v32, %v1869_v19 }
 0x1b7   : > { %v1762_v49 = vpack.c.b16 %v1758_v33, %v1757_v23  ;;  %v1880_v44 = vunpack.c.l.b16 %v1870_v37 }
 0x1b9   : > { %3660 = vmatmul.msk.bf16.gmra.mxu2 %vm898_vm14, %v3653_v42  ;;  %v1879_v42 = vunpack.c.l.b16 %v1866_v35 }
 0x1bb   : > { %v1884_v46 = vpack.c.b16 %v1880_v44, %v1879_v42 }
 0x1c0   : > { %3681 = vmatmul.msk.bf16.gmra.mxu3 %vm898_vm14, %v1761_v7 }
 0x1c3   : > { %v4778_v5 = vpop.f32.mrf.mxu1 }
 0x1c5   : > { %3702 = vmatmul.msk.bf16.gmra.mxu0 %vm898_vm14, %v1883_v16 }
 0x1c6   : > { %3630 = vmatmul.msk.bf16.gmra.mxu1 %vm898_vm14, %v1482_v20 }
 0x1c9   : > { %3661 = vmatmul.msk.bf16.gmra.mxu2 %vm898_vm14, %v3657_v26 }
 0x1cb   : > { %v4793_v38 = vpop.f32.mrf.mxu1 }
 0x1cc   : > { %v4795_v39 = vpop.f32.mrf.mxu2 }
 0x1d0   : > { %3682 = vmatmul.msk.bf16.gmra.mxu3 %vm898_vm14, %v1762_v49 }
 0x1d2   : > { %v924_v47 = vpop.f32.mrf.mxu0 }
 0x1d3   : > { %v4798_v36 = vpop.f32.mrf.mxu3  ;;  %v988_v48 = vpop.f32.mrf.mxu1 }
 0x1d4   : > { %v4800_v34 = vpop.f32.mrf.mxu2  ;;  %v989_v13 = vadd.f32 %v988_v48, %v924_v47 }
 0x1d5   : > { %3703 = vmatmul.msk.bf16.gmra.mxu0 %vm898_vm14, %v1884_v46 }
 0x1da   : > { %v926_v17 = vpop.f32.mrf.mxu0 }
 0x1db   : > { %v4803_v43 = vpop.f32.mrf.mxu3  ;;  %v990_v50 = vpop.f32.mrf.mxu1 }
 0x1dc   : > { %v1105_v51 = vpop.f32.mrf.mxu2  ;;  %v991_v25 = vadd.f32 %v990_v50, %v926_v17 }
 0x1dd   : > { %v1125_v16 = vadd.f32 %v1105_v51, %v989_v13 }
 0x1e2   : > { %v1385_v52 = vpop.f32.mrf.mxu0 }
 0x1e3   : > { %v1191_v58 = vpop.f32.mrf.mxu3  ;;  %v993_v2 = vpop.f32.mrf.mxu1 }
 0x1e4   : > { %v1107_v53 = vpop.f32.mrf.mxu2  ;;  %v1211_v1 = vadd.f32 %v1191_v58, %v1125_v16  ;;  %v994_v30 = vadd.f32 %v993_v2, %v4778_v5 }
 0x1e5   : > { %v1126_v22 = vadd.f32 %v1107_v53, %v991_v25 }
 0x1e6   : > { %v1405_v12 = vadd.f32 %v1385_v52, %v1211_v1 }
 0x1ea   : > { %v1387_v55 = vpop.f32.mrf.mxu0 }
 0x1eb   : > { %v1193_v56 = vpop.f32.mrf.mxu3  ;;  %v995_v57 = vpop.f32.mrf.mxu1 }
 0x1ec   : > { %v1110_v59 = vpop.f32.mrf.mxu2  ;;  %v1212_v27 = vadd.f32 %v1193_v56, %v1126_v22  ;;  %v996_v48 = vadd.f32 %v995_v57, %v4793_v38  ;;  %v3706_v57 = vld [vmem:[%s4849_s15 + $0x8] sm:$0xf] }
 0x1ed   : > { %v1127_v32 = vadd.f32 %v1110_v59, %v994_v30 }
 0x1ee   : > { %v1406_v35 = vadd.f32 %v1387_v55, %v1212_v27 }
 0x1f2   : > { %v1390_v40 = vpop.f32.mrf.mxu0 }
 0x1f3   : > { %v1196_v60 = vpop.f32.mrf.mxu3  ;;  %v4805_v61 = vpop.f32.mrf.mxu1 }
 0x1f4   : > { %v1112_v62 = vpop.f32.mrf.mxu2  ;;  %v1213_v44 = vadd.f32 %v1196_v60, %v1127_v32  ;;  %v999_v27 = vadd.f32 %v4805_v61, %v4795_v39 }
 0x1f5   : > { %v1128_v50 = vadd.f32 %v1112_v62, %v996_v48 }
 0x1f6   : > { %v1407_v52 = vadd.f32 %v1390_v40, %v1213_v44  ;;  %v3708_v40 = vld [vmem:[%s4849_s15 + $0xc] sm:$0x1] }
 0x1fa   : > { %v4807_v63 = vpop.f32.mrf.mxu0 }
 0x1fb   : > { %v4809_v45 = vpop.f32.mrf.mxu3  ;;  %v4811_v3 = vpop.f32.mrf.mxu1 }
 0x1fc   : > { %v4813_v4 = vpop.f32.mrf.mxu2  ;;  %v1214_v1 = vadd.f32 %v4809_v45, %v1128_v50 }
 0x202   : > { %v4815_v6 = vpop.f32.mrf.mxu0 }
 0x203   : > { %v4817_v41 = vpop.f32.mrf.mxu3  ;;  %v4819_v54 = vpop.f32.mrf.mxu1 }
 0x204   : > { %v4821_v7 = vpop.f32.mrf.mxu2 }
 0x20a   : > { %v4823_v8 = vpop.f32.mrf.mxu0 }
 0x20b   : > { %v4825_v9 = vpop.f32.mrf.mxu3  ;;  %v4827_v10 = vpop.f32.mrf.mxu1 }
 0x20c   : > { %v4829_v11 = vpop.f32.mrf.mxu2 }
 0x212   : > { %v4831_v14 = vpop.f32.mrf.mxu0 }
 0x213   : > { %v4833_v15 = vpop.f32.mrf.mxu3  ;;  %v1507_v24 = vpop.f32.mrf.mxu1 }
 0x214   : > { %v4835_v0 = vpop.f32.mrf.mxu2  ;;  %v1527_v26 = vadd.f32 %v1507_v24, %v1405_v12 }
 0x21a   : > { %v4837_v18 = vpop.f32.mrf.mxu0 }
 0x21b   : > { %v4839_v20 = vpop.f32.mrf.mxu3  ;;  %v1509_v21 = vpop.f32.mrf.mxu1 }
 0x21c   : > { %v1593_v28 = vpop.f32.mrf.mxu2  ;;  %v1528_v42 = vadd.f32 %v1509_v21, %v1406_v35 }
 0x21d   : > { %v1613_v29 = vadd.f32 %v1593_v28, %v1527_v26 }
 0x222   : > { %v1909_v31 = vpop.f32.mrf.mxu0 }
 0x223   : > { %v1787_v19 = vpop.f32.mrf.mxu3  ;;  %v1512_v23 = vpop.f32.mrf.mxu1 }
 0x224   : > { %v1807_v33 = vadd.f32 %v1787_v19, %v1613_v29  ;;  %v1595_v37 = vpop.f32.mrf.mxu2  ;;  %v1529_v60 = vadd.f32 %v1512_v23, %v1407_v52  ;;  %v1129_v19 = vadd.f32 %v4813_v4, %v999_v27 }
 0x225   : > { %v1614_v47 = vadd.f32 %v1595_v37, %v1528_v42 }
 0x226   : > { %v1929_v49 = vadd.f32 %v1909_v31, %v1807_v33 }
 0x228   : > { %v1995_v46 = vpack.c.bf16 %v1929_v49, %v1929_v49  ;;  %v1964_v62 = vmul.f32 %v1929_v49, %v1929_v49  ;;  %v1939_v25 = vsel %vm1938_vm7, %v1929_v49, 0.0  ;;  %v1408_v49 = vadd.f32 %v4807_v63, %v1214_v1 }
 0x229   : > { %v1001_v63 = vadd.f32 %v4811_v3, %v4800_v34 }
 0x22a   : > { %v2004_v17 = vshrl.u32 %v1995_v46, 16  ;;  %v1911_v5 = vpop.f32.mrf.mxu0  ;;  %v2007_v53 = vshll.u32 %v1995_v46, 16  ;;  %v1972_v45 = vsel %vm1938_vm7, %v1964_v62, 0.0  ;;  %v3710_v46 = vld [vmem:[%s4849_s15 + $0x10] sm:$0xf] }
 0x22b   : > { %v1789_v51 = vpop.f32.mrf.mxu3  ;;  %v1514_v58 = vpop.f32.mrf.mxu1 }
 0x22c   : > { %v2006_v2 = vrot.slane %v2004_v17, 7  ;;  %v1808_v56 = vadd.f32 %v1789_v51, %v1614_v47  ;;  %v1598_v38 = vpop.f32.mrf.mxu2  ;;  %v3712_v47 = vld [vmem:[%s4849_s15 + $0x14] sm:$0x1]  ;;  %v1530_v17 = vadd.f32 %v1514_v58, %v1408_v49 }
 0x22d   : > { %v1615_v21 = vadd.f32 %v1598_v38, %v1529_v60  ;;  %v1130_v60 = vadd.f32 %v4821_v7, %v1001_v63 }
 0x22e   : > { %v2009_v13 = vor.u32 %v2007_v53, %v2006_v2  ;;  %v2010_v24 = vrot.slane %v2006_v2, 4  ;;  %v1930_v16 = vadd.f32 %v1911_v5, %v1808_v56  ;;  %v1215_v5 = vadd.f32 %v4817_v41, %v1129_v19 }
 0x22f   : > { %v1216_v7 = vadd.f32 %v4825_v9, %v1130_v60 }
 0x230   : > { %v2089_v22 = vsel %vm4843_vm8, %v2009_v13, %v3706_v57  ;;  %v2095_v12 = vsel %vm4853_vm9, %v2010_v24, %v3708_v40  ;;  %v1940_v28 = vsel %vm1938_vm7, %v1930_v16, 0.0  ;;  %v1965_v26 = vmul.f32 %v1930_v16, %v1930_v16 }
 0x231   : > { %3707 = vst [vmem:[%s4849_s15 + $0x8] sm:$0xf] %v2089_v22  ;;  %v1941_v29 = vadd.f32 %v1940_v28, %v1939_v25  ;;  %v1996_v30 = vpack.c.bf16 %v1930_v16, %v1930_v16  ;;  %v1409_v34 = vadd.f32 %v4815_v6, %v1215_v5  ;;  %v3714_v25 = vld [vmem:[%s4849_s15 + $0x18] sm:$0xf] }
 0x232   : > { %3709 = vst [vmem:[%s4849_s15 + $0xc] sm:$0x1] %v2095_v12  ;;  %v1973_v31 = vsel %vm1938_vm7, %v1965_v26, 0.0  ;;  %v1914_v32 = vpop.f32.mrf.mxu0 }
 0x233   : > { %v1974_v23 = vadd.f32 %v1973_v31, %v1972_v45  ;;  %v2012_v33 = vshrl.u32 %v1996_v30, 16  ;;  %v1792_v35 = vpop.f32.mrf.mxu3  ;;  %v1517_v61 = vpop.f32.mrf.mxu1  ;;  %v2015_v44 = vshll.u32 %v1996_v30, 16 }
 0x234   : > { %v1809_v37 = vadd.f32 %v1792_v35, %v1615_v21  ;;  %v1600_v39 = vpop.f32.mrf.mxu2  ;;  %v3716_v21 = vld [vmem:[%s4849_s15 + $0x1c] sm:$0x1]  ;;  %v1531_v22 = vadd.f32 %v1517_v61, %v1409_v34 }
 0x235   : > { %v2014_v42 = vrot.slane %v2012_v33, 7  ;;  %v1616_v53 = vadd.f32 %v1600_v39, %v1530_v17 }
 0x236   : > { %v1931_v48 = vadd.f32 %v1914_v32, %v1809_v37  ;;  %v1004_v32 = vadd.f32 %v4819_v54, %v4798_v36  ;;  %v3718_v54 = vld [vmem:[%s4849_s15 + $0x20] sm:$0xf] }
 0x237   : > { %v2017_v50 = vor.u32 %v2015_v44, %v2014_v42  ;;  %v2018_v4 = vrot.slane %v2014_v42, 4  ;;  %v1410_v42 = vadd.f32 %v4823_v8, %v1216_v7  ;;  %v1006_v8 = vadd.f32 %v4827_v10, %v4803_v43 }
 0x238   : > { %v1942_v51 = vsel %vm1938_vm7, %v1931_v48, 0.0  ;;  %v1966_v52 = vmul.f32 %v1931_v48, %v1931_v48  ;;  %v1997_v2 = vpack.c.bf16 %v1931_v48, %v1931_v48  ;;  %v1131_v35 = vadd.f32 %v4829_v11, %v1004_v32 }
 0x239   : > { %v2098_v56 = vsel %vm4843_vm8, %v2017_v50, %v3710_v46  ;;  %v2101_v58 = vsel %vm4853_vm9, %v2018_v4, %v3712_v47  ;;  %v1943_v41 = vadd.f32 %v1942_v51, %v1941_v29  ;;  %v3720_v47 = vld [vmem:[%s4849_s15 + $0x24] sm:$0x1] }
 0x23a   : > { %3711 = vst [vmem:[%s4849_s15 + $0x10] sm:$0xf] %v2098_v56  ;;  %v1975_v38 = vsel %vm1938_vm7, %v1966_v52, 0.0  ;;  %v2020_v57 = vshrl.u32 %v1997_v2, 16  ;;  %v1916_v40 = vpop.f32.mrf.mxu0  ;;  %v2023_v24 = vshll.u32 %v1997_v2, 16  ;;  %v1217_v5 = vadd.f32 %v4833_v15, %v1131_v35 }
 0x23b   : > { %3713 = vst [vmem:[%s4849_s15 + $0x14] sm:$0x1] %v2101_v58  ;;  %v1976_v62 = vadd.f32 %v1975_v38, %v1974_v23  ;;  %v1794_v13 = vpop.f32.mrf.mxu3  ;;  %v1519_v27 = vpop.f32.mrf.mxu1  ;;  %v3726_v35 = vld [vmem:[%s4849_s15 + $0x60] sm:$0xf] }
 0x23c   : > { %v2022_v3 = vrot.slane %v2020_v57, 7  ;;  %v1810_v16 = vadd.f32 %v1794_v13, %v1616_v53  ;;  %v1603_v1 = vpop.f32.mrf.mxu2  ;;  %v1532_v17 = vadd.f32 %v1519_v27, %v1410_v42  ;;  %v1132_v57 = vadd.f32 %v4835_v0, %v1006_v8 }
 0x23d   : > { %v1617_v29 = vadd.f32 %v1603_v1, %v1531_v22  ;;  %v1411_v43 = vadd.f32 %v4831_v14, %v1217_v5 }
 0x23e   : > { %v2025_v12 = vor.u32 %v2023_v24, %v2022_v3  ;;  %v2026_v28 = vrot.slane %v2022_v3, 4  ;;  %v1932_v26 = vadd.f32 %v1916_v40, %v1810_v16  ;;  %v3722_v3 = vld [vmem:[%s4849_s15 + $0x58] sm:$0xf]  ;;  %v3724_v24 = vld [vmem:[%s4849_s15 + $0x5c] sm:$0x1]  ;;  %v1218_v22 = vadd.f32 %v4839_v20, %v1132_v57 }
 0x240   : > { %v2104_v30 = vsel %vm4843_vm8, %v2025_v12, %v3714_v25  ;;  %v2107_v6 = vsel %vm4853_vm9, %v2026_v28, %v3716_v21  ;;  %v1944_v45 = vsel %vm1938_vm7, %v1932_v26, 0.0  ;;  %v1967_v31 = vmul.f32 %v1932_v26, %v1932_v26 }
 0x241   : > { %3715 = vst [vmem:[%s4849_s15 + $0x18] sm:$0xf] %v2104_v30  ;;  %v1945_v19 = vadd.f32 %v1944_v45, %v1943_v41  ;;  %v1998_v23 = vpack.c.bf16 %v1932_v26, %v1932_v26 }
 0x242   : > { %3717 = vst [vmem:[%s4849_s15 + $0x1c] sm:$0x1] %v2107_v6  ;;  %v1977_v9 = vsel %vm1938_vm7, %v1967_v31, 0.0  ;;  %v1919_v33 = vpop.f32.mrf.mxu0 }
 0x243   : > { %v1978_v37 = vadd.f32 %v1977_v9, %v1976_v62  ;;  %v2028_v49 = vshrl.u32 %v1998_v23, 16  ;;  %v1797_v39 = vpop.f32.mrf.mxu3  ;;  %v2031_v36 = vshll.u32 %v1998_v23, 16  ;;  %v1522_v53 = vpop.f32.mrf.mxu1 }
 0x244   : > { %v1811_v61 = vadd.f32 %v1797_v39, %v1617_v29  ;;  %v1605_v44 = vpop.f32.mrf.mxu2  ;;  %v1533_v16 = vadd.f32 %v1522_v53, %v1411_v43  ;;  %v3732_v53 = vld [vmem:[%s4849_s15 + $0x6c] sm:$0x1] }
 0x245   : > { %v2030_v46 = vrot.slane %v2028_v49, 7  ;;  %v1618_v2 = vadd.f32 %v1605_v44, %v1532_v17 }
 0x246   : > { %v1933_v48 = vadd.f32 %v1919_v33, %v1811_v61 }
 0x247   : > { %v2033_v50 = vor.u32 %v2031_v36, %v2030_v46  ;;  %v2034_v4 = vrot.slane %v2030_v46, 4 }
 0x248   : > { %v1946_v11 = vsel %vm1938_vm7, %v1933_v48, 0.0  ;;  %v1968_v51 = vmul.f32 %v1933_v48, %v1933_v48  ;;  %v1999_v52 = vpack.c.bf16 %v1933_v48, %v1933_v48 }
 0x249   : > { %v2110_v63 = vsel %vm4843_vm8, %v2033_v50, %v3718_v54  ;;  %v2113_v56 = vsel %vm4853_vm9, %v2034_v4, %v3720_v47  ;;  %v1947_v15 = vadd.f32 %v1946_v11, %v1945_v19  ;;  %v1412_v19 = vadd.f32 %v4837_v18, %v1218_v22 }
 0x24a   : > { %3719 = vst [vmem:[%s4849_s15 + $0x20] sm:$0xf] %v2110_v63  ;;  %v1979_v58 = vsel %vm1938_vm7, %v1968_v51, 0.0  ;;  %v2036_v41 = vshrl.u32 %v1999_v52, 16  ;;  %v1921_v38 = vpop.f32.mrf.mxu0  ;;  %v2039_v62 = vshll.u32 %v1999_v52, 16 }
 0x24b   : > { %3721 = vst [vmem:[%s4849_s15 + $0x24] sm:$0x1] %v2113_v56  ;;  %v1980_v40 = vadd.f32 %v1979_v58, %v1978_v37  ;;  %v1799_v60 = vpop.f32.mrf.mxu3  ;;  %v1524_v30 = vpop.f32.mrf.mxu1  ;;  %v3728_v37 = vld [vmem:[%s4849_s15 + $0x64] sm:$0x1] }
 0x24c   : > { %v2038_v10 = vrot.slane %v2036_v41, 7  ;;  %v1812_v13 = vadd.f32 %v1799_v60, %v1618_v2  ;;  %v1608_v34 = vpop.f32.mrf.mxu2  ;;  %v1534_v39 = vadd.f32 %v1524_v30, %v1412_v19  ;;  %v3730_v2 = vld [vmem:[%s4849_s15 + $0x68] sm:$0xf]  ;;  %v1937_v30 = vld [vmem:[#allocation5] sm:$0x1] }
 0x24d   : > { %v1619_v0 = vadd.f32 %v1608_v34, %v1533_v16 }
 0x24e   : > { %v2041_v1 = vor.u32 %v2039_v62, %v2038_v10  ;;  %v2042_v25 = vrot.slane %v2038_v10, 4  ;;  %v1934_v21 = vadd.f32 %v1921_v38, %v1812_v13 }
 0x250   : > { %v2116_v12 = vsel %vm4843_vm8, %v2041_v1, %v3722_v3  ;;  %v2119_v14 = vsel %vm4853_vm9, %v2042_v25, %v3724_v24  ;;  %v1948_v28 = vsel %vm1938_vm7, %v1934_v21, 0.0  ;;  %v1969_v26 = vmul.f32 %v1934_v21, %v1934_v21  ;;  %v3734_v1 = vld [vmem:[%s4849_s15 + $0x70] sm:$0xf]  ;;  %v3736_v25 = vld [vmem:[%s4849_s15 + $0x74] sm:$0x1] }
 0x251   : > { %3723 = vst [vmem:[%s4849_s15 + $0x58] sm:$0xf] %v2116_v12  ;;  %v1949_v27 = vadd.f32 %v1948_v28, %v1947_v15  ;;  %v2000_v7 = vpack.c.bf16 %v1934_v21, %v1934_v21 }
 0x252   : > { %3725 = vst [vmem:[%s4849_s15 + $0x5c] sm:$0x1] %v2119_v14  ;;  %v1981_v29 = vsel %vm1938_vm7, %v1969_v26, 0.0  ;;  %v1924_v45 = vpop.f32.mrf.mxu0 }
 0x253   : > { %v1982_v20 = vadd.f32 %v1981_v29, %v1980_v40  ;;  %v2044_v6 = vshrl.u32 %v2000_v7, 16  ;;  %v1802_v31 = vpop.f32.mrf.mxu3  ;;  %v2047_v9 = vshll.u32 %v2000_v7, 16 }
 0x254   : > { %v1813_v32 = vadd.f32 %v1802_v31, %v1619_v0  ;;  %v1610_v33 = vpop.f32.mrf.mxu2 }
 0x255   : > { %v2046_v23 = vrot.slane %v2044_v6, 7  ;;  %v1620_v54 = vadd.f32 %v1610_v33, %v1534_v39 }
 0x256   : > { %v1935_v49 = vadd.f32 %v1924_v45, %v1813_v32  ;;  %v1963_v45 = vld [vmem:[#allocation5 + $0x1] sm:$0x1] }
 0x257   : > { %v2049_v61 = vor.u32 %v2047_v9, %v2046_v23  ;;  %v2050_v42 = vrot.slane %v2046_v23, 4 }
 0x258   : > { %v1950_v44 = vsel %vm1938_vm7, %v1935_v49, 0.0  ;;  %v1970_v46 = vmul.f32 %v1935_v49, %v1935_v49  ;;  %v2001_v36 = vpack.c.bf16 %v1935_v49, %v1935_v49 }
 0x259   : > { %v2122_v18 = vsel %vm4843_vm8, %v2049_v61, %v3726_v35  ;;  %v2125_v47 = vsel %vm4853_vm9, %v2050_v42, %v3728_v37  ;;  %v1951_v48 = vadd.f32 %v1950_v44, %v1949_v27 }
 0x25a   : > { %3727 = vst [vmem:[%s4849_s15 + $0x60] sm:$0xf] %v2122_v18  ;;  %v1983_v17 = vsel %vm1938_vm7, %v1970_v46, 0.0  ;;  %v2052_v5 = vshrl.u32 %v2001_v36, 16  ;;  %v2055_v51 = vshll.u32 %v2001_v36, 16  ;;  %v1926_v8 = vpop.f32.mrf.mxu0 }
 0x25b   : > { %3729 = vst [vmem:[%s4849_s15 + $0x64] sm:$0x1] %v2125_v47  ;;  %v1984_v50 = vadd.f32 %v1983_v17, %v1982_v20  ;;  %v1804_v4 = vpop.f32.mrf.mxu3 }
 0x25c   : > { %v2054_v11 = vrot.slane %v2052_v5, 7  ;;  %v1814_v52 = vadd.f32 %v1804_v4, %v1620_v54 }
 0x25e   : > { %v2057_v63 = vor.u32 %v2055_v51, %v2054_v11  ;;  %v2058_v56 = vrot.slane %v2054_v11, 4  ;;  %v1936_v15 = vadd.f32 %v1926_v8, %v1814_v52 }
 0x260   : > { %v2128_v58 = vsel %vm4843_vm8, %v2057_v63, %v3730_v2  ;;  %v2131_v41 = vsel %vm4853_vm9, %v2058_v56, %v3732_v53  ;;  %v1952_v38 = vsel %vm1938_vm7, %v1936_v15, 0.0  ;;  %v1971_v57 = vmul.f32 %v1936_v15, %v1936_v15 }
 0x261   : > { %3731 = vst [vmem:[%s4849_s15 + $0x68] sm:$0xf] %v2128_v58  ;;  %v1953_v40 = vadd.f32 %v1952_v38, %v1951_v48  ;;  %v2002_v60 = vpack.c.bf16 %v1936_v15, %v1936_v15 }
 0x262   : > { %3733 = vst [vmem:[%s4849_s15 + $0x6c] sm:$0x1] %v2131_v41  ;;  %v1985_v43 = vsel %vm1938_vm7, %v1971_v57, 0.0 }
 0x263   : > { %v1954_v10 = vrot.slane %v1953_v40, 4  ;;  %v1986_v62 = vadd.f32 %v1985_v43, %v1984_v50  ;;  %v2060_v13 = vshrl.u32 %v2002_v60, 16  ;;  %v2063_v16 = vshll.u32 %v2002_v60, 16 }
 0x265   : > { %v1955_v34 = vadd.f32 %v1954_v10, %v1953_v40  ;;  %v1987_v3 = vrot.slane %v1986_v62, 4  ;;  %v2062_v24 = vrot.slane %v2060_v13, 7 }
 0x267   : > { %v1956_v21 = vrot.slane %v1955_v34, 2  ;;  %v1988_v22 = vadd.f32 %v1987_v3, %v1986_v62  ;;  %v2065_v0 = vor.u32 %v2063_v16, %v2062_v24  ;;  %v2066_v12 = vrot.slane %v2062_v24, 4 }
 0x269   : > { %v1957_v14 = vadd.f32 %v1956_v21, %v1955_v34  ;;  %v1989_v28 = vrot.slane %v1988_v22, 2  ;;  %v2134_v26 = vsel %vm4843_vm8, %v2065_v0, %v3734_v1  ;;  %v2137_v27 = vsel %vm4853_vm9, %v2066_v12, %v3736_v25 }
 0x26a   : > { %3735 = vst [vmem:[%s4849_s15 + $0x70] sm:$0xf] %v2134_v26 }
 0x26b   : > { %v1958_v7 = vrot.slane %v1957_v14, 1  ;;  %v1990_v29 = vadd.f32 %v1989_v28, %v1988_v22  ;;  %3737 = vst [vmem:[%s4849_s15 + $0x74] sm:$0x1] %v2137_v27 }
 0x26d   : > { %v1959_v20 = vadd.f32 %v1958_v7, %v1957_v14  ;;  %v1991_v6 = vrot.slane %v1990_v29, 1 }
 0x26f   : > { %v1960_v31 = vadd.f32 %v1959_v20, %v1937_v30  ;;  %v1992_v32 = vadd.f32 %v1991_v6, %v1990_v29 }
 0x271   : > { %1962 = vst.msk [vmem:[#allocation5] sm:$0x1] %vm1961_vm5, %v1960_v31  ;;  %v1993_v19 = vadd.f32 %v1992_v32, %v1963_v45 }
 0x273   : > { %1994 = vst.msk [vmem:[#allocation5 + $0x1] sm:$0x1] %vm1961_vm5, %v1993_v19 }
 0x274 PF: > { %p3738_p9 = scmp.ne.s32.totalorder %s4031_s29, 2 }
 0x275   : > { %s3825_s18 = sshll.u32 (!%p3738_p9), %s4027_s28, 5 }
 0x276   : > { %2142 = sbr.rel (%p3738_p9) target bundleno = 1002 (0x3ea), region = 105  ;;  %s4976_s19 = scalar_lea.vmem (!%p3738_p9), [#allocation3], %s3825_s18 }
 0x27b   : > { %v3741_v55 = vld [vmem:[%s5762_s4 + $0x4] sm:$0xf]  ;;  %vm2541_vm10 = vcmask 1043456   ;;  %v2143_v59 = vld [vmem:[#allocation5] sm:$0x1]  ;;  %v4972_v36 = vstv %s3481_s17  ;;  %v2301_v54 = vlaneseq }
 0x27c   : > { %v2543_v23 = vsel %vm2541_vm10, %v3741_v55, 0  ;;  %v4965_v9 = vmul.f32 0.0078125, %v2143_v59  ;;  %v2145_v33 = vld [vmem:[#allocation5 + $0x1] sm:$0x1]  ;;  %v2173_v18 = vld [vmem:[%s4976_s19 + $0x10] sm:$0xf] }
 0x27d   : > { %3871 = vmatpush.bf16.msra.mxu1 %v2543_v23  ;;  %3872 = vmatpush.bf16.msra.mxu2 %v2543_v23  ;;  %v2146_v35 = vmul.f32 0.0078125, %v2145_v33  ;;  %v2174_v48 = vld [vmem:[%s4976_s19 + $0x14] sm:$0x1]  ;;  %v2175_v17 = vld [vmem:[%s4976_s19 + $0x18] sm:$0xf]  ;;  %v2297_v4 = vadd.s32 2, %v4972_v36  ;;  %v2197_v56 = vunpack.c.l.bf16 %v2173_v18 }
 0x27e   : > { %3873 = vmatpush.bf16.msra.mxu3 %v2543_v23  ;;  %2552 = vmatpush.bf16.msra.mxu0 %v2543_v23  ;;  %v2147_v37 = vmul.f32 %v4965_v9, %v4965_v9  ;;  %v2176_v5 = vld [vmem:[%s4976_s19 + $0x1c] sm:$0x1]  ;;  %v2185_v50 = vld [vmem:[%s4976_s19 + $0x60] sm:$0xf]  ;;  %v2298_v11 = vadd.s32 3, %v4972_v36  ;;  %v4986_v2 = vshrl.u32 %v2301_v54, 7  ;;  %v2198_v15 = vunpack.c.l.bf16 %v2174_v48 }
 0x27f   : > { %v2187_v52 = vld [vmem:[%s4976_s19 + $0x68] sm:$0xf]  ;;  %v2169_v53 = vld [vmem:[%s4976_s19] sm:$0xf]  ;;  %v2199_v58 = vunpack.c.l.bf16 %v2175_v17  ;;  %v2200_v57 = vunpack.c.l.bf16 %v2176_v5  ;;  %v2209_v40 = vunpack.c.l.bf16 %v2185_v50  ;;  %v2181_v43 = vld [vmem:[%s4976_s19 + $0x50] sm:$0xf] }
 0x280   : > { %v2148_v49 = vsub.f32 %v2146_v35, %v2147_v37  ;;  %v2150_v8 = vld [vmem:[%s5760_s2] sm:$0x1]  ;;  %v2171_v41 = vld [vmem:[%s4976_s19 + $0x8] sm:$0xf]  ;;  %v4998_v60 = vadd.s32 8, %v4986_v2  ;;  %v2211_v62 = vunpack.c.l.bf16 %v2187_v52  ;;  %vm2306_vm14 = vcmp.ge.s32.totalorder %v2297_v4, 1 }
 0x281   : > { %v2182_v10 = vld [vmem:[%s4976_s19 + $0x54] sm:$0x1]  ;;  %vm2307_vm15 = vcmp.ge.s32.totalorder %v2298_v11, 1  ;;  %v2183_v13 = vld [vmem:[%s4976_s19 + $0x58] sm:$0xf]  ;;  %v2193_v3 = vunpack.c.l.bf16 %v2169_v53  ;;  %vm2312_vm0 = vcmp.le.s32.totalorder %v2297_v4, 8  ;;  %v2195_v21 = vunpack.c.l.bf16 %v2171_v41 }
 0x282   : > { %v2149_v39 = vmax.f32 %v2148_v49, 0.0  ;;  %v2184_v34 = vld [vmem:[%s4976_s19 + $0x5c] sm:$0x1]  ;;  %vm2313_vm1 = vcmp.le.s32.totalorder %v2298_v11, 8  ;;  %v5007_v16 = vadd.s32 1, %v4972_v36  ;;  %v2205_v22 = vunpack.c.l.bf16 %v2181_v43  ;;  %vm5029_vm6 = vmand %vm2306_vm14, %vm2312_vm0 }
 0x283   : > { %v2186_v1 = vld [vmem:[%s4976_s19 + $0x64] sm:$0x1]  ;;  %v2206_v0 = vunpack.c.l.bf16 %v2182_v10  ;;  %v2188_v12 = vld [vmem:[%s4976_s19 + $0x6c] sm:$0x1]  ;;  %v2163_v26 = vld [vmem:[%s5761_s3] sm:$0x1]  ;;  %v2207_v27 = vunpack.c.l.bf16 %v2183_v13  ;;  %v2208_v7 = vunpack.c.l.bf16 %v2184_v34 }
 0x284   : > { %v2151_v61 = vadd.f32 1e-05, %v2149_v39  ;;  %v5012_v14 = vld [vmem:[%s4976_s19 + $0x4] sm:$0x1]  ;;  %v5015_v28 = vld [vmem:[%s4976_s19 + $0xc] sm:$0x1]  ;;  %v2210_v6 = vunpack.c.l.bf16 %v2186_v1  ;;  %v2212_v45 = vunpack.c.l.bf16 %v2188_v12  ;;  %vm5042_vm9 = vmand %vm2307_vm15, %vm2313_vm1 }
 0x285   : > { %vm2322_vm2 = vcmp.ge.s32.totalorder %v4986_v2, 1  ;;  %vm2337_vm3 = vcmp.le.s32.totalorder %v4998_v60, 8  ;;  %vm2304_vm4 = vcmp.ge.s32.totalorder %v4972_v36, 1  ;;  %vm2310_vm5 = vcmp.le.s32.totalorder %v4972_v36, 8 }
 0x286   : > { %3969 = vrsqrt.f32 %v2151_v61  ;;  %vm2158_vm11 = vweird.f32 %v2151_v61  ;;  %vm2305_vm7 = vcmp.ge.s32.totalorder %v5007_v16, 1  ;;  %vm2311_vm8 = vcmp.le.s32.totalorder %v5007_v16, 8  ;;  %vm5097_vm14 = vmand %vm5042_vm9, %vm2337_vm3 }
 0x287   : > { %v2194_v31 = vunpack.c.l.bf16 %v5012_v14  ;;  %v2196_v32 = vunpack.c.l.bf16 %v5015_v28  ;;  %vm2399_vm15 = vsmask.f32 3328  ;;  %vm2400_vm0 = vsmask.f32 7440  ;;  %vm5125_vm1 = vmand %vm2304_vm4, %vm2310_vm5  ;;  %v3763_v28 = vld [vmem:[%s5762_s4 + $0xc] sm:$0xf] }
 0x288   : > { %vm5157_vm4 = vmand %vm5125_vm1, %vm2322_vm2 }
 0x28c   : > { %v3970_v42 = vpop.eup %3969 }
 0x28d   : > { %v2153_v44 = vmul.f32 %v3970_v42, %v2151_v61  ;;  %vm2159_vm12 = vweird.f32 %v3970_v42 }
 0x28e   : > { %vm4992_vm13 = vmor %vm2158_vm11, %vm2159_vm12 }
 0x28f   : > { %v2154_v46 = vmul.f32 %v3970_v42, %v2153_v44  ;;  %vm5056_vm11 = vmand %vm5029_vm6, %vm2322_vm2 }
 0x290   : > { %vm5067_vm12 = vmand %vm5042_vm9, %vm2322_vm2 }
 0x291   : > { %v2155_v47 = vmul.f32 0.5, %v2154_v46 }
 0x293   : > { %v2156_v51 = vsub.f32 1.5, %v2155_v47 }
 0x295   : > { %v2157_v38 = vmul.f32 %v3970_v42, %v2156_v51 }
 0x297   : > { %v2161_v24 = vsel %vm4992_vm13, %v3970_v42, %v2157_v38  ;;  %vm5087_vm13 = vmand %vm5029_vm6, %vm2337_vm3 }
 0x298   : > { %v2162_v25 = vmul.f32 %v2161_v24, %v2150_v8  ;;  %vm5141_vm6 = vmand %vm2305_vm7, %vm2311_vm8  ;;  %vm2528_vm7 = vcmask 64512  }
 0x299   : > { %vm5165_vm5 = vmand %vm5141_vm6, %vm2322_vm2 }
 0x29a   : > { %v2164_v29 = vmul.f32 %v2162_v25, %v4965_v9  ;;  %v5023_v30 = vperm.slane %v2162_v25, 0  ;;  %vm5173_vm8 = vmand %vm5125_vm1, %vm2337_vm3 }
 0x29b   : > { %vm5181_vm9 = vmand %vm5141_vm6, %vm2337_vm3 }
 0x29c   : > { %v2165_v19 = vsub.f32 %v2163_v26, %v2164_v29  ;;  %v2224_v55 = vmul.f32 %v5023_v30, %v2197_v56  ;;  %v2225_v59 = vmul.f32 %v5023_v30, %v2198_v15  ;;  %v2226_v23 = vmul.f32 %v5023_v30, %v2199_v58 }
 0x29d   : > { %v2227_v33 = vmul.f32 %v5023_v30, %v2200_v57  ;;  %v2236_v35 = vmul.f32 %v5023_v30, %v2209_v40  ;;  %v2238_v37 = vmul.f32 %v5023_v30, %v2211_v62  ;;  %v2220_v49 = vmul.f32 %v5023_v30, %v2193_v3 }
 0x29e   : > { %v5050_v39 = vperm.slane %v2165_v19, 0  ;;  %v2222_v42 = vmul.f32 %v5023_v30, %v2195_v21  ;;  %v2232_v44 = vmul.f32 %v5023_v30, %v2205_v22  ;;  %v2233_v46 = vmul.f32 %v5023_v30, %v2206_v0 }
 0x29f   : > { %v2234_v18 = vmul.f32 %v5023_v30, %v2207_v27  ;;  %v2235_v47 = vmul.f32 %v5023_v30, %v2208_v7  ;;  %v5074_v48 = vmul.f32 %v5023_v30, %v2210_v6  ;;  %v5077_v17 = vmul.f32 %v5023_v30, %v2212_v45 }
 0x2a0   : > { %v2251_v5 = vadd.f32 %v5050_v39, %v2224_v55  ;;  %v2252_v50 = vadd.f32 %v5050_v39, %v2225_v59  ;;  %v2253_v4 = vadd.f32 %v5050_v39, %v2226_v23  ;;  %v2254_v11 = vadd.f32 %v5050_v39, %v2227_v33 }
 0x2a1   : > { %v2263_v52 = vadd.f32 %v5050_v39, %v2236_v35  ;;  %v2265_v53 = vadd.f32 %v5050_v39, %v2238_v37  ;;  %v2247_v63 = vadd.f32 %v5050_v39, %v2220_v49  ;;  %v2249_v56 = vadd.f32 %v5050_v39, %v2222_v42 }
 0x2a2   : > { %v2275_v15 = vmax.f32 %v2251_v5, 0.0  ;;  %v2276_v58 = vmax.f32 %v2252_v50, 0.0  ;;  %v2277_v41 = vmax.f32 %v2253_v4, 0.0  ;;  %v2278_v38 = vmax.f32 %v2254_v11, 0.0  ;;  %v3780_v4 = vld [vmem:[%s5762_s4 + $0x18] sm:$0xf] }
 0x2a3   : > { %v2287_v57 = vmax.f32 %v2263_v52, 0.0  ;;  %v2289_v40 = vmax.f32 %v2265_v53, 0.0  ;;  %v2259_v43 = vadd.f32 %v5050_v39, %v2232_v44  ;;  %v2260_v10 = vadd.f32 %v5050_v39, %v2233_v46 }
 0x2a4   : > { %v2354_v62 = vsel %vm5056_vm11, %v2275_v15, 0.0  ;;  %v2355_v13 = vsel %vm5087_vm13, %v2276_v58, 0.0  ;;  %v2356_v34 = vsel %vm5067_vm12, %v2277_v41, 0.0  ;;  %v2357_v3 = vsel %vm5097_vm14, %v2278_v38, 0.0 }
 0x2a5   : > { %v2366_v24 = vsel %vm5056_vm11, %v2287_v57, 0.0  ;;  %v2368_v1 = vsel %vm5067_vm12, %v2289_v40, 0.0  ;;  %v5117_v25 = vpack.c.bf16 %v2354_v62, %v2354_v62  ;;  %v5119_v21 = vpack.c.bf16 %v2355_v13, %v2355_v13  ;;  %vm5187_vm11 = vmor %vm2399_vm15, %vm2400_vm0 }
 0x2a6   : > { %v5129_v0 = vpack.c.bf16 %v2356_v34, %v2356_v34  ;;  %v5131_v12 = vpack.c.bf16 %v2357_v3, %v2357_v3  ;;  %v5133_v26 = vpack.c.bf16 %v2366_v24, %v2366_v24  ;;  %v5135_v27 = vpack.c.bf16 %v2368_v1, %v2368_v1 }
 0x2a7   : > { %v2431_v29 = vshrl.u32 %v5117_v25, 16  ;;  %v2434_v20 = vshll.u32 %v5117_v25, 16  ;;  %v2440_v6 = vshll.u32 %v5119_v21, 16  ;;  %v2261_v45 = vadd.f32 %v5050_v39, %v2234_v18 }
 0x2a8   : > { %v2445_v19 = vshrl.u32 %v5129_v0, 16  ;;  %v2448_v55 = vshll.u32 %v5129_v0, 16  ;;  %v2454_v59 = vshll.u32 %v5131_v12, 16  ;;  %v2262_v16 = vadd.f32 %v5050_v39, %v2235_v47 }
 0x2a9   : > { %v2433_v9 = vrot.slane %v2431_v29, 4  ;;  %v2436_v33 = vrot.slane %v2434_v20, 5  ;;  %v2442_v35 = vrot.slane %v2440_v6, 5  ;;  %v2271_v37 = vmax.f32 %v2247_v63, 0.0 }
 0x2aa   : > { %v2447_v61 = vrot.slane %v2445_v19, 4  ;;  %v2450_v42 = vrot.slane %v2448_v55, 5  ;;  %v2456_v44 = vrot.slane %v2454_v59, 5  ;;  %v2273_v46 = vmax.f32 %v2249_v56, 0.0 }
 0x2ab   : > { %v2437_v18 = vor.u32 %v2436_v33, %v2433_v9  ;;  %v2283_v47 = vmax.f32 %v2259_v43, 0.0  ;;  %v2284_v5 = vmax.f32 %v2260_v10, 0.0  ;;  %v2285_v50 = vmax.f32 %v2261_v45, 0.0 }
 0x2ac   : > { %v2451_v52 = vor.u32 %v2450_v42, %v2447_v61  ;;  %v2286_v53 = vmax.f32 %v2262_v16, 0.0  ;;  %v2350_v63 = vsel %vm5157_vm4, %v2271_v37, 0.0  ;;  %v2352_v56 = vsel %vm5165_vm5, %v2273_v46, 0.0 }
 0x2ad   : > { %v2438_v15 = vrot.slane %v2437_v18, 4  ;;  %v2362_v58 = vsel %vm5157_vm4, %v2283_v47, 0.0  ;;  %v2363_v41 = vsel %vm5173_vm8, %v2284_v5, 0.0  ;;  %v2364_v38 = vsel %vm5165_vm5, %v2285_v50, 0.0 }
 0x2ae   : > { %v2452_v57 = vrot.slane %v2451_v52, 4  ;;  %v2365_v40 = vsel %vm5181_vm9, %v2286_v53, 0.0  ;;  %v5203_v43 = vpack.c.bf16 %v2350_v63, %v2350_v63  ;;  %v5205_v10 = vpack.c.bf16 %v2352_v56, %v2352_v56  ;;  %v3758_v52 = vld [vmem:[%s5762_s4 + $0x8] sm:$0xf] }
 0x2af   : > { %v2443_v62 = vsel %vm5187_vm11, %v2438_v15, %v2442_v35  ;;  %v5209_v13 = vpack.c.bf16 %v2362_v58, %v2362_v58  ;;  %v5211_v34 = vpack.c.bf16 %v2363_v41, %v2363_v41  ;;  %v5213_v3 = vpack.c.bf16 %v2364_v38, %v2364_v38 }
 0x2b0   : > { %v2457_v24 = vsel %vm5187_vm11, %v2452_v57, %v2456_v44  ;;  %v5217_v1 = vunpack.c.l.b16 %v2443_v62  ;;  %v5219_v22 = vpack.c.bf16 %v2365_v40, %v2365_v40  ;;  %v2264_v7 = vadd.f32 %v5050_v39, %v5074_v48 }
 0x2b1   : > { %v5223_v29 = vunpack.c.l.b16 %v2457_v24  ;;  %v2459_v20 = vshrl.u32 %v5209_v13, 16  ;;  %v2462_v6 = vshll.u32 %v5209_v13, 16  ;;  %v2468_v45 = vshll.u32 %v5211_v34, 16 }
 0x2b2   : > { %v2473_v19 = vshrl.u32 %v5213_v3, 16  ;;  %v2476_v55 = vshll.u32 %v5213_v3, 16  ;;  %v2482_v59 = vshll.u32 %v5219_v22, 16  ;;  %v2266_v16 = vadd.f32 %v5050_v39, %v5077_v17 }
 0x2b3   : > { %v5235_v48 = vpack.c.b16 %v5223_v29, %v5217_v1  ;;  %v2461_v23 = vrot.slane %v2459_v20, 4  ;;  %v2464_v9 = vrot.slane %v2462_v6, 5  ;;  %v2470_v33 = vrot.slane %v2468_v45, 5 }
 0x2b4   : > { %v2475_v35 = vrot.slane %v2473_v19, 4  ;;  %v2478_v37 = vrot.slane %v2476_v55, 5  ;;  %v2484_v49 = vrot.slane %v2482_v59, 5  ;;  %v2288_v61 = vmax.f32 %v2264_v7, 0.0 }
 0x2b5   : > { %3743 = vmatmul.msk.bf16.vlgmr.msra.gmra.mxu1 %vm2528_vm7, %v5235_v48  ;;  %v2465_v42 = vor.u32 %v2464_v9, %v2461_v23  ;;  %v2290_v44 = vmax.f32 %v2266_v16, 0.0  ;;  %v2487_v46 = vshrl.u32 %v5133_v26, 16  ;;  %v2490_v17 = vshll.u32 %v5133_v26, 16 }
 0x2b6   : > { %v2479_v18 = vor.u32 %v2478_v37, %v2475_v35  ;;  %v2367_v47 = vsel %vm5087_vm13, %v2288_v61, 0.0  ;;  %v2501_v5 = vshrl.u32 %v5135_v27, 16  ;;  %v2504_v50 = vshll.u32 %v5135_v27, 16 }
 0x2b7   : > { %v2466_v53 = vrot.slane %v2465_v42, 4  ;;  %v2369_v63 = vsel %vm5097_vm14, %v2290_v44, 0.0  ;;  %v5250_v56 = vpack.c.bf16 %v2367_v47, %v2367_v47  ;;  %v2489_v15 = vrot.slane %v2487_v46, 4 }
 0x2b8   : > { %v2480_v58 = vrot.slane %v2479_v18, 4  ;;  %v5252_v41 = vpack.c.bf16 %v2369_v63, %v2369_v63  ;;  %v2492_v51 = vrot.slane %v2490_v17, 5  ;;  %v2503_v38 = vrot.slane %v2501_v5, 4  ;;  %v3768_v63 = vld [vmem:[%s5762_s4 + $0x10] sm:$0xf] }
 0x2b9   : > { %v2471_v57 = vsel %vm5187_vm11, %v2466_v53, %v2470_v33  ;;  %v2496_v40 = vshll.u32 %v5250_v56, 16  ;;  %v2506_v62 = vrot.slane %v2504_v50, 5  ;;  %v2708_v24 = vsel %vm2541_vm10, %v3758_v52, 0 }
 0x2ba   : > { %v2485_v8 = vsel %vm5187_vm11, %v2480_v58, %v2484_v49  ;;  %v2520_v7 = vunpack.c.l.b16 %v2471_v57  ;;  %v2493_v20 = vor.u32 %v2492_v51, %v2489_v15  ;;  %v2510_v6 = vshll.u32 %v5252_v41, 16  ;;  %2717 = vmatpush.bf16.msrb.mxu2 %v2708_v24 }
 0x2bb   : > { %v5261_v45 = vunpack.c.l.b16 %v2485_v8  ;;  %v2498_v19 = vrot.slane %v2496_v40, 5  ;;  %v2507_v55 = vor.u32 %v2506_v62, %v2503_v38  ;;  %v2221_v59 = vmul.f32 %v5023_v30, %v2194_v31 }
 0x2bc   : > { %v2494_v16 = vrot.slane %v2493_v20, 4  ;;  %v2512_v23 = vrot.slane %v2510_v6, 5  ;;  %v2223_v9 = vmul.f32 %v5023_v30, %v2196_v32  ;;  %v2403_v33 = vshrl.u32 %v5203_v43, 16  ;;  %v2398_v32 = vld [vmem:[%s5762_s4] sm:$0xf] }
 0x2bd   : > { %v2526_v35 = vpack.c.b16 %v5261_v45, %v2520_v7  ;;  %v2508_v37 = vrot.slane %v2507_v55, 4  ;;  %v2248_v49 = vadd.f32 %v5050_v39, %v2221_v59  ;;  %v2406_v61 = vshll.u32 %v5203_v43, 16 }
 0x2be   : > { %v2499_v14 = vsel %vm5187_vm11, %v2494_v16, %v2498_v19  ;;  %v2250_v31 = vadd.f32 %v5050_v39, %v2223_v9  ;;  %v2405_v42 = vrot.slane %v2403_v33, 4  ;;  %v2417_v44 = vshrl.u32 %v5205_v10, 16  ;;  %v3785_v9 = vld [vmem:[%s5762_s4 + $0x1c] sm:$0xf] }
 0x2bf   : > { %3744 = vmatmul.msk.bf16.vlgmr.msra.gmra.mxu2 %vm2528_vm7, %v2526_v35  ;;  %v2513_v46 = vsel %vm5187_vm11, %v2508_v37, %v2512_v23  ;;  %v5286_v17 = vunpack.c.l.b16 %v2499_v14  ;;  %v2272_v18 = vmax.f32 %v2248_v49, 0.0  ;;  %v2408_v47 = vrot.slane %v2406_v61, 5 }
 0x2c0   : > { %v5288_v5 = vunpack.c.l.b16 %v2513_v46  ;;  %v2274_v50 = vmax.f32 %v2250_v31, 0.0  ;;  %v2419_v52 = vrot.slane %v2417_v44, 4  ;;  %v2420_v53 = vshll.u32 %v5205_v10, 16 }
 0x2c1   : > { %v2351_v15 = vsel %vm5173_vm8, %v2272_v18, 0.0  ;;  %v2409_v58 = vor.u32 %v2408_v47, %v2405_v42  ;;  %v2770_v51 = vsel %vm2541_vm10, %v3763_v28, 0  ;;  %v2607_v38 = vsel %vm2541_vm10, %v2398_v32, 0 }
 0x2c2   : > { %v5300_v57 = vpack.c.b16 %v5288_v5, %v5286_v17  ;;  %v2353_v40 = vsel %vm5181_vm9, %v2274_v50, 0.0  ;;  %v2375_v62 = vpack.c.bf16 %v2351_v15, %v2351_v15  ;;  %v2422_v24 = vrot.slane %v2420_v53, 5  ;;  %2779 = vmatpush.bf16.msrb.mxu3 %v2770_v51  ;;  %2616 = vmatpush.bf16.msrb.mxu1 %v2607_v38  ;;  %v3792_v50 = vld [vmem:[%s5762_s4 + $0x20] sm:$0xf]  ;;  %v2178_v51 = vld [vmem:[%s4976_s19 + $0x24] sm:$0x1] }
 0x2c3   : > { %v2377_v8 = vpack.c.bf16 %v2353_v40, %v2353_v40  ;;  %v2410_v7 = vrot.slane %v2409_v58, 4  ;;  %v2858_v54 = vsel %vm2541_vm10, %v3768_v63, 0  ;;  %v2582_v20 = vunpack.c.l.b16 %v5203_v43  ;;  %v2177_v58 = vld [vmem:[%s4976_s19 + $0x20] sm:$0xf] }
 0x2c4   : > { %3745 = vmatmul.msk.bf16.vlgmr.msra.gmra.mxu3 %vm2528_vm7, %v5300_v57  ;;  %v2412_v6 = vshll.u32 %v2375_v62, 16  ;;  %v2423_v19 = vor.u32 %v2422_v24, %v2419_v52  ;;  %2867 = vmatpush.bf16.msrb.mxu0 %v2858_v54  ;;  %v2583_v55 = vunpack.c.l.b16 %v5205_v10  ;;  %vm2646_vm12 = vcmask 1042432  }
 0x2c5   : > { %v2426_v59 = vshll.u32 %v2377_v8, 16  ;;  %vm2647_vm13 = vcmask 1046532   ;;  %v3750_v16 = vrot.slane %v5203_v43, 9  ;;  %v2651_v23 = vrot.slane %v2375_v62, 5  ;;  %v3775_v43 = vld [vmem:[%s5762_s4 + $0x14] sm:$0xf] }
 0x2c6   : > { %v2414_v33 = vrot.slane %v2412_v6, 5  ;;  %v2424_v35 = vrot.slane %v2423_v19, 4  ;;  %v2590_v37 = vpack.c.b16 %v2583_v55, %v2582_v20  ;;  %vm5316_vm14 = vmor %vm2646_vm12, %vm2647_vm13  ;;  %v3751_v61 = vrot.slane %v5205_v10, 9 }
 0x2c7   : > { %v2428_v14 = vrot.slane %v2426_v59, 5  ;;  %v2652_v31 = vsel %vm5316_vm14, %v3750_v16, %v2651_v23  ;;  %v2655_v42 = vrot.slane %v2377_v8, 5  ;;  %v2982_v32 = vsel %vm2541_vm10, %v3780_v4, 0 }
 0x2c8   : > { %v2415_v44 = vsel %vm5187_vm11, %v2410_v7, %v2414_v33  ;;  %3746 = vmatmul.msk.bf16.vlgmr.msrb.gmra.mxu1 %vm2528_vm7, %v2590_v37  ;;  %v2683_v28 = vunpack.c.l.b16 %v2652_v31  ;;  %v3062_v10 = vsel %vm2541_vm10, %v3785_v9, 0  ;;  %2991 = vmatpush.bf16.msra.mxu2 %v2982_v32  ;;  %v2584_v63 = vunpack.c.l.b16 %v5117_v25 }
 0x2c9   : > { %v2429_v46 = vsel %vm5187_vm11, %v2424_v35, %v2428_v14  ;;  %v2516_v18 = vunpack.c.l.b16 %v2415_v44  ;;  %v5335_v47 = vsel %vm5316_vm14, %v3751_v61, %v2655_v42  ;;  %3071 = vmatpush.bf16.msra.mxu3 %v3062_v10  ;;  %v2928_v15 = vsel %vm2541_vm10, %v3775_v43, 0  ;;  %v2189_v10 = vld [vmem:[%s4976_s19 + $0x70] sm:$0xf] }
 0x2ca   : > { %v2517_v52 = vunpack.c.l.b16 %v2429_v46  ;;  %v2684_v53 = vunpack.c.l.b16 %v5335_v47  ;;  %2937 = vmatpush.bf16.msra.mxu1 %v2928_v15  ;;  %v3124_v62 = vsel %vm2541_vm10, %v3792_v50, 0  ;;  %v2201_v24 = vunpack.c.l.bf16 %v2177_v58 }
 0x2cb   : > { %v2299_v8 = vadd.s32 4, %v4972_v36  ;;  %v2753_v7 = vpack.c.b16 %v2584_v63, %v2583_v55  ;;  %v2585_v54 = vunpack.c.l.b16 %v5129_v0  ;;  %v2202_v20 = vunpack.c.l.bf16 %v2178_v51 }
 0x2cc   : > { %v2524_v38 = vpack.c.b16 %v2517_v52, %v2516_v18  ;;  %v2691_v40 = vpack.c.b16 %v2684_v53, %v2683_v28  ;;  %v3752_v6 = vrot.slane %v5117_v25, 9  ;;  %v2228_v19 = vmul.f32 %v5023_v30, %v2201_v24 }
 0x2cd   : > { %vm2308_vm15 = vcmp.ge.s32.totalorder %v2299_v8, 1  ;;  %vm2314_vm0 = vcmp.le.s32.totalorder %v2299_v8, 8  ;;  %v2659_v4 = vrot.slane %v5119_v21, 5  ;;  %v3753_v59 = vrot.slane %v5129_v0, 9 }
 0x2ce   : > { %3742 = vmatmul.msk.bf16.vlgmr.msra.gmra.mxu0 %vm2528_vm7, %v2524_v38  ;;  %v2663_v16 = vrot.slane %v5131_v12, 5  ;;  %vm2320_vm10 = vmand %vm2308_vm15, %vm2314_vm0  ;;  %v2229_v55 = vmul.f32 %v5023_v30, %v2202_v20  ;;  %v2255_v23 = vadd.f32 %v5050_v39, %v2228_v19  ;;  %v5373_v0 = vpack.c.b16 %v2585_v54, %v2584_v63 }
 0x2cf   : > { %3759 = vmatmul.msk.bf16.vlgmr.msrb.gmra.mxu2 %vm2528_vm7, %v2691_v40  ;;  %3133 = vmatpush.bf16.msra.mxu0 %v3124_v62  ;;  %vm5361_vm1 = vmand %vm2320_vm10, %vm2322_vm2  ;;  %v5377_v12 = vsel %vm5316_vm14, %v3752_v6, %v2659_v4  ;;  %v2841_v46 = vpack.c.b16 %v5217_v1, %v2517_v52  ;;  %v2213_v38 = vunpack.c.l.bf16 %v2189_v10  ;;  %v2586_v40 = vunpack.c.l.b16 %v5209_v13 }
 0x2d0   : > { %v2256_v25 = vadd.f32 %v5050_v39, %v2229_v55  ;;  %v2279_v33 = vmax.f32 %v2255_v23, 0.0  ;;  %vm5368_vm6 = vmand %vm2320_vm10, %vm2337_vm3  ;;  %v5381_v35 = vsel %vm5316_vm14, %v3753_v59, %v2663_v16  ;;  %v2685_v42 = vunpack.c.l.b16 %v5377_v12  ;;  %v2190_v55 = vld [vmem:[%s4976_s19 + $0x74] sm:$0x1] }
 0x2d1   : > { %v2686_v43 = vunpack.c.l.b16 %v5381_v35  ;;  %v2587_v62 = vunpack.c.l.b16 %v5213_v3  ;;  %v3754_v1 = vrot.slane %v5209_v13, 9  ;;  %v2667_v52 = vrot.slane %v5211_v34, 5 }
 0x2d2   : > { %v2280_v37 = vmax.f32 %v2256_v25, 0.0  ;;  %v2358_v61 = vsel %vm5361_vm1, %v2279_v33, 0.0  ;;  %v3755_v24 = vrot.slane %v5213_v3, 9  ;;  %v3756_v8 = vrot.slane %v5133_v26, 9 }
 0x2d3   : > { %v5385_v14 = vpack.c.bf16 %v2358_v61, %v2358_v61  ;;  %v5403_v63 = vpack.c.b16 %v2686_v43, %v2685_v42  ;;  %v3757_v19 = vrot.slane %v5135_v27, 9  ;;  %v2679_v13 = vrot.slane %v5252_v41, 5 }
 0x2d4   : > { %3764 = vmatmul.msk.bf16.vlgmr.msrb.gmra.mxu3 %vm2528_vm7, %v2753_v7  ;;  %v2359_v31 = vsel %vm5368_vm6, %v2280_v37, 0.0  ;;  %v2675_v7 = vrot.slane %v5250_v56, 5  ;;  %v2671_v34 = vrot.slane %v5219_v22, 5  ;;  %v2240_v56 = vmul.f32 %v5023_v30, %v2213_v38 }
 0x2d5   : > { %v5391_v44 = vpack.c.bf16 %v2359_v31, %v2359_v31  ;;  %v2810_v28 = vshrl.u32 %v5385_v14, 16  ;;  %v2813_v32 = vshll.u32 %v5385_v14, 16  ;;  %v2751_v58 = vunpack.c.l.b16 %v5385_v14 }
 0x2d6   : > { %v5424_v3 = vsel %vm5316_vm14, %v3756_v8, %v2675_v7  ;;  %v5429_v59 = vsel %vm5316_vm14, %v3757_v19, %v2679_v13  ;;  %v2592_v23 = vpack.c.b16 %v2587_v62, %v2586_v40  ;;  %v2668_v22 = vsel %vm5316_vm14, %v3754_v1, %v2667_v52  ;;  %v2179_v8 = vld [vmem:[%s4976_s19 + $0x28] sm:$0xf] }
 0x2d7   : > { %v2812_v18 = vrot.slane %v2810_v28, 4  ;;  %v2815_v50 = vrot.slane %v2813_v32, 5  ;;  %v2819_v15 = vshll.u32 %v5391_v44, 16  ;;  %v2754_v4 = vpack.c.b16 %v2751_v58, %v2585_v54 }
 0x2d8   : > { %3747 = vmatmul.msk.bf16.gmra.mxu1 %vm2528_vm7, %v5373_v0  ;;  %v2689_v16 = vunpack.c.l.b16 %v5424_v3  ;;  %v2690_v41 = vunpack.c.l.b16 %v5429_v59  ;;  %v5441_v25 = vsel %vm5316_vm14, %v3755_v24, %v2671_v34  ;;  %v2267_v37 = vadd.f32 %v5050_v39, %v2240_v56 }
 0x2d9   : > { %v2816_v51 = vor.u32 %v2815_v50, %v2812_v18  ;;  %v2821_v6 = vrot.slane %v2819_v15, 5  ;;  %v2214_v61 = vunpack.c.l.bf16 %v2190_v55  ;;  %v2687_v28 = vunpack.c.l.b16 %v2668_v22 }
 0x2da   : > { %v5447_v33 = vpack.c.b16 %v2690_v41, %v2689_v16  ;;  %v2688_v32 = vunpack.c.l.b16 %v5441_v25  ;;  %v2291_v10 = vmax.f32 %v2267_v37, 0.0  ;;  %v2588_v15 = vunpack.c.l.b16 %v5133_v26 }
 0x2db   : > { %v2817_v20 = vrot.slane %v2816_v51, 4  ;;  %v2300_v13 = vadd.s32 5, %v4972_v36  ;;  %v2843_v34 = vpack.c.b16 %v5286_v17, %v5261_v45  ;;  %v2911_v2 = vpack.c.b16 %v2685_v42, %v2684_v53 }
 0x2dc   : > { %v2693_v50 = vpack.c.b16 %v2688_v32, %v2687_v28  ;;  %v2370_v51 = vsel %vm5361_vm1, %v2291_v10, 0.0  ;;  %v2755_v1 = vpack.c.b16 %v2588_v15, %v2587_v62  ;;  %v3773_v47 = vrot.slane %v5385_v14, 9 }
 0x2dd   : > { %v2822_v54 = vsel %vm5187_vm11, %v2817_v20, %v2821_v6  ;;  %v5465_v40 = vpack.c.bf16 %v2370_v51, %v2370_v51  ;;  %v2203_v20 = vunpack.c.l.bf16 %v2179_v8  ;;  %vm2309_vm4 = vcmp.ge.s32.totalorder %v2300_v13, 1 }
 0x2de   : > { %3769 = vmatmul.msk.bf16.vlgmr.msrb.gmra.mxu0 %vm2528_vm7, %v2841_v46  ;;  %v5450_v31 = vunpack.c.l.b16 %v2822_v54  ;;  %v2241_v46 = vmul.f32 %v5023_v30, %v2214_v61  ;;  %vm2315_vm5 = vcmp.le.s32.totalorder %v2300_v13, 8  ;;  %v2901_v53 = vrot.slane %v5391_v44, 5 }
 0x2df   : > { %3760 = vmatmul.msk.bf16.gmra.mxu2 %vm2528_vm7, %v5403_v63  ;;  %v2824_v24 = vshrl.u32 %v5465_v40, 16  ;;  %v2827_v26 = vshll.u32 %v5465_v40, 16  ;;  %v2230_v6 = vmul.f32 %v5023_v30, %v2203_v20  ;;  %vm5488_vm8 = vmand %vm2309_vm4, %vm2315_vm5  ;;  %v2191_v20 = vld [vmem:[%s4976_s19 + $0x78] sm:$0xf] }
 0x2e0   : > { %v2842_v18 = vpack.c.b16 %v5450_v31, %v5223_v29  ;;  %v2268_v38 = vadd.f32 %v5050_v39, %v2241_v46  ;;  %v2589_v29 = vunpack.c.l.b16 %v5135_v27  ;;  %vm5500_vm9 = vmand %vm5488_vm8, %vm2322_vm2 }
 0x2e1   : > { %v2826_v62 = vrot.slane %v2824_v24, 4  ;;  %v2829_v27 = vrot.slane %v2827_v26, 5  ;;  %v2257_v21 = vadd.f32 %v5050_v39, %v2230_v6  ;;  %vm5522_vm2 = vmand %vm5488_vm8, %vm2337_vm3  ;;  %v2215_v6 = vunpack.c.l.bf16 %v2191_v20 }
 0x2e2   : > { %v2292_v52 = vmax.f32 %v2268_v38, 0.0  ;;  %v5472_v9 = vpack.c.b16 %v2589_v29, %v2588_v15  ;;  %vm3186_vm3 = vcmask 57344  }
 0x2e3   : > { %v2830_v55 = vor.u32 %v2829_v27, %v2826_v62  ;;  %v2281_v36 = vmax.f32 %v2257_v21, 0.0  ;;  %v2242_v13 = vmul.f32 %v5023_v30, %v2215_v6 }
 0x2e4   : > { %3765 = vmatmul.msk.bf16.gmra.mxu3 %vm2528_vm7, %v2754_v4  ;;  %v2371_v7 = vsel %vm5368_vm6, %v2292_v52, 0.0  ;;  %v2180_v4 = vld [vmem:[%s4976_s19 + $0x2c] sm:$0x1] }
 0x2e5   : > { %v5477_v19 = vpack.c.bf16 %v2371_v7, %v2371_v7  ;;  %v2204_v56 = vunpack.c.l.bf16 %v2180_v4  ;;  %v2831_v45 = vrot.slane %v2830_v55, 4  ;;  %v2360_v10 = vsel %vm5500_vm9, %v2281_v36, 0.0 }
 0x2e6   : > { %v2269_v21 = vadd.f32 %v5050_v39, %v2242_v13 }
 0x2e7   : > { %v2833_v54 = vshll.u32 %v5477_v19, 16  ;;  %v2231_v37 = vmul.f32 %v5023_v30, %v2204_v56  ;;  %v2905_v61 = vrot.slane %v5477_v19, 5 }
 0x2e8   : > { %3748 = vmatmul.msk.bf16.gmra.mxu1 %vm2528_vm7, %v2592_v23  ;;  %v2752_v23 = vunpack.c.l.b16 %v5465_v40 }
 0x2e9   : > { %v2835_v17 = vrot.slane %v2833_v54, 5  ;;  %v2258_v46 = vadd.f32 %v5050_v39, %v2231_v37 }
 0x2ea   : > { %v2756_v28 = vpack.c.b16 %v2752_v23, %v2589_v29  ;;  %v2902_v29 = vsel %vm5316_vm14, %v3773_v47, %v2901_v53 }
 0x2eb   : > { %v2282_v51 = vmax.f32 %v2258_v46, 0.0  ;;  %v2909_v44 = vunpack.c.l.b16 %v2902_v29 }
 0x2ed   : > { %v2361_v60 = vsel %vm5522_vm2, %v2282_v51, 0.0 }
 0x2ee   : > { %3770 = vmatmul.msk.bf16.gmra.mxu0 %vm2528_vm7, %v2842_v18  ;;  %v2836_v18 = vsel %vm5187_vm11, %v2831_v45, %v2835_v17  ;;  %v2385_v52 = vpack.c.bf16 %v2361_v60, %v2361_v60 }
 0x2ef   : > { %3761 = vmatmul.msk.bf16.gmra.mxu2 %vm2528_vm7, %v2693_v50  ;;  %v2384_v50 = vpack.c.bf16 %v2360_v10, %v2360_v10  ;;  %v5516_v15 = vunpack.c.l.b16 %v2836_v18 }
 0x2f0   : > { %v3031_v7 = vshll.u32 %v2385_v52, 16  ;;  %v3105_v22 = vrot.slane %v2385_v52, 5 }
 0x2f1   : > { %v3022_v12 = vshrl.u32 %v2384_v50, 16  ;;  %v3025_v42 = vshll.u32 %v2384_v50, 16  ;;  %v2971_v4 = vunpack.c.l.b16 %v2384_v50  ;;  %v3790_v54 = vrot.slane %v2384_v50, 9 }
 0x2f2   : > { %v3033_v27 = vrot.slane %v3031_v7, 5 }
 0x2f3   : > { %v3024_v24 = vrot.slane %v3022_v12, 4  ;;  %v3027_v26 = vrot.slane %v3025_v42, 5  ;;  %v3106_v14 = vsel %vm5316_vm14, %v3790_v54, %v3105_v22 }
 0x2f4   : > { %3766 = vmatmul.msk.bf16.gmra.mxu3 %vm2528_vm7, %v2755_v1  ;;  %v2844_v1 = vpack.c.b16 %v5516_v15, %v5288_v5  ;;  %v2912_v5 = vpack.c.b16 %v2909_v44, %v2686_v43  ;;  %v2293_v43 = vmax.f32 %v2269_v21, 0.0 }
 0x2f5   : > { %v3028_v8 = vor.u32 %v3027_v26, %v3024_v24 }
 0x2f6   : > { %v2372_v37 = vsel %vm5500_vm9, %v2293_v43, 0.0 }
 0x2f7   : > { %v3029_v62 = vrot.slane %v3028_v8, 4 }
 0x2f8   : > { %3749 = vmatmul.msk.bf16.gmra.mxu1 %vm2528_vm7, %v5472_v9 }
 0x2fe   : > { %3771 = vmatmul.msk.bf16.gmra.mxu0 %vm2528_vm7, %v2843_v34  ;;  %v2192_v34 = vld [vmem:[%s4976_s19 + $0x7c] sm:$0x1]  ;;  %s5639_s19 = scalar_lea.vmem [#allocation4], %s3825_s18 }
 0x2ff   : > { %3762 = vmatmul.msk.bf16.gmra.mxu2 %vm2528_vm7, %v5447_v33  ;;  %v2216_v56 = vunpack.c.l.bf16 %v2192_v34 }
 0x301   : > { %v2243_v55 = vmul.f32 %v5023_v30, %v2216_v56  ;;  %v2913_v30 = vpack.c.b16 %v2689_v16, %v2688_v32 }
 0x303   : > { %v2270_v45 = vadd.f32 %v5050_v39, %v2243_v55 }
 0x304   : > { %3767 = vmatmul.msk.bf16.gmra.mxu3 %vm2528_vm7, %v2756_v28 }
 0x305   : > { %v2294_v17 = vmax.f32 %v2270_v45, 0.0 }
 0x307   : > { %v2373_v46 = vsel %vm5522_vm2, %v2294_v17, 0.0 }
 0x308   : > { %3776 = vmatmul.msk.bf16.vlgmr.msra.gmra.mxu1 %vm2528_vm7, %v2911_v2  ;;  %v2397_v3 = vpack.c.bf16 %v2373_v46, %v2373_v46 }
 0x30a   : > { %v3045_v19 = vshll.u32 %v2397_v3, 16  ;;  %v3109_v59 = vrot.slane %v2397_v3, 5 }
 0x30c   : > { %v3047_v47 = vrot.slane %v3045_v19, 5 }
 0x30e   : > { %3772 = vmatmul.msk.bf16.gmra.mxu0 %vm2528_vm7, %v2844_v1 }
 0x30f   : > { %3781 = vmatmul.msk.bf16.vlgmr.msra.gmra.mxu2 %vm2528_vm7, %v5373_v0  ;;  %v3034_v0 = vsel %vm5187_vm11, %v3029_v62, %v3033_v27 }
 0x310   : > { %v3051_v35 = vunpack.c.l.b16 %v3034_v0 }
 0x312   : > { %v3053_v36 = vpack.c.b16 %v3051_v35, %v5450_v31  ;;  %v3774_v31 = vrot.slane %v5465_v40, 9 }
 0x314   : > { %3786 = vmatmul.msk.bf16.vlgmr.msra.gmra.mxu3 %vm2528_vm7, %v5235_v48  ;;  %v2973_v48 = vpack.c.b16 %v2971_v4, %v2751_v58  ;;  %v3113_v58 = vunpack.c.l.b16 %v3106_v14  ;;  %v2906_v25 = vsel %vm5316_vm14, %v3774_v31, %v2905_v61 }
 0x315   : > { %v2910_v18 = vunpack.c.l.b16 %v2906_v25 }
 0x316   : > { %v3115_v10 = vpack.c.b16 %v3113_v58, %v2909_v44 }
 0x317   : > { %v2914_v51 = vpack.c.b16 %v2910_v18, %v2690_v41 }
 0x318   : > { %3777 = vmatmul.msk.bf16.gmra.mxu1 %vm2528_vm7, %v2912_v5 }
 0x31e   : > { %3793 = vmatmul.msk.bf16.vlgmr.msra.gmra.mxu0 %vm2528_vm7, %v5403_v63  ;;  %v2396_v63 = vpack.c.bf16 %v2372_v37, %v2372_v37 }
 0x31f   : > { %3782 = vmatmul.msk.bf16.gmra.mxu2 %vm2528_vm7, %v2973_v48 }
 0x320   : > { %v3036_v39 = vshrl.u32 %v2396_v63, 16  ;;  %v3039_v28 = vshll.u32 %v2396_v63, 16  ;;  %v2972_v53 = vunpack.c.l.b16 %v2396_v63 }
 0x322   : > { %v3038_v16 = vrot.slane %v3036_v39, 4  ;;  %v3041_v32 = vrot.slane %v3039_v28, 5 }
 0x324   : > { %3787 = vmatmul.msk.bf16.gmra.mxu3 %vm2528_vm7, %v3053_v36  ;;  %v3042_v2 = vor.u32 %v3041_v32, %v3038_v16 }
 0x326   : > { %v3043_v38 = vrot.slane %v3042_v2, 4 }
 0x328   : > { %3778 = vmatmul.msk.bf16.gmra.mxu1 %vm2528_vm7, %v2913_v30  ;;  %v3048_v12 = vsel %vm5187_vm11, %v3043_v38, %v3047_v47 }
 0x329   : > { %v3052_v1 = vunpack.c.l.b16 %v3048_v12 }
 0x32b   : > { %v3054_v41 = vpack.c.b16 %v3052_v1, %v5516_v15 }
 0x32e   : > { %3794 = vmatmul.msk.bf16.gmra.mxu0 %vm2528_vm7, %v3115_v10 }
 0x32f   : > { %3783 = vmatmul.msk.bf16.gmra.mxu2 %vm2528_vm7, %v5472_v9  ;;  %v2974_v9 = vpack.c.b16 %v2972_v53, %v2752_v23 }
 0x332   : > { %v5576_v50 = vpop.f32.mrf.mxu1 }
 0x334   : > { %3788 = vmatmul.msk.bf16.gmra.mxu3 %vm2528_vm7, %v5300_v57  ;;  %v3791_v57 = vrot.slane %v2396_v63, 9 }
 0x336   : > { %v3110_v11 = vsel %vm5316_vm14, %v3791_v57, %v3109_v59 }
 0x337   : > { %v3114_v23 = vunpack.c.l.b16 %v3110_v11 }
 0x338   : > { %3779 = vmatmul.msk.bf16.gmra.mxu1 %vm2528_vm7, %v2914_v51 }
 0x339   : > { %v3116_v52 = vpack.c.b16 %v3114_v23, %v2910_v18 }
 0x33a   : > { %v5587_v42 = vpop.f32.mrf.mxu1 }
 0x33e   : > { %3795 = vmatmul.msk.bf16.gmra.mxu0 %vm2528_vm7, %v5447_v33 }
 0x33f   : > { %3784 = vmatmul.msk.bf16.gmra.mxu2 %vm2528_vm7, %v2974_v9 }
 0x342   : > { %v5593_v60 = vpop.f32.mrf.mxu2 }
 0x344   : > { %3789 = vmatmul.msk.bf16.gmra.mxu3 %vm2528_vm7, %v3054_v41 }
 0x345   : > { %v2618_v40 = vpop.f32.mrf.mxu1 }
 0x347   : > { %v5598_v29 = vpop.f32.mrf.mxu3 }
 0x34a   : > { %v5600_v24 = vpop.f32.mrf.mxu2 }
 0x34b   : > { %v2554_v33 = vpop.f32.mrf.mxu0 }
 0x34c   : > { %v2619_v58 = vadd.f32 %v2618_v40, %v2554_v33 }
 0x34d   : > { %v2620_v26 = vpop.f32.mrf.mxu1 }
 0x34e   : > { %3796 = vmatmul.msk.bf16.gmra.mxu0 %vm2528_vm7, %v3116_v52 }
 0x34f   : > { %v5603_v44 = vpop.f32.mrf.mxu3 }
 0x352   : > { %v2719_v15 = vpop.f32.mrf.mxu2 }
 0x353   : > { %v2556_v8 = vpop.f32.mrf.mxu0  ;;  %v2739_v31 = vadd.f32 %v2719_v15, %v2619_v58 }
 0x354   : > { %v2621_v46 = vadd.f32 %v2620_v26, %v2556_v8 }
 0x355   : > { %v2623_v7 = vpop.f32.mrf.mxu1 }
 0x356   : > { %v2624_v47 = vadd.f32 %v2623_v7, %v5576_v50 }
 0x357   : > { %v2781_v49 = vpop.f32.mrf.mxu3 }
 0x358   : > { %v2801_v28 = vadd.f32 %v2781_v49, %v2739_v31 }
 0x35a   : > { %v2721_v20 = vpop.f32.mrf.mxu2 }
 0x35b   : > { %v2869_v5 = vpop.f32.mrf.mxu0  ;;  %v2740_v3 = vadd.f32 %v2721_v20, %v2621_v46 }
 0x35c   : > { %v2889_v16 = vadd.f32 %v2869_v5, %v2801_v28 }
 0x35d   : > { %v2625_v6 = vpop.f32.mrf.mxu1 }
 0x35e   : > { %v2626_v52 = vadd.f32 %v2625_v6, %v5587_v42 }
 0x35f   : > { %v2783_v62 = vpop.f32.mrf.mxu3 }
 0x360   : > { %v2802_v19 = vadd.f32 %v2783_v62, %v2740_v3 }
 0x362   : > { %v2724_v27 = vpop.f32.mrf.mxu2 }
 0x363   : > { %v2871_v13 = vpop.f32.mrf.mxu0  ;;  %v2741_v12 = vadd.f32 %v2724_v27, %v2624_v47 }
 0x364   : > { %v2890_v1 = vadd.f32 %v2871_v13, %v2802_v19 }
 0x365   : > { %v2628_v4 = vpop.f32.mrf.mxu1 }
 0x366   : > { %v2629_v42 = vadd.f32 %v2628_v4, %v5593_v60 }
 0x367   : > { %v2786_v34 = vpop.f32.mrf.mxu3 }
 0x368   : > { %v2803_v11 = vadd.f32 %v2786_v34, %v2741_v12 }
 0x36a   : > { %v2726_v0 = vpop.f32.mrf.mxu2 }
 0x36b   : > { %v2874_v21 = vpop.f32.mrf.mxu0  ;;  %v2742_v26 = vadd.f32 %v2726_v0, %v2626_v52 }
 0x36c   : > { %v2891_v8 = vadd.f32 %v2874_v21, %v2803_v11 }
 0x36d   : > { %v5605_v56 = vpop.f32.mrf.mxu1 }
 0x36f   : > { %v2788_v48 = vpop.f32.mrf.mxu3 }
 0x370   : > { %v2804_v5 = vadd.f32 %v2788_v48, %v2742_v26 }
 0x372   : > { %v2729_v35 = vpop.f32.mrf.mxu2 }
 0x373   : > { %v5607_v43 = vpop.f32.mrf.mxu0  ;;  %v2743_v58 = vadd.f32 %v2729_v35, %v2629_v42  ;;  %v2631_v35 = vadd.f32 %v5605_v56, %v5600_v24 }
 0x375   : > { %v5609_v55 = vpop.f32.mrf.mxu1 }
 0x377   : > { %v5611_v54 = vpop.f32.mrf.mxu3 }
 0x37a   : > { %v5613_v22 = vpop.f32.mrf.mxu2 }
 0x37b   : > { %v5615_v36 = vpop.f32.mrf.mxu0 }
 0x37d   : > { %v5617_v37 = vpop.f32.mrf.mxu1 }
 0x37f   : > { %v5619_v45 = vpop.f32.mrf.mxu3 }
 0x382   : > { %v5621_v14 = vpop.f32.mrf.mxu2 }
 0x383   : > { %v5623_v30 = vpop.f32.mrf.mxu0 }
 0x385   : > { %v2939_v63 = vpop.f32.mrf.mxu1 }
 0x386   : > { %v2959_v32 = vadd.f32 %v2939_v63, %v2889_v16 }
 0x387   : > { %v5625_v17 = vpop.f32.mrf.mxu3 }
 0x38a   : > { %v5627_v61 = vpop.f32.mrf.mxu2 }
 0x38b   : > { %v5629_v39 = vpop.f32.mrf.mxu0 }
 0x38d   : > { %v2941_v10 = vpop.f32.mrf.mxu1 }
 0x38e   : > { %v2960_v57 = vadd.f32 %v2941_v10, %v2890_v1  ;;  %v2892_v10 = vadd.f32 %v5607_v43, %v2804_v5  ;;  %v2744_v43 = vadd.f32 %v5613_v22, %v2631_v35 }
 0x38f   : > { %v5631_v25 = vpop.f32.mrf.mxu3 }
 0x390   : > { %v2806_v56 = vadd.f32 %v5619_v45, %v2744_v43 }
 0x392   : > { %v2993_v18 = vpop.f32.mrf.mxu2  ;;  %v2894_v45 = vadd.f32 %v5623_v30, %v2806_v56 }
 0x393   : > { %v5633_v2 = vpop.f32.mrf.mxu0  ;;  %v3013_v51 = vadd.f32 %v2993_v18, %v2959_v32  ;;  %v2805_v32 = vadd.f32 %v5611_v54, %v2743_v58 }
 0x395   : > { %v2944_v38 = vpop.f32.mrf.mxu1  ;;  %v2893_v54 = vadd.f32 %v5615_v36, %v2805_v32 }
 0x396   : > { %v2961_v7 = vadd.f32 %v2944_v38, %v2891_v8 }
 0x397   : > { %v3073_v53 = vpop.f32.mrf.mxu3 }
 0x398   : > { %v3093_v9 = vadd.f32 %v3073_v53, %v3013_v51 }
 0x39a   : > { %v2995_v59 = vpop.f32.mrf.mxu2 }
 0x39b   : > { %v3135_v41 = vpop.f32.mrf.mxu0  ;;  %v3014_v23 = vadd.f32 %v2995_v59, %v2960_v57 }
 0x39c   : > { %v3155_v40 = vadd.f32 %v3135_v41, %v3093_v9 }
 0x39d   : > { %v2946_v50 = vpop.f32.mrf.mxu1 }
 0x39e   : > { %3222 = vst.msk [vmem:[%s5639_s19] sm:$0xff] %vm2528_vm7, %v3155_v40  ;;  %v3189_v62 = vmul.f32 %v3155_v40, %v3155_v40  ;;  %v3164_v6 = vsel %vm2528_vm7, %v3155_v40, 0.0  ;;  %v2962_v4 = vadd.f32 %v2946_v50, %v2892_v10 }
 0x39f   : > { %v3075_v33 = vpop.f32.mrf.mxu3 }
 0x3a0   : > { %v3094_v15 = vadd.f32 %v3075_v33, %v3014_v23  ;;  %v3197_v21 = vsel %vm2528_vm7, %v3189_v62, 0.0  ;;  %v2634_v23 = vadd.f32 %v5609_v55, %v5598_v29 }
 0x3a2   : > { %v2998_v49 = vpop.f32.mrf.mxu2  ;;  %v2745_v36 = vadd.f32 %v5621_v14, %v2634_v23 }
 0x3a3   : > { %v3137_v20 = vpop.f32.mrf.mxu0  ;;  %v3015_v13 = vadd.f32 %v2998_v49, %v2961_v7 }
 0x3a4   : > { %v3156_v27 = vadd.f32 %v3137_v20, %v3094_v15  ;;  %v2807_v29 = vadd.f32 %v5625_v17, %v2745_v36 }
 0x3a5   : > { %v2949_v60 = vpop.f32.mrf.mxu1 }
 0x3a6   : > { %v3165_v34 = vsel %vm2528_vm7, %v3156_v27, 0.0  ;;  %v3190_v63 = vmul.f32 %v3156_v27, %v3156_v27  ;;  %3223 = vst.msk [vmem:[%s5639_s19 + $0x8] sm:$0xff] %vm2528_vm7, %v3156_v27  ;;  %v2963_v57 = vadd.f32 %v2949_v60, %v2893_v54  ;;  %v2636_v27 = vadd.f32 %v5617_v37, %v5603_v44 }
 0x3a7   : > { %v3166_v0 = vadd.f32 %v3165_v34, %v3164_v6  ;;  %v3078_v31 = vpop.f32.mrf.mxu3  ;;  %v2895_v17 = vadd.f32 %v5629_v39, %v2807_v29 }
 0x3a8   : > { %v3198_v48 = vsel %vm2528_vm7, %v3190_v63, 0.0  ;;  %v3095_v28 = vadd.f32 %v3078_v31, %v3015_v13  ;;  %v2746_v6 = vadd.f32 %v5627_v61, %v2636_v27 }
 0x3a9   : > { %v3199_v46 = vadd.f32 %v3198_v48, %v3197_v21 }
 0x3aa   : > { %v3000_v3 = vpop.f32.mrf.mxu2  ;;  %v2808_v44 = vadd.f32 %v5631_v25, %v2746_v6 }
 0x3ab   : > { %v3140_v16 = vpop.f32.mrf.mxu0  ;;  %v3016_v19 = vadd.f32 %v3000_v3, %v2962_v4 }
 0x3ac   : > { %v3157_v18 = vadd.f32 %v3140_v16, %v3095_v28  ;;  %v2896_v3 = vadd.f32 %v5633_v2, %v2808_v44 }
 0x3ad   : > { %v2951_v24 = vpop.f32.mrf.mxu1 }
 0x3ae   : > { %v3167_v51 = vsel %vm2528_vm7, %v3157_v18, 0.0  ;;  %v3191_v38 = vmul.f32 %v3157_v18, %v3157_v18  ;;  %3224 = vst.msk [vmem:[%s5639_s19 + $0x10] sm:$0xff] %vm2528_vm7, %v3157_v18  ;;  %v2964_v7 = vadd.f32 %v2951_v24, %v2894_v45 }
 0x3af   : > { %v3168_v47 = vadd.f32 %v3167_v51, %v3166_v0  ;;  %v3080_v53 = vpop.f32.mrf.mxu3 }
 0x3b0   : > { %v3200_v12 = vsel %vm2528_vm7, %v3191_v38, 0.0  ;;  %v3096_v9 = vadd.f32 %v3080_v53, %v3016_v19 }
 0x3b1   : > { %v3201_v1 = vadd.f32 %v3200_v12, %v3199_v46 }
 0x3b2   : > { %v3003_v59 = vpop.f32.mrf.mxu2 }
 0x3b3   : > { %v3142_v41 = vpop.f32.mrf.mxu0  ;;  %v3017_v40 = vadd.f32 %v3003_v59, %v2963_v57 }
 0x3b4   : > { %v3158_v11 = vadd.f32 %v3142_v41, %v3096_v9 }
 0x3b5   : > { %v2954_v62 = vpop.f32.mrf.mxu1 }
 0x3b6   : > { %v3169_v52 = vsel %vm2528_vm7, %v3158_v11, 0.0  ;;  %v3192_v22 = vmul.f32 %v3158_v11, %v3158_v11  ;;  %3225 = vst.msk [vmem:[%s5639_s19 + $0x18] sm:$0xff] %vm2528_vm7, %v3158_v11  ;;  %v2965_v0 = vadd.f32 %v2954_v62, %v2895_v17 }
 0x3b7   : > { %v3170_v33 = vadd.f32 %v3169_v52, %v3168_v47  ;;  %v3083_v50 = vpop.f32.mrf.mxu3 }
 0x3b8   : > { %v3202_v26 = vsel %vm2528_vm7, %v3192_v22, 0.0  ;;  %v3097_v15 = vadd.f32 %v3083_v50, %v3017_v40 }
 0x3b9   : > { %v3203_v8 = vadd.f32 %v3202_v26, %v3201_v1  ;;  %v3163_v26 = vld [vmem:[#allocation6] sm:$0x1] }
 0x3ba   : > { %v3005_v49 = vpop.f32.mrf.mxu2 }
 0x3bb   : > { %v3145_v20 = vpop.f32.mrf.mxu0  ;;  %v3018_v5 = vadd.f32 %v3005_v49, %v2964_v7 }
 0x3bc   : > { %v3159_v55 = vadd.f32 %v3145_v20, %v3097_v15 }
 0x3bd   : > { %v2956_v60 = vpop.f32.mrf.mxu1 }
 0x3be   : > { %v3171_v13 = vsel %vm2528_vm7, %v3159_v55, 0.0  ;;  %v3193_v14 = vmul.f32 %v3159_v55, %v3159_v55  ;;  %3226 = vst.msk [vmem:[%s5639_s19 + $0x40] sm:$0xff] %vm2528_vm7, %v3159_v55  ;;  %v2966_v32 = vadd.f32 %v2956_v60, %v2896_v3 }
 0x3bf   : > { %v3172_v42 = vadd.f32 %v3171_v13, %v3170_v33  ;;  %v3085_v30 = vpop.f32.mrf.mxu3 }
 0x3c0   : > { %v3204_v34 = vsel %vm2528_vm7, %v3193_v14, 0.0  ;;  %v3098_v63 = vadd.f32 %v3085_v30, %v3018_v5 }
 0x3c1   : > { %v3205_v58 = vadd.f32 %v3204_v34, %v3203_v8  ;;  %v3188_v8 = vld [vmem:[#allocation6 + $0x1] sm:$0x1] }
 0x3c2   : > { %v3008_v31 = vpop.f32.mrf.mxu2 }
 0x3c3   : > { %v3147_v21 = vpop.f32.mrf.mxu0  ;;  %v3019_v48 = vadd.f32 %v3008_v31, %v2965_v0 }
 0x3c4   : > { %v3160_v37 = vadd.f32 %v3147_v21, %v3098_v63 }
 0x3c6   : > { %v3173_v28 = vsel %vm2528_vm7, %v3160_v37, 0.0  ;;  %v3194_v10 = vmul.f32 %v3160_v37, %v3160_v37  ;;  %3227 = vst.msk [vmem:[%s5639_s19 + $0x48] sm:$0xff] %vm2528_vm7, %v3160_v37 }
 0x3c7   : > { %v3174_v61 = vadd.f32 %v3173_v28, %v3172_v42  ;;  %v3088_v46 = vpop.f32.mrf.mxu3 }
 0x3c8   : > { %v3206_v4 = vsel %vm2528_vm7, %v3194_v10, 0.0  ;;  %v3099_v39 = vadd.f32 %v3088_v46, %v3019_v48 }
 0x3c9   : > { %v3207_v16 = vadd.f32 %v3206_v4, %v3205_v58 }
 0x3ca   : > { %v3010_v18 = vpop.f32.mrf.mxu2 }
 0x3cb   : > { %v3150_v25 = vpop.f32.mrf.mxu0  ;;  %v3020_v35 = vadd.f32 %v3010_v18, %v2966_v32 }
 0x3cc   : > { %v3161_v19 = vadd.f32 %v3150_v25, %v3099_v39 }
 0x3ce   : > { %v3175_v51 = vsel %vm2528_vm7, %v3161_v19, 0.0  ;;  %v3195_v38 = vmul.f32 %v3161_v19, %v3161_v19  ;;  %3228 = vst.msk [vmem:[%s5639_s19 + $0x50] sm:$0xff] %vm2528_vm7, %v3161_v19 }
 0x3cf   : > { %v3176_v47 = vadd.f32 %v3175_v51, %v3174_v61  ;;  %v3090_v53 = vpop.f32.mrf.mxu3 }
 0x3d0   : > { %v3208_v43 = vsel %vm2528_vm7, %v3195_v38, 0.0  ;;  %v3100_v12 = vadd.f32 %v3090_v53, %v3020_v35 }
 0x3d1   : > { %v3209_v9 = vadd.f32 %v3208_v43, %v3207_v16 }
 0x3d3   : > { %v3152_v54 = vpop.f32.mrf.mxu0 }
 0x3d4   : > { %v3162_v2 = vadd.f32 %v3152_v54, %v3100_v12 }
 0x3d6   : > { %v3177_v1 = vsel %vm2528_vm7, %v3162_v2, 0.0  ;;  %v3196_v57 = vmul.f32 %v3162_v2, %v3162_v2  ;;  %3229 = vst.msk [vmem:[%s5639_s19 + $0x58] sm:$0xff] %vm2528_vm7, %v3162_v2 }
 0x3d7   : > { %v3178_v59 = vadd.f32 %v3177_v1, %v3176_v47 }
 0x3d8   : > { %v3210_v41 = vsel %vm2528_vm7, %v3196_v57, 0.0 }
 0x3d9   : > { %v3179_v24 = vrot.slane %v3178_v59, 4  ;;  %v3211_v56 = vadd.f32 %v3210_v41, %v3209_v9 }
 0x3db   : > { %v3180_v11 = vadd.f32 %v3179_v24, %v3178_v59  ;;  %v3212_v40 = vrot.slane %v3211_v56, 4 }
 0x3dd   : > { %v3181_v23 = vrot.slane %v3180_v11, 2  ;;  %v3213_v52 = vadd.f32 %v3212_v40, %v3211_v56 }
 0x3df   : > { %v3182_v22 = vadd.f32 %v3181_v23, %v3180_v11  ;;  %v3214_v33 = vrot.slane %v3213_v52, 2 }
 0x3e1   : > { %v3183_v50 = vrot.slane %v3182_v22, 1  ;;  %v3215_v36 = vadd.f32 %v3214_v33, %v3213_v52 }
 0x3e3   : > { %v3184_v15 = vadd.f32 %v3183_v50, %v3182_v22  ;;  %v3216_v45 = vrot.slane %v3215_v36, 1 }
 0x3e5   : > { %v3185_v7 = vadd.f32 %v3184_v15, %v3163_v26  ;;  %v3217_v49 = vadd.f32 %v3216_v45, %v3215_v36 }
 0x3e7   : > { %3187 = vst.msk [vmem:[#allocation6] sm:$0x1] %vm3186_vm3, %v3185_v7  ;;  %v3218_v20 = vadd.f32 %v3217_v49, %v3188_v8 }
 0x3e9   : > { %3219 = vst.msk [vmem:[#allocation6 + $0x1] sm:$0x1] %vm3186_vm3, %v3218_v20 }
 0x3ea PF: > { %p3798_p10 = scmp.ne.s32.totalorder %s4031_s29, 3 }
 0x3eb   : > { %s3827_s18 = sshll.u32 (!%p3798_p10), %s4027_s28, 5 }
 0x3ec   : > { %3233 = sbr.rel (%p3798_p10) target bundleno = 1058 (0x422), region = 109  ;;  %s3258_s15 = scalar_lea.vmem (!%p3798_p10), [#allocation4], %s3827_s18 }
 0x3f1   : > { %v3234_v29 = vld [vmem:[#allocation6] sm:$0x1]  ;;  %v3236_v55 = vld [vmem:[#allocation6 + $0x1] sm:$0x1]  ;;  %v3241_v58 = vld [vmem:[%s5763_s5] sm:$0x1] }
 0x3f2   : > { %v3235_v5 = vmul.f32 0.0078125, %v3234_v29  ;;  %v3237_v62 = vmul.f32 0.0078125, %v3236_v55  ;;  %v3254_v44 = vld [vmem:[%s5764_s6] sm:$0x1]  ;;  %v3260_v48 = vld [vmem:[%s3258_s15 + $0x8] sm:$0xff]  ;;  %v3261_v28 = vld [vmem:[%s3258_s15 + $0x10] sm:$0xff] }
 0x3f3   : > { %v3259_v37 = vld [vmem:[%s3258_s15] sm:$0xff]  ;;  %v3262_v46 = vld [vmem:[%s3258_s15 + $0x18] sm:$0xff]  ;;  %v3264_v4 = vld [vmem:[%s3258_s15 + $0x48] sm:$0xff]  ;;  %vm3297_vm13 = vcmask 64512  }
 0x3f4   : > { %v3238_v27 = vmul.f32 %v3235_v5, %v3235_v5  ;;  %v3263_v60 = vld [vmem:[%s3258_s15 + $0x40] sm:$0xff]  ;;  %v3265_v39 = vld [vmem:[%s3258_s15 + $0x50] sm:$0xff]  ;;  %v3266_v25 = vld [vmem:[%s3258_s15 + $0x58] sm:$0xff] }
 0x3f6   : > { %v3239_v13 = vsub.f32 %v3237_v62, %v3238_v27 }
 0x3f8   : > { %v3240_v14 = vmax.f32 %v3239_v13, 0.0 }
 0x3fa   : > { %v3242_v42 = vadd.f32 1e-05, %v3240_v14 }
 0x3fc   : > { %3971 = vrsqrt.f32 %v3242_v42  ;;  %vm3249_vm7 = vweird.f32 %v3242_v42 }
 0x402   : > { %v3972_v30 = vpop.eup %3971 }
 0x403   : > { %v3244_v6 = vmul.f32 %v3972_v30, %v3242_v42  ;;  %vm3250_vm11 = vweird.f32 %v3972_v30 }
 0x404   : > { %vm3251_vm12 = vmor %vm3249_vm7, %vm3250_vm11 }
 0x405   : > { %v3245_v34 = vmul.f32 %v3972_v30, %v3244_v6 }
 0x407   : > { %v3246_v63 = vmul.f32 0.5, %v3245_v34 }
 0x409   : > { %v3247_v17 = vsub.f32 1.5, %v3246_v63 }
 0x40b   : > { %v3248_v0 = vmul.f32 %v3972_v30, %v3247_v17 }
 0x40d   : > { %v3252_v31 = vsel %vm3251_vm12, %v3972_v30, %v3248_v0 }
 0x40e   : > { %v3253_v21 = vmul.f32 %v3252_v31, %v3241_v58 }
 0x410   : > { %v3255_v10 = vmul.f32 %v3253_v21, %v3235_v5  ;;  %v3268_v61 = vperm.slane %v3253_v21, 0 }
 0x412   : > { %v3256_v3 = vsub.f32 %v3254_v44, %v3255_v10  ;;  %v3270_v16 = vmul.f32 %v3268_v61, %v3259_v37  ;;  %v3271_v32 = vmul.f32 %v3268_v61, %v3260_v48  ;;  %v3272_v18 = vmul.f32 %v3268_v61, %v3261_v28 }
 0x413   : > { %v3273_v19 = vmul.f32 %v3268_v61, %v3262_v46  ;;  %v3274_v35 = vmul.f32 %v3268_v61, %v3263_v60  ;;  %v3275_v51 = vmul.f32 %v3268_v61, %v3264_v4  ;;  %v3276_v47 = vmul.f32 %v3268_v61, %v3265_v39 }
 0x414   : > { %v3279_v38 = vperm.slane %v3256_v3, 0  ;;  %v3277_v53 = vmul.f32 %v3268_v61, %v3266_v25 }
 0x416   : > { %v3281_v43 = vadd.f32 %v3279_v38, %v3270_v16  ;;  %v3282_v12 = vadd.f32 %v3279_v38, %v3271_v32  ;;  %v3283_v9 = vadd.f32 %v3279_v38, %v3272_v18  ;;  %v3284_v54 = vadd.f32 %v3279_v38, %v3273_v19 }
 0x417   : > { %v3285_v2 = vadd.f32 %v3279_v38, %v3274_v35  ;;  %v3286_v1 = vadd.f32 %v3279_v38, %v3275_v51  ;;  %v3287_v24 = vadd.f32 %v3279_v38, %v3276_v47  ;;  %v3288_v11 = vadd.f32 %v3279_v38, %v3277_v53 }
 0x418   : > { %v3289_v57 = vmax.f32 %v3281_v43, 0.0  ;;  %v3290_v59 = vmax.f32 %v3282_v12, 0.0  ;;  %v3291_v41 = vmax.f32 %v3283_v9, 0.0  ;;  %v3292_v56 = vmax.f32 %v3284_v54, 0.0 }
 0x419   : > { %v3293_v40 = vmax.f32 %v3285_v2, 0.0  ;;  %v3294_v23 = vmax.f32 %v3286_v1, 0.0  ;;  %v3295_v52 = vmax.f32 %v3287_v24, 0.0  ;;  %v3296_v22 = vmax.f32 %v3288_v11, 0.0 }
 0x41a   : > { %3298 = vst.msk [vmem:[%s4190_s10] sm:$0xff] %vm3297_vm13, %v3289_v57 }
 0x41b   : > { %3299 = vst.msk [vmem:[%s4190_s10 + $0x8] sm:$0xff] %vm3297_vm13, %v3290_v59 }
 0x41c   : > { %3300 = vst.msk [vmem:[%s4190_s10 + $0x10] sm:$0xff] %vm3297_vm13, %v3291_v41 }
 0x41d   : > { %3301 = vst.msk [vmem:[%s4190_s10 + $0x18] sm:$0xff] %vm3297_vm13, %v3292_v56 }
 0x41e   : > { %3302 = vst.msk [vmem:[%s4190_s10 + $0x20] sm:$0xff] %vm3297_vm13, %v3293_v40 }
 0x41f   : > { %3303 = vst.msk [vmem:[%s4190_s10 + $0x28] sm:$0xff] %vm3297_vm13, %v3294_v23 }
 0x420   : > { %3304 = vst.msk [vmem:[%s4190_s10 + $0x30] sm:$0xff] %vm3297_vm13, %v3295_v52 }
 0x421   : > { %3305 = vst.msk [vmem:[%s4190_s10 + $0x38] sm:$0xff] %vm3297_vm13, %v3296_v22 }
 0x422 PF: > { %3312 = sbr.rel (!%p4169_p13) target bundleno = 1074 (0x432), region = 113  ;;  %p3313_p11 = scmp.eq.s32.totalorder (%p4169_p13), %s4031_s29, 3  ;;  %v3360_v33 = vld [vmem:[%s4190_s10] sm:$0xff] (%p4169_p13)  ;;  %v3362_v50 = vld [vmem:[%s4190_s10 + $0x8] sm:$0xff] (%p4169_p13) }
 0x423   : > { %v3364_v36 = vld [vmem:[%s4190_s10 + $0x10] sm:$0xff] (%p4169_p13) }
 0x424   : > { %v3366_v26 = vld [vmem:[%s4190_s10 + $0x18] sm:$0xff] (%p4169_p13) }
 0x425   : > { %v3368_v15 = vld [vmem:[%s4190_s10 + $0x20] sm:$0xff] (%p4169_p13) }
 0x426   : > { %v3370_v45 = vld [vmem:[%s4190_s10 + $0x28] sm:$0xff] (%p4169_p13) }
 0x427   : > { %s5837_s28 = smov (!%p3313_p11, %s4027_s28), 0  ;;  %v3372_v8 = vld [vmem:[%s4190_s10 + $0x30] sm:$0xff] }
 0x428   : > { %s3828_s14 = sshll.u32 %s5837_s28, 5  ;;  %v3374_v7 = vld [vmem:[%s4190_s10 + $0x38] sm:$0xff] }
 0x429   : > { %s3317_s8 = scalar_lea.vmem %s5765_s7, %s3828_s14 }
 0x42a   : > { %3361 = vst [vmem:[%s3317_s8] sm:$0xff] %v3360_v33 }
 0x42b   : > { %3363 = vst [vmem:[%s3317_s8 + $0x8] sm:$0xff] %v3362_v50 }
 0x42c   : > { %3365 = vst [vmem:[%s3317_s8 + $0x10] sm:$0xff] %v3364_v36 }
 0x42d   : > { %3367 = vst [vmem:[%s3317_s8 + $0x18] sm:$0xff] %v3366_v26 }
 0x42e   : > { %3369 = vst [vmem:[%s3317_s8 + $0x40] sm:$0xff] %v3368_v15 }
 0x42f   : > { %3371 = vst [vmem:[%s3317_s8 + $0x48] sm:$0xff] %v3370_v45 }
 0x430   : > { %3373 = vst [vmem:[%s3317_s8 + $0x50] sm:$0xff] %v3372_v8 }
 0x431   : > { %3375 = vst [vmem:[%s3317_s8 + $0x58] sm:$0xff] %v3374_v7 }
 0x432 PF: > { %s17_s9 = sadd.s32 1, %s4043_s9   ;;  %s5822_s29 = sld [smem:[#allocation9_spill]] }
 0x433   : > { %p14_p12 = scmp.ge.s32.totalorder %s17_s9, 10   ;;  %s5823_s24 = smov %s4015_s25 }
 0x434   : > { %s5824_s25 = smov %s4167_s23  ;;  %s5825_s26 = smov %s4023_s27 }
 0x435   : > { %s5826_s27 = smov %s4164_s22  ;;  %s5827_s28 = smov %s4035_s30 }
 0x436   : > { %s5828_s30 = smov %s5831_s11  ;;  %s5829_s8 = smov %s5835_s12 }
 0x437   :  { %16 = sbr.rel (!%p14_p12) target bundleno = 5 (0x5), region = 206 }

</bundles_post_ra>
